<compile_context>
chip_gen: v7x
topology: tpu7x:2x2x1
jax: 0.10.0
libtpu: 0.0.40
codegen_flags: <defaults>
</compile_context>

<pallas_src>
import numpy as np
import jax
import jax.numpy as jnp
from jax.experimental import pallas as pl
from jax.experimental.pallas import tpu as pltpu

BN_EPS = 1e-5


# ----------------------------------------------------------------------------
# Single fused kernel: 2 directional sweeps + 2 train-mode BN+ReLU + folded
# linear tail + sigmoid.
# ----------------------------------------------------------------------------
def _rscnn_fused_kernel(x_ref, wct_ref, gamma_ref, beta_ref, ww2_ref, bmat_ref,
                        o_ref, s_ref):
    # x_ref  : (W, M, C) f32   input columns (M = B*H), computation order
    # wct_ref: (C, C)    bf16  message-conv center tap, transposed
    # gamma/beta: (1, C) f32   bn1 affine
    # ww2_ref: (W, C, 3) bf16  folded tail weights (kw/conv2/C->1 conv), flipped
    #                          to computation order (column reversal folded in)
    # bmat_ref: (3, 8H, H) f32 folded (shift_kh o U3@U2) @ U1 row-mix matrices
    # o_ref  : (B, 8H, 1) f32  sigmoid logits
    # s_ref  : (W, M, C) f32   working buffer (holds sweep outputs in place)
    Wd, M, C = x_ref.shape
    B, H8, _ = o_ref.shape
    Hd = bmat_ref.shape[2]
    inv_n = 1.0 / float(Wd * M)

    wct = wct_ref[...]          # bf16 MXU weights, constant across the sweep
    gamma = gamma_ref[...]
    beta = beta_ref[...]

    # ---- sweep 1 (reverse=False), stored in computation order: s[i]=out1[i] --
    col0 = x_ref[0]
    s_ref[0] = col0

    def sweep1(i, prev_bf16):
        msg = jnp.maximum(
            jnp.dot(prev_bf16, wct, preferred_element_type=jnp.float32), 0.0)
        cur = x_ref[i] + msg
        s_ref[i] = cur
        return cur.astype(jnp.bfloat16)      # bf16 carry: half the vreg footprint

    jax.lax.fori_loop(1, Wd, sweep1, col0.astype(jnp.bfloat16), unroll=True)

    # ---- BN statistics: vectorized per-column reduction (off the serial path)
    def stats_body(i, carry):
        ssum, ssq = carry
        col = s_ref[i]
        return (ssum + jnp.sum(col, axis=0, keepdims=True),
                ssq + jnp.sum(col * col, axis=0, keepdims=True))

    zsum = jnp.zeros((1, C), jnp.float32)
    sum1, sq1 = jax.lax.fori_loop(0, Wd, stats_body, (zsum, zsum), unroll=True)
    mean1 = sum1 * inv_n
    var1 = jnp.maximum(sq1 * inv_n - mean1 * mean1, 0.0)
    a1 = gamma * jax.lax.rsqrt(var1 + BN_EPS)
    b1 = beta - mean1 * a1

    # ---- sweep 2 (reverse=True): slices2[i] == bn1_relu(out1[i]) — in place --
    c0 = jnp.maximum(s_ref[0] * a1 + b1, 0.0)
    s_ref[0] = c0

    def sweep2(i, prev_bf16):
        msg = jnp.maximum(
            jnp.dot(prev_bf16, wct, preferred_element_type=jnp.float32), 0.0)
        cur = jnp.maximum(s_ref[i] * a1 + b1, 0.0) + msg
        s_ref[i] = cur                       # out1[i] consumed this step: safe
        return cur.astype(jnp.bfloat16)

    jax.lax.fori_loop(1, Wd, sweep2, c0.astype(jnp.bfloat16), unroll=True)

    sum2, sq2 = jax.lax.fori_loop(0, Wd, stats_body, (zsum, zsum), unroll=True)
    mean2 = sum2 * inv_n
    var2 = jnp.maximum(sq2 * inv_n - mean2 * mean2, 0.0)
    a2 = gamma * jax.lax.rsqrt(var2 + BN_EPS)
    b2 = beta - mean2 * a2

    # ---- fused tail, part 1: bn2+relu and per-column C-contraction ----------
    #   r[m, kh] = sum_i bn2relu(s[i])[m, :] @ ww2_flip[i][:, kh]
    # Columns never leave VMEM; no (W, B*H, C) HBM round trip.
    def tail_body(i, r):
        z = jnp.maximum(s_ref[i] * a2 + b2, 0.0).astype(jnp.bfloat16)
        return r + jnp.dot(z, ww2_ref[i], preferred_element_type=jnp.float32)

    r = jax.lax.fori_loop(0, Wd, tail_body,
                          jnp.zeros((M, 3), jnp.float32), unroll=True)

    # ---- fused tail, part 2: folded row-mix (upsamples + conv_up2 kh taps)
    # and sigmoid.  B is static and small -> static per-batch loop with tiny
    # (8H, H) @ (H, 1) matmuls.
    for b in range(B):
        rb = r[b * Hd:(b + 1) * Hd, :]                      # (H, 3) static slice
        acc = jnp.zeros((H8, 1), jnp.float32)
        for kh in range(3):                                 # 3 static conv-H taps
            acc = acc + jnp.dot(bmat_ref[kh], rb[:, kh:kh + 1],
                                preferred_element_type=jnp.float32)
        o_ref[b] = 1.0 / (1.0 + jnp.exp(-acc))              # sigmoid


def r_scnn_fused(x_cols, wct_bf16, gamma, beta, ww2f, bmat, B):
    Wd, M, C = x_cols.shape
    H8 = bmat.shape[1]
    return pl.pallas_call(
        _rscnn_fused_kernel,
        out_shape=jax.ShapeDtypeStruct((B, H8, 1), jnp.float32),
        in_specs=[pl.BlockSpec(memory_space=pltpu.MemorySpace.VMEM)
                  for _ in range(6)],
        out_specs=pl.BlockSpec(memory_space=pltpu.MemorySpace.VMEM),
        scratch_shapes=[pltpu.VMEM((Wd, M, C), jnp.float32)],
        # Only two large residents remain (x slab + working slab, ~7.4 MB each
        # at production C=256, W~100): 48 MiB keeps headroom on v7x (64 MiB
        # physical); v5e/v6e (128 MiB) have plenty of slack.  For much larger
        # B*H, x could be streamed from HBM with double-buffered
        # make_async_copy instead of holding the full slab.
        compiler_params=pltpu.CompilerParams(vmem_limit_bytes=48 * 1024 * 1024),
    )(x_cols, wct_bf16, gamma, beta, ww2f, bmat)


# ----------------------------------------------------------------------------
# Full forward (glue = input layout transform + host-side weight folding)
# ----------------------------------------------------------------------------
def r_scnn_forward(x, params):
    B, C, H, W = x.shape
    mid = params["ms_ks"] // 2
    wct = params["w_msg"][:, :, 0, mid].T.astype(jnp.bfloat16)   # (Cin, Cout)
    gamma = params["bn1_gamma"].reshape(1, C).astype(jnp.float32)
    beta = params["bn1_beta"].reshape(1, C).astype(jnp.float32)

    # (W, B*H, C) column layout: each recurrence step is a (B*H,C)@(C,C) matmul
    x_cols = jnp.transpose(x, (3, 0, 2, 1)).reshape(W, B * H, C)

    # ---- fold the entire linear tail into two small weight tensors ----------
    u1, u2, u3 = params["u1"], params["u2"], params["u3"]    # (2H,H)(4H,2H)(8H,4H)
    wc = params["w_conv"][0, :, 0, 0]                        # (C,)  1x1 conv C->1
    w2 = params["w_conv2"][0, :, 0, 0]                       # (W,)  1x1 conv W->1

    # conv_up2 folded with the C->1 conv: weff[kh,kw,ci] = sum_o wc[o]*Wup[o,ci,kh,kw]
    weff = jnp.einsum("o,oikl->kli", wc, params["w_up2"])    # (3, 3, C)

    # W-contraction (conv2) pulled through the 3x3 conv's kw taps (zero pad):
    zero1 = jnp.zeros((1,), w2.dtype)
    vs = jnp.stack([jnp.concatenate([w2[1:], zero1]),        # kw = 0  (w-1 tap)
                    w2,                                       # kw = 1  (center)
                    jnp.concatenate([zero1, w2[:-1]])],       # kw = 2  (w+1 tap)
                   axis=1)                                    # (W, 3)
    ww2 = jnp.einsum("wk,jkc->wcj", vs, weff)                 # (W, C, 3)
    # Fold the module's final column reversal: computation index i corresponds
    # to module column W-1-i, so flip along W.  bf16 MXU operand.
    ww2f = ww2[::-1].astype(jnp.bfloat16)                     # (W, C, 3)

    # H side: compose u2,u3, fold the kh shift of the 3x3 conv, compose with u1
    u32 = u3 @ u2                                             # (8H, 2H)
    zc = jnp.zeros((u32.shape[0], 1), u32.dtype)
    a_kh = [jnp.concatenate([u32[:, 1:], zc], axis=1),        # kh = 0
            u32,                                              # kh = 1
            jnp.concatenate([zc, u32[:, :-1]], axis=1)]       # kh = 2
    bmat = jnp.stack([a @ u1 for a in a_kh], axis=0)          # (3, 8H, H)

    out = r_scnn_fused(x_cols, wct, gamma, beta, ww2f, bmat, B)   # (B, 8H, 1)
    return out.reshape(B, 1, 8 * H, 1)                            # NCHW output


# ----------------------------------------------------------------------------
# Pure-JAX reference (mirrors the PyTorch forward, original op order)
# ----------------------------------------------------------------------------
def _r_scnn_ref(x, w_center, reverse):
    B, C, H, W = x.shape
    slices = [x[:, :, :, i] for i in range(W)]
    if reverse:
        slices = slices[::-1]
    out = [slices[0]]
    for i in range(1, W):
        msg = jnp.maximum(jnp.einsum("oc,bch->boh", w_center, out[i - 1]), 0.0)
        out.append(slices[i] + msg)
    out = out[::-1]
    return jnp.stack(out, axis=3)


def _bn_relu_ref(x, gamma, beta):
    mean = jnp.mean(x, axis=(0, 2, 3), keepdims=True)
    var = jnp.mean((x - mean) ** 2, axis=(0, 2, 3), keepdims=True)
    y = (x - mean) * jax.lax.rsqrt(var + BN_EPS)
    y = y * gamma.reshape(1, -1, 1, 1) + beta.reshape(1, -1, 1, 1)
    return jnp.maximum(y, 0.0)


def _upsample_ref(x, u):
    return jnp.einsum("oh,bchw->bcow", u, x)


def forward_ref(x, params):
    mid = params["ms_ks"] // 2
    wc = params["w_msg"][:, :, 0, mid]
    y = _r_scnn_ref(x, wc, False)
    y = _bn_relu_ref(y, params["bn1_gamma"], params["bn1_beta"])
    y = _r_scnn_ref(y, wc, True)
    y = _bn_relu_ref(y, params["bn1_gamma"], params["bn1_beta"])
    y = _upsample_ref(y, params["u1"])
    y = jax.lax.conv_general_dilated(
        y, params["w_up2"], (1, 1), ((1, 1), (1, 1)),
        dimension_numbers=("NCHW", "OIHW", "NCHW"))
    y = _upsample_ref(y, params["u2"])
    y = jnp.einsum("oc,bchw->bohw", params["w_conv"][:, :, 0, 0], y)
    y = _upsample_ref(y, params["u3"])
    y = jnp.transpose(y, (0, 3, 2, 1))
    y = jnp.einsum("ow,bwhc->bohc", params["w_conv2"][:, :, 0, 0], y)
    return jax.nn.sigmoid(y)


def upsample_matrix(hi, ho):
    """F.interpolate(mode='bilinear', align_corners=True) row-interp matrix."""
    u = np.zeros((ho, hi), np.float32)
    for o in range(ho):
        src = o * (hi - 1) / (ho - 1) if ho > 1 else 0.0
        lo = int(np.floor(src))
        hi_idx = min(lo + 1, hi - 1)
        frac = src - lo
        u[o, lo] += 1.0 - frac
        u[o, hi_idx] += frac
    return u


if __name__ == "__main__":
    # Small stand-in shapes: C=32 replaces 256, W=8 replaces 25 (conv2's
    # in_channels must equal the input width, as in the original forward).
    B, C, H, W = 2, 32, 8, 8
    ms_ks = 9

    key = jax.random.PRNGKey(0)
    ks = jax.random.split(key, 7)
    params = dict(
        ms_ks=ms_ks,
        w_msg=0.05 * jax.random.normal(ks[0], (C, C, 1, ms_ks), jnp.float32),
        bn1_gamma=1.0 + 0.1 * jax.random.normal(ks[1], (C,), jnp.float32),
        bn1_beta=0.1 * jax.random.normal(ks[2], (C,), jnp.float32),
        w_up2=0.1 * jax.random.normal(ks[3], (C, C, 3, 3), jnp.float32),
        w_conv=0.1 * jax.random.normal(ks[4], (1, C, 1, 1), jnp.float32),
        w_conv2=0.3 * jax.random.normal(ks[5], (1, W, 1, 1), jnp.float32),
        u1=jnp.asarray(upsample_matrix(H, 2 * H)),
        u2=jnp.asarray(upsample_matrix(2 * H, 4 * H)),
        u3=jnp.asarray(upsample_matrix(4 * H, 8 * H)),
    )
    x = jax.random.normal(ks[6], (B, C, H, W), jnp.float32)

    out = jax.block_until_ready(r_scnn_forward(x, params))
    ref = jax.block_until_ready(forward_ref(x, params))

    assert out.shape == (B, 1, 8 * H, 1), out.shape
    np.testing.assert_allclose(np.asarray(out), np.asarray(ref),
                               rtol=2e-2, atol=2e-2)
    print("KERNEL_OK")
</pallas_src>

<mosaic_0001>
module attributes {stable_mosaic.version = 11 : i64} {
  func.func @_rscnn_fused_kernel(%arg0: memref<8x16x32xf32, #tpu.memory_space<vmem>>, %arg1: memref<32x32xbf16, #tpu.memory_space<vmem>>, %arg2: memref<1x32xf32, #tpu.memory_space<vmem>>, %arg3: memref<1x32xf32, #tpu.memory_space<vmem>>, %arg4: memref<8x32x3xbf16, #tpu.memory_space<vmem>>, %arg5: memref<3x64x8xf32, #tpu.memory_space<vmem>>, %arg6: memref<2x64x1xf32, #tpu.memory_space<vmem>>, %arg7: memref<8x16x32xf32, #tpu.memory_space<vmem>>) attributes {dimension_semantics = [], scalar_prefetch = 0 : i64, scratch_operands = 1 : i64, tpu.core_type = #tpu.core_type<tc>} {
    %c0 = arith.constant 0 : index
    %c0_0 = arith.constant 0 : index
    %0 = vector.load %arg1[%c0, %c0_0] : memref<32x32xbf16, #tpu.memory_space<vmem>>, vector<32x32xbf16>
    %c0_1 = arith.constant 0 : index
    %c0_2 = arith.constant 0 : index
    %1 = vector.load %arg2[%c0_1, %c0_2] : memref<1x32xf32, #tpu.memory_space<vmem>>, vector<1x32xf32>
    %c0_3 = arith.constant 0 : index
    %c0_4 = arith.constant 0 : index
    %2 = vector.load %arg3[%c0_3, %c0_4] : memref<1x32xf32, #tpu.memory_space<vmem>>, vector<1x32xf32>
    %c0_5 = arith.constant 0 : index
    %c0_6 = arith.constant 0 : index
    %c0_7 = arith.constant 0 : index
    %3 = vector.load %arg0[%c0_5, %c0_6, %c0_7] : memref<8x16x32xf32, #tpu.memory_space<vmem>>, vector<1x16x32xf32>
    %4 = vector.shape_cast %3 : vector<1x16x32xf32> to vector<16x32xf32>
    %c0_8 = arith.constant 0 : index
    %c0_9 = arith.constant 0 : index
    %c0_10 = arith.constant 0 : index
    %5 = vector.load %arg7[%c0_8, %c0_9, %c0_10] : memref<8x16x32xf32, #tpu.memory_space<vmem>>, vector<1x16x32xf32>
    %6 = vector.shape_cast %5 : vector<1x16x32xf32> to vector<16x32xf32>
    %7 = vector.shape_cast %4 : vector<16x32xf32> to vector<1x16x32xf32>
    tpu.vector_store %arg7[%c0_8, %c0_9, %c0_10], %7 {strides = array<i32>} : memref<8x16x32xf32, #tpu.memory_space<vmem>>, vector<1x16x32xf32>,
    %8 = arith.truncf %4 : vector<16x32xf32> to vector<16x32xbf16>
    %c1_i32 = arith.constant 1 : i32
    %cst = arith.constant dense<0.000000e+00> : vector<16x32xf32>
    %9 = tpu.matmul %8, %0, %cst {dimension_numbers = #tpu.dot_dimension_numbers<[1], [0], [0], [1], [0, 0, 1, 1], [], []>} : vector<16x32xbf16>, vector<32x32xbf16>, vector<16x32xf32> -> vector<16x32xf32>
    %cst_11 = arith.constant 0.000000e+00 : f32
    %10 = vector.broadcast %cst_11 : f32 to vector<16x32xf32>
    %11 = arith.maximumf %9, %10 : vector<16x32xf32>
    %12 = arith.index_cast %c1_i32 : i32 to index
    %c0_12 = arith.constant 0 : index
    %c0_13 = arith.constant 0 : index
    %13 = vector.load %arg0[%12, %c0_12, %c0_13] : memref<8x16x32xf32, #tpu.memory_space<vmem>>, vector<1x16x32xf32>
    %14 = vector.shape_cast %13 : vector<1x16x32xf32> to vector<16x32xf32>
    %15 = arith.addf %14, %11 : vector<16x32xf32>
    %16 = arith.index_cast %c1_i32 : i32 to index
    %c0_14 = arith.constant 0 : index
    %c0_15 = arith.constant 0 : index
    %17 = vector.load %arg7[%16, %c0_14, %c0_15] : memref<8x16x32xf32, #tpu.memory_space<vmem>>, vector<1x16x32xf32>
    %18 = vector.shape_cast %17 : vector<1x16x32xf32> to vector<16x32xf32>
    %19 = vector.shape_cast %15 : vector<16x32xf32> to vector<1x16x32xf32>
    tpu.vector_store %arg7[%16, %c0_14, %c0_15], %19 {strides = array<i32>} : memref<8x16x32xf32, #tpu.memory_space<vmem>>, vector<1x16x32xf32>,
    %20 = arith.truncf %15 : vector<16x32xf32> to vector<16x32xbf16>
    %c2_i32 = arith.constant 2 : i32
    %cst_16 = arith.constant dense<0.000000e+00> : vector<16x32xf32>
    %21 = tpu.matmul %20, %0, %cst_16 {dimension_numbers = #tpu.dot_dimension_numbers<[1], [0], [0], [1], [0, 0, 1, 1], [], []>} : vector<16x32xbf16>, vector<32x32xbf16>, vector<16x32xf32> -> vector<16x32xf32>
    %cst_17 = arith.constant 0.000000e+00 : f32
    %22 = vector.broadcast %cst_17 : f32 to vector<16x32xf32>
    %23 = arith.maximumf %21, %22 : vector<16x32xf32>
    %24 = arith.index_cast %c2_i32 : i32 to index
    %c0_18 = arith.constant 0 : index
    %c0_19 = arith.constant 0 : index
    %25 = vector.load %arg0[%24, %c0_18, %c0_19] : memref<8x16x32xf32, #tpu.memory_space<vmem>>, vector<1x16x32xf32>
    %26 = vector.shape_cast %25 : vector<1x16x32xf32> to vector<16x32xf32>
    %27 = arith.addf %26, %23 : vector<16x32xf32>
    %28 = arith.index_cast %c2_i32 : i32 to index
    %c0_20 = arith.constant 0 : index
    %c0_21 = arith.constant 0 : index
    %29 = vector.load %arg7[%28, %c0_20, %c0_21] : memref<8x16x32xf32, #tpu.memory_space<vmem>>, vector<1x16x32xf32>
    %30 = vector.shape_cast %29 : vector<1x16x32xf32> to vector<16x32xf32>
    %31 = vector.shape_cast %27 : vector<16x32xf32> to vector<1x16x32xf32>
    tpu.vector_store %arg7[%28, %c0_20, %c0_21], %31 {strides = array<i32>} : memref<8x16x32xf32, #tpu.memory_space<vmem>>, vector<1x16x32xf32>,
    %32 = arith.truncf %27 : vector<16x32xf32> to vector<16x32xbf16>
    %c3_i32 = arith.constant 3 : i32
    %cst_22 = arith.constant dense<0.000000e+00> : vector<16x32xf32>
    %33 = tpu.matmul %32, %0, %cst_22 {dimension_numbers = #tpu.dot_dimension_numbers<[1], [0], [0], [1], [0, 0, 1, 1], [], []>} : vector<16x32xbf16>, vector<32x32xbf16>, vector<16x32xf32> -> vector<16x32xf32>
    %cst_23 = arith.constant 0.000000e+00 : f32
    %34 = vector.broadcast %cst_23 : f32 to vector<16x32xf32>
    %35 = arith.maximumf %33, %34 : vector<16x32xf32>
    %36 = arith.index_cast %c3_i32 : i32 to index
    %c0_24 = arith.constant 0 : index
    %c0_25 = arith.constant 0 : index
    %37 = vector.load %arg0[%36, %c0_24, %c0_25] : memref<8x16x32xf32, #tpu.memory_space<vmem>>, vector<1x16x32xf32>
    %38 = vector.shape_cast %37 : vector<1x16x32xf32> to vector<16x32xf32>
    %39 = arith.addf %38, %35 : vector<16x32xf32>
    %40 = arith.index_cast %c3_i32 : i32 to index
    %c0_26 = arith.constant 0 : index
    %c0_27 = arith.constant 0 : index
    %41 = vector.load %arg7[%40, %c0_26, %c0_27] : memref<8x16x32xf32, #tpu.memory_space<vmem>>, vector<1x16x32xf32>
    %42 = vector.shape_cast %41 : vector<1x16x32xf32> to vector<16x32xf32>
    %43 = vector.shape_cast %39 : vector<16x32xf32> to vector<1x16x32xf32>
    tpu.vector_store %arg7[%40, %c0_26, %c0_27], %43 {strides = array<i32>} : memref<8x16x32xf32, #tpu.memory_space<vmem>>, vector<1x16x32xf32>,
    %44 = arith.truncf %39 : vector<16x32xf32> to vector<16x32xbf16>
    %c4_i32 = arith.constant 4 : i32
    %cst_28 = arith.constant dense<0.000000e+00> : vector<16x32xf32>
    %45 = tpu.matmul %44, %0, %cst_28 {dimension_numbers = #tpu.dot_dimension_numbers<[1], [0], [0], [1], [0, 0, 1, 1], [], []>} : vector<16x32xbf16>, vector<32x32xbf16>, vector<16x32xf32> -> vector<16x32xf32>
    %cst_29 = arith.constant 0.000000e+00 : f32
    %46 = vector.broadcast %cst_29 : f32 to vector<16x32xf32>
    %47 = arith.maximumf %45, %46 : vector<16x32xf32>
    %48 = arith.index_cast %c4_i32 : i32 to index
    %c0_30 = arith.constant 0 : index
    %c0_31 = arith.constant 0 : index
    %49 = vector.load %arg0[%48, %c0_30, %c0_31] : memref<8x16x32xf32, #tpu.memory_space<vmem>>, vector<1x16x32xf32>
    %50 = vector.shape_cast %49 : vector<1x16x32xf32> to vector<16x32xf32>
    %51 = arith.addf %50, %47 : vector<16x32xf32>
    %52 = arith.index_cast %c4_i32 : i32 to index
    %c0_32 = arith.constant 0 : index
    %c0_33 = arith.constant 0 : index
    %53 = vector.load %arg7[%52, %c0_32, %c0_33] : memref<8x16x32xf32, #tpu.memory_space<vmem>>, vector<1x16x32xf32>
    %54 = vector.shape_cast %53 : vector<1x16x32xf32> to vector<16x32xf32>
    %55 = vector.shape_cast %51 : vector<16x32xf32> to vector<1x16x32xf32>
    tpu.vector_store %arg7[%52, %c0_32, %c0_33], %55 {strides = array<i32>} : memref<8x16x32xf32, #tpu.memory_space<vmem>>, vector<1x16x32xf32>,
    %56 = arith.truncf %51 : vector<16x32xf32> to vector<16x32xbf16>
    %c5_i32 = arith.constant 5 : i32
    %cst_34 = arith.constant dense<0.000000e+00> : vector<16x32xf32>
    %57 = tpu.matmul %56, %0, %cst_34 {dimension_numbers = #tpu.dot_dimension_numbers<[1], [0], [0], [1], [0, 0, 1, 1], [], []>} : vector<16x32xbf16>, vector<32x32xbf16>, vector<16x32xf32> -> vector<16x32xf32>
    %cst_35 = arith.constant 0.000000e+00 : f32
    %58 = vector.broadcast %cst_35 : f32 to vector<16x32xf32>
    %59 = arith.maximumf %57, %58 : vector<16x32xf32>
    %60 = arith.index_cast %c5_i32 : i32 to index
    %c0_36 = arith.constant 0 : index
    %c0_37 = arith.constant 0 : index
    %61 = vector.load %arg0[%60, %c0_36, %c0_37] : memref<8x16x32xf32, #tpu.memory_space<vmem>>, vector<1x16x32xf32>
    %62 = vector.shape_cast %61 : vector<1x16x32xf32> to vector<16x32xf32>
    %63 = arith.addf %62, %59 : vector<16x32xf32>
    %64 = arith.index_cast %c5_i32 : i32 to index
    %c0_38 = arith.constant 0 : index
    %c0_39 = arith.constant 0 : index
    %65 = vector.load %arg7[%64, %c0_38, %c0_39] : memref<8x16x32xf32, #tpu.memory_space<vmem>>, vector<1x16x32xf32>
    %66 = vector.shape_cast %65 : vector<1x16x32xf32> to vector<16x32xf32>
    %67 = vector.shape_cast %63 : vector<16x32xf32> to vector<1x16x32xf32>
    tpu.vector_store %arg7[%64, %c0_38, %c0_39], %67 {strides = array<i32>} : memref<8x16x32xf32, #tpu.memory_space<vmem>>, vector<1x16x32xf32>,
    %68 = arith.truncf %63 : vector<16x32xf32> to vector<16x32xbf16>
    %c6_i32 = arith.constant 6 : i32
    %cst_40 = arith.constant dense<0.000000e+00> : vector<16x32xf32>
    %69 = tpu.matmul %68, %0, %cst_40 {dimension_numbers = #tpu.dot_dimension_numbers<[1], [0], [0], [1], [0, 0, 1, 1], [], []>} : vector<16x32xbf16>, vector<32x32xbf16>, vector<16x32xf32> -> vector<16x32xf32>
    %cst_41 = arith.constant 0.000000e+00 : f32
    %70 = vector.broadcast %cst_41 : f32 to vector<16x32xf32>
    %71 = arith.maximumf %69, %70 : vector<16x32xf32>
    %72 = arith.index_cast %c6_i32 : i32 to index
    %c0_42 = arith.constant 0 : index
    %c0_43 = arith.constant 0 : index
    %73 = vector.load %arg0[%72, %c0_42, %c0_43] : memref<8x16x32xf32, #tpu.memory_space<vmem>>, vector<1x16x32xf32>
    %74 = vector.shape_cast %73 : vector<1x16x32xf32> to vector<16x32xf32>
    %75 = arith.addf %74, %71 : vector<16x32xf32>
    %76 = arith.index_cast %c6_i32 : i32 to index
    %c0_44 = arith.constant 0 : index
    %c0_45 = arith.constant 0 : index
    %77 = vector.load %arg7[%76, %c0_44, %c0_45] : memref<8x16x32xf32, #tpu.memory_space<vmem>>, vector<1x16x32xf32>
    %78 = vector.shape_cast %77 : vector<1x16x32xf32> to vector<16x32xf32>
    %79 = vector.shape_cast %75 : vector<16x32xf32> to vector<1x16x32xf32>
    tpu.vector_store %arg7[%76, %c0_44, %c0_45], %79 {strides = array<i32>} : memref<8x16x32xf32, #tpu.memory_space<vmem>>, vector<1x16x32xf32>,
    %80 = arith.truncf %75 : vector<16x32xf32> to vector<16x32xbf16>
    %c7_i32 = arith.constant 7 : i32
    %cst_46 = arith.constant dense<0.000000e+00> : vector<16x32xf32>
    %81 = tpu.matmul %80, %0, %cst_46 {dimension_numbers = #tpu.dot_dimension_numbers<[1], [0], [0], [1], [0, 0, 1, 1], [], []>} : vector<16x32xbf16>, vector<32x32xbf16>, vector<16x32xf32> -> vector<16x32xf32>
    %cst_47 = arith.constant 0.000000e+00 : f32
    %82 = vector.broadcast %cst_47 : f32 to vector<16x32xf32>
    %83 = arith.maximumf %81, %82 : vector<16x32xf32>
    %84 = arith.index_cast %c7_i32 : i32 to index
    %c0_48 = arith.constant 0 : index
    %c0_49 = arith.constant 0 : index
    %85 = vector.load %arg0[%84, %c0_48, %c0_49] : memref<8x16x32xf32, #tpu.memory_space<vmem>>, vector<1x16x32xf32>
    %86 = vector.shape_cast %85 : vector<1x16x32xf32> to vector<16x32xf32>
    %87 = arith.addf %86, %83 : vector<16x32xf32>
    %88 = arith.index_cast %c7_i32 : i32 to index
    %c0_50 = arith.constant 0 : index
    %c0_51 = arith.constant 0 : index
    %89 = vector.load %arg7[%88, %c0_50, %c0_51] : memref<8x16x32xf32, #tpu.memory_space<vmem>>, vector<1x16x32xf32>
    %90 = vector.shape_cast %89 : vector<1x16x32xf32> to vector<16x32xf32>
    %91 = vector.shape_cast %87 : vector<16x32xf32> to vector<1x16x32xf32>
    tpu.vector_store %arg7[%88, %c0_50, %c0_51], %91 {strides = array<i32>} : memref<8x16x32xf32, #tpu.memory_space<vmem>>, vector<1x16x32xf32>,
    %92 = arith.truncf %87 : vector<16x32xf32> to vector<16x32xbf16>
    %c7_i32_52 = arith.constant 7 : i32
    %cst_53 = arith.constant 0.000000e+00 : f32
    %93 = vector.broadcast %cst_53 : f32 to vector<1x32xf32>
    %c0_i32 = arith.constant 0 : i32
    %94 = arith.index_cast %c0_i32 : i32 to index
    %c0_54 = arith.constant 0 : index
    %c0_55 = arith.constant 0 : index
    %95 = vector.load %arg7[%94, %c0_54, %c0_55] : memref<8x16x32xf32, #tpu.memory_space<vmem>>, vector<1x16x32xf32>
    %96 = vector.shape_cast %95 : vector<1x16x32xf32> to vector<16x32xf32>
    %cst_56 = arith.constant dense<0.000000e+00> : vector<32xf32>
    %97 = vector.multi_reduction <add>, %96, %cst_56 [0] : vector<16x32xf32> to vector<32xf32>
    %98 = vector.shape_cast %97 : vector<32xf32> to vector<1x32xf32>
    %99 = arith.addf %93, %98 : vector<1x32xf32>
    %100 = arith.mulf %96, %96 : vector<16x32xf32>
    %cst_57 = arith.constant dense<0.000000e+00> : vector<32xf32>
    %101 = vector.multi_reduction <add>, %100, %cst_57 [0] : vector<16x32xf32> to vector<32xf32>
    %102 = vector.shape_cast %101 : vector<32xf32> to vector<1x32xf32>
    %103 = arith.addf %93, %102 : vector<1x32xf32>
    %c1_i32_58 = arith.constant 1 : i32
    %104 = arith.index_cast %c1_i32_58 : i32 to index
    %c0_59 = arith.constant 0 : index
    %c0_60 = arith.constant 0 : index
    %105 = vector.load %arg7[%104, %c0_59, %c0_60] : memref<8x16x32xf32, #tpu.memory_space<vmem>>, vector<1x16x32xf32>
    %106 = vector.shape_cast %105 : vector<1x16x32xf32> to vector<16x32xf32>
    %cst_61 = arith.constant dense<0.000000e+00> : vector<32xf32>
    %107 = vector.multi_reduction <add>, %106, %cst_61 [0] : vector<16x32xf32> to vector<32xf32>
    %108 = vector.shape_cast %107 : vector<32xf32> to vector<1x32xf32>
    %109 = arith.addf %99, %108 : vector<1x32xf32>
    %110 = arith.mulf %106, %106 : vector<16x32xf32>
    %cst_62 = arith.constant dense<0.000000e+00> : vector<32xf32>
    %111 = vector.multi_reduction <add>, %110, %cst_62 [0] : vector<16x32xf32> to vector<32xf32>
    %112 = vector.shape_cast %111 : vector<32xf32> to vector<1x32xf32>
    %113 = arith.addf %103, %112 : vector<1x32xf32>
    %c2_i32_63 = arith.constant 2 : i32
    %114 = arith.index_cast %c2_i32_63 : i32 to index
    %c0_64 = arith.constant 0 : index
    %c0_65 = arith.constant 0 : index
    %115 = vector.load %arg7[%114, %c0_64, %c0_65] : memref<8x16x32xf32, #tpu.memory_space<vmem>>, vector<1x16x32xf32>
    %116 = vector.shape_cast %115 : vector<1x16x32xf32> to vector<16x32xf32>
    %cst_66 = arith.constant dense<0.000000e+00> : vector<32xf32>
    %117 = vector.multi_reduction <add>, %116, %cst_66 [0] : vector<16x32xf32> to vector<32xf32>
    %118 = vector.shape_cast %117 : vector<32xf32> to vector<1x32xf32>
    %119 = arith.addf %109, %118 : vector<1x32xf32>
    %120 = arith.mulf %116, %116 : vector<16x32xf32>
    %cst_67 = arith.constant dense<0.000000e+00> : vector<32xf32>
    %121 = vector.multi_reduction <add>, %120, %cst_67 [0] : vector<16x32xf32> to vector<32xf32>
    %122 = vector.shape_cast %121 : vector<32xf32> to vector<1x32xf32>
    %123 = arith.addf %113, %122 : vector<1x32xf32>
    %c3_i32_68 = arith.constant 3 : i32
    %124 = arith.index_cast %c3_i32_68 : i32 to index
    %c0_69 = arith.constant 0 : index
    %c0_70 = arith.constant 0 : index
    %125 = vector.load %arg7[%124, %c0_69, %c0_70] : memref<8x16x32xf32, #tpu.memory_space<vmem>>, vector<1x16x32xf32>
    %126 = vector.shape_cast %125 : vector<1x16x32xf32> to vector<16x32xf32>
    %cst_71 = arith.constant dense<0.000000e+00> : vector<32xf32>
    %127 = vector.multi_reduction <add>, %126, %cst_71 [0] : vector<16x32xf32> to vector<32xf32>
    %128 = vector.shape_cast %127 : vector<32xf32> to vector<1x32xf32>
    %129 = arith.addf %119, %128 : vector<1x32xf32>
    %130 = arith.mulf %126, %126 : vector<16x32xf32>
    %cst_72 = arith.constant dense<0.000000e+00> : vector<32xf32>
    %131 = vector.multi_reduction <add>, %130, %cst_72 [0] : vector<16x32xf32> to vector<32xf32>
    %132 = vector.shape_cast %131 : vector<32xf32> to vector<1x32xf32>
    %133 = arith.addf %123, %132 : vector<1x32xf32>
    %c4_i32_73 = arith.constant 4 : i32
    %134 = arith.index_cast %c4_i32_73 : i32 to index
    %c0_74 = arith.constant 0 : index
    %c0_75 = arith.constant 0 : index
    %135 = vector.load %arg7[%134, %c0_74, %c0_75] : memref<8x16x32xf32, #tpu.memory_space<vmem>>, vector<1x16x32xf32>
    %136 = vector.shape_cast %135 : vector<1x16x32xf32> to vector<16x32xf32>
    %cst_76 = arith.constant dense<0.000000e+00> : vector<32xf32>
    %137 = vector.multi_reduction <add>, %136, %cst_76 [0] : vector<16x32xf32> to vector<32xf32>
    %138 = vector.shape_cast %137 : vector<32xf32> to vector<1x32xf32>
    %139 = arith.addf %129, %138 : vector<1x32xf32>
    %140 = arith.mulf %136, %136 : vector<16x32xf32>
    %cst_77 = arith.constant dense<0.000000e+00> : vector<32xf32>
    %141 = vector.multi_reduction <add>, %140, %cst_77 [0] : vector<16x32xf32> to vector<32xf32>
    %142 = vector.shape_cast %141 : vector<32xf32> to vector<1x32xf32>
    %143 = arith.addf %133, %142 : vector<1x32xf32>
    %c5_i32_78 = arith.constant 5 : i32
    %144 = arith.index_cast %c5_i32_78 : i32 to index
    %c0_79 = arith.constant 0 : index
    %c0_80 = arith.constant 0 : index
    %145 = vector.load %arg7[%144, %c0_79, %c0_80] : memref<8x16x32xf32, #tpu.memory_space<vmem>>, vector<1x16x32xf32>
    %146 = vector.shape_cast %145 : vector<1x16x32xf32> to vector<16x32xf32>
    %cst_81 = arith.constant dense<0.000000e+00> : vector<32xf32>
    %147 = vector.multi_reduction <add>, %146, %cst_81 [0] : vector<16x32xf32> to vector<32xf32>
    %148 = vector.shape_cast %147 : vector<32xf32> to vector<1x32xf32>
    %149 = arith.addf %139, %148 : vector<1x32xf32>
    %150 = arith.mulf %146, %146 : vector<16x32xf32>
    %cst_82 = arith.constant dense<0.000000e+00> : vector<32xf32>
    %151 = vector.multi_reduction <add>, %150, %cst_82 [0] : vector<16x32xf32> to vector<32xf32>
    %152 = vector.shape_cast %151 : vector<32xf32> to vector<1x32xf32>
    %153 = arith.addf %143, %152 : vector<1x32xf32>
    %c6_i32_83 = arith.constant 6 : i32
    %154 = arith.index_cast %c6_i32_83 : i32 to index
    %c0_84 = arith.constant 0 : index
    %c0_85 = arith.constant 0 : index
    %155 = vector.load %arg7[%154, %c0_84, %c0_85] : memref<8x16x32xf32, #tpu.memory_space<vmem>>, vector<1x16x32xf32>
    %156 = vector.shape_cast %155 : vector<1x16x32xf32> to vector<16x32xf32>
    %cst_86 = arith.constant dense<0.000000e+00> : vector<32xf32>
    %157 = vector.multi_reduction <add>, %156, %cst_86 [0] : vector<16x32xf32> to vector<32xf32>
    %158 = vector.shape_cast %157 : vector<32xf32> to vector<1x32xf32>
    %159 = arith.addf %149, %158 : vector<1x32xf32>
    %160 = arith.mulf %156, %156 : vector<16x32xf32>
    %cst_87 = arith.constant dense<0.000000e+00> : vector<32xf32>
    %161 = vector.multi_reduction <add>, %160, %cst_87 [0] : vector<16x32xf32> to vector<32xf32>
    %162 = vector.shape_cast %161 : vector<32xf32> to vector<1x32xf32>
    %163 = arith.addf %153, %162 : vector<1x32xf32>
    %c7_i32_88 = arith.constant 7 : i32
    %164 = arith.index_cast %c7_i32_88 : i32 to index
    %c0_89 = arith.constant 0 : index
    %c0_90 = arith.constant 0 : index
    %165 = vector.load %arg7[%164, %c0_89, %c0_90] : memref<8x16x32xf32, #tpu.memory_space<vmem>>, vector<1x16x32xf32>
    %166 = vector.shape_cast %165 : vector<1x16x32xf32> to vector<16x32xf32>
    %cst_91 = arith.constant dense<0.000000e+00> : vector<32xf32>
    %167 = vector.multi_reduction <add>, %166, %cst_91 [0] : vector<16x32xf32> to vector<32xf32>
    %168 = vector.shape_cast %167 : vector<32xf32> to vector<1x32xf32>
    %169 = arith.addf %159, %168 : vector<1x32xf32>
    %170 = arith.mulf %166, %166 : vector<16x32xf32>
    %cst_92 = arith.constant dense<0.000000e+00> : vector<32xf32>
    %171 = vector.multi_reduction <add>, %170, %cst_92 [0] : vector<16x32xf32> to vector<32xf32>
    %172 = vector.shape_cast %171 : vector<32xf32> to vector<1x32xf32>
    %173 = arith.addf %163, %172 : vector<1x32xf32>
    %c8_i32 = arith.constant 8 : i32
    %cst_93 = arith.constant 7.812500e-03 : f32
    %174 = vector.broadcast %cst_93 : f32 to vector<1x32xf32>
    %175 = arith.mulf %169, %174 : vector<1x32xf32>
    %cst_94 = arith.constant 7.812500e-03 : f32
    %176 = vector.broadcast %cst_94 : f32 to vector<1x32xf32>
    %177 = arith.mulf %173, %176 : vector<1x32xf32>
    %178 = arith.mulf %175, %175 : vector<1x32xf32>
    %179 = arith.subf %177, %178 : vector<1x32xf32>
    %cst_95 = arith.constant 0.000000e+00 : f32
    %180 = vector.broadcast %cst_95 : f32 to vector<1x32xf32>
    %181 = arith.maximumf %179, %180 : vector<1x32xf32>
    %cst_96 = arith.constant 9.99999974E-6 : f32
    %182 = vector.broadcast %cst_96 : f32 to vector<1x32xf32>
    %183 = arith.addf %181, %182 : vector<1x32xf32>
    %184 = math.rsqrt %183 : vector<1x32xf32>
    %185 = arith.mulf %1, %184 : vector<1x32xf32>
    %186 = arith.mulf %175, %185 : vector<1x32xf32>
    %187 = arith.subf %2, %186 : vector<1x32xf32>
    %c0_97 = arith.constant 0 : index
    %c0_98 = arith.constant 0 : index
    %c0_99 = arith.constant 0 : index
    %188 = vector.load %arg7[%c0_97, %c0_98, %c0_99] : memref<8x16x32xf32, #tpu.memory_space<vmem>>, vector<1x16x32xf32>
    %189 = vector.shape_cast %188 : vector<1x16x32xf32> to vector<16x32xf32>
    %190 = vector.broadcast %185 : vector<1x32xf32> to vector<16x32xf32>
    %191 = arith.mulf %189, %190 : vector<16x32xf32>
    %192 = vector.broadcast %187 : vector<1x32xf32> to vector<16x32xf32>
    %193 = arith.addf %191, %192 : vector<16x32xf32>
    %cst_100 = arith.constant 0.000000e+00 : f32
    %194 = vector.broadcast %cst_100 : f32 to vector<16x32xf32>
    %195 = arith.maximumf %193, %194 : vector<16x32xf32>
    %c0_101 = arith.constant 0 : index
    %c0_102 = arith.constant 0 : index
    %c0_103 = arith.constant 0 : index
    %196 = vector.load %arg7[%c0_101, %c0_102, %c0_103] : memref<8x16x32xf32, #tpu.memory_space<vmem>>, vector<1x16x32xf32>
    %197 = vector.shape_cast %196 : vector<1x16x32xf32> to vector<16x32xf32>
    %198 = vector.shape_cast %195 : vector<16x32xf32> to vector<1x16x32xf32>
    tpu.vector_store %arg7[%c0_101, %c0_102, %c0_103], %198 {strides = array<i32>} : memref<8x16x32xf32, #tpu.memory_space<vmem>>, vector<1x16x32xf32>,
    %199 = arith.truncf %195 : vector<16x32xf32> to vector<16x32xbf16>
    %c1_i32_104 = arith.constant 1 : i32
    %cst_105 = arith.constant dense<0.000000e+00> : vector<16x32xf32>
    %200 = tpu.matmul %199, %0, %cst_105 {dimension_numbers = #tpu.dot_dimension_numbers<[1], [0], [0], [1], [0, 0, 1, 1], [], []>} : vector<16x32xbf16>, vector<32x32xbf16>, vector<16x32xf32> -> vector<16x32xf32>
    %cst_106 = arith.constant 0.000000e+00 : f32
    %201 = vector.broadcast %cst_106 : f32 to vector<16x32xf32>
    %202 = arith.maximumf %200, %201 : vector<16x32xf32>
    %203 = arith.index_cast %c1_i32_104 : i32 to index
    %c0_107 = arith.constant 0 : index
    %c0_108 = arith.constant 0 : index
    %204 = vector.load %arg7[%203, %c0_107, %c0_108] : memref<8x16x32xf32, #tpu.memory_space<vmem>>, vector<1x16x32xf32>
    %205 = vector.shape_cast %204 : vector<1x16x32xf32> to vector<16x32xf32>
    %206 = vector.broadcast %185 : vector<1x32xf32> to vector<16x32xf32>
    %207 = arith.mulf %205, %206 : vector<16x32xf32>
    %208 = vector.broadcast %187 : vector<1x32xf32> to vector<16x32xf32>
    %209 = arith.addf %207, %208 : vector<16x32xf32>
    %cst_109 = arith.constant 0.000000e+00 : f32
    %210 = vector.broadcast %cst_109 : f32 to vector<16x32xf32>
    %211 = arith.maximumf %209, %210 : vector<16x32xf32>
    %212 = arith.addf %211, %202 : vector<16x32xf32>
    %213 = arith.index_cast %c1_i32_104 : i32 to index
    %c0_110 = arith.constant 0 : index
    %c0_111 = arith.constant 0 : index
    %214 = vector.load %arg7[%213, %c0_110, %c0_111] : memref<8x16x32xf32, #tpu.memory_space<vmem>>, vector<1x16x32xf32>
    %215 = vector.shape_cast %214 : vector<1x16x32xf32> to vector<16x32xf32>
    %216 = vector.shape_cast %212 : vector<16x32xf32> to vector<1x16x32xf32>
    tpu.vector_store %arg7[%213, %c0_110, %c0_111], %216 {strides = array<i32>} : memref<8x16x32xf32, #tpu.memory_space<vmem>>, vector<1x16x32xf32>,
    %217 = arith.truncf %212 : vector<16x32xf32> to vector<16x32xbf16>
    %c2_i32_112 = arith.constant 2 : i32
    %cst_113 = arith.constant dense<0.000000e+00> : vector<16x32xf32>
    %218 = tpu.matmul %217, %0, %cst_113 {dimension_numbers = #tpu.dot_dimension_numbers<[1], [0], [0], [1], [0, 0, 1, 1], [], []>} : vector<16x32xbf16>, vector<32x32xbf16>, vector<16x32xf32> -> vector<16x32xf32>
    %cst_114 = arith.constant 0.000000e+00 : f32
    %219 = vector.broadcast %cst_114 : f32 to vector<16x32xf32>
    %220 = arith.maximumf %218, %219 : vector<16x32xf32>
    %221 = arith.index_cast %c2_i32_112 : i32 to index
    %c0_115 = arith.constant 0 : index
    %c0_116 = arith.constant 0 : index
    %222 = vector.load %arg7[%221, %c0_115, %c0_116] : memref<8x16x32xf32, #tpu.memory_space<vmem>>, vector<1x16x32xf32>
    %223 = vector.shape_cast %222 : vector<1x16x32xf32> to vector<16x32xf32>
    %224 = vector.broadcast %185 : vector<1x32xf32> to vector<16x32xf32>
    %225 = arith.mulf %223, %224 : vector<16x32xf32>
    %226 = vector.broadcast %187 : vector<1x32xf32> to vector<16x32xf32>
    %227 = arith.addf %225, %226 : vector<16x32xf32>
    %cst_117 = arith.constant 0.000000e+00 : f32
    %228 = vector.broadcast %cst_117 : f32 to vector<16x32xf32>
    %229 = arith.maximumf %227, %228 : vector<16x32xf32>
    %230 = arith.addf %229, %220 : vector<16x32xf32>
    %231 = arith.index_cast %c2_i32_112 : i32 to index
    %c0_118 = arith.constant 0 : index
    %c0_119 = arith.constant 0 : index
    %232 = vector.load %arg7[%231, %c0_118, %c0_119] : memref<8x16x32xf32, #tpu.memory_space<vmem>>, vector<1x16x32xf32>
    %233 = vector.shape_cast %232 : vector<1x16x32xf32> to vector<16x32xf32>
    %234 = vector.shape_cast %230 : vector<16x32xf32> to vector<1x16x32xf32>
    tpu.vector_store %arg7[%231, %c0_118, %c0_119], %234 {strides = array<i32>} : memref<8x16x32xf32, #tpu.memory_space<vmem>>, vector<1x16x32xf32>,
    %235 = arith.truncf %230 : vector<16x32xf32> to vector<16x32xbf16>
    %c3_i32_120 = arith.constant 3 : i32
    %cst_121 = arith.constant dense<0.000000e+00> : vector<16x32xf32>
    %236 = tpu.matmul %235, %0, %cst_121 {dimension_numbers = #tpu.dot_dimension_numbers<[1], [0], [0], [1], [0, 0, 1, 1], [], []>} : vector<16x32xbf16>, vector<32x32xbf16>, vector<16x32xf32> -> vector<16x32xf32>
    %cst_122 = arith.constant 0.000000e+00 : f32
    %237 = vector.broadcast %cst_122 : f32 to vector<16x32xf32>
    %238 = arith.maximumf %236, %237 : vector<16x32xf32>
    %239 = arith.index_cast %c3_i32_120 : i32 to index
    %c0_123 = arith.constant 0 : index
    %c0_124 = arith.constant 0 : index
    %240 = vector.load %arg7[%239, %c0_123, %c0_124] : memref<8x16x32xf32, #tpu.memory_space<vmem>>, vector<1x16x32xf32>
    %241 = vector.shape_cast %240 : vector<1x16x32xf32> to vector<16x32xf32>
    %242 = vector.broadcast %185 : vector<1x32xf32> to vector<16x32xf32>
    %243 = arith.mulf %241, %242 : vector<16x32xf32>
    %244 = vector.broadcast %187 : vector<1x32xf32> to vector<16x32xf32>
    %245 = arith.addf %243, %244 : vector<16x32xf32>
    %cst_125 = arith.constant 0.000000e+00 : f32
    %246 = vector.broadcast %cst_125 : f32 to vector<16x32xf32>
    %247 = arith.maximumf %245, %246 : vector<16x32xf32>
    %248 = arith.addf %247, %238 : vector<16x32xf32>
    %249 = arith.index_cast %c3_i32_120 : i32 to index
    %c0_126 = arith.constant 0 : index
    %c0_127 = arith.constant 0 : index
    %250 = vector.load %arg7[%249, %c0_126, %c0_127] : memref<8x16x32xf32, #tpu.memory_space<vmem>>, vector<1x16x32xf32>
    %251 = vector.shape_cast %250 : vector<1x16x32xf32> to vector<16x32xf32>
    %252 = vector.shape_cast %248 : vector<16x32xf32> to vector<1x16x32xf32>
    tpu.vector_store %arg7[%249, %c0_126, %c0_127], %252 {strides = array<i32>} : memref<8x16x32xf32, #tpu.memory_space<vmem>>, vector<1x16x32xf32>,
    %253 = arith.truncf %248 : vector<16x32xf32> to vector<16x32xbf16>
    %c4_i32_128 = arith.constant 4 : i32
    %cst_129 = arith.constant dense<0.000000e+00> : vector<16x32xf32>
    %254 = tpu.matmul %253, %0, %cst_129 {dimension_numbers = #tpu.dot_dimension_numbers<[1], [0], [0], [1], [0, 0, 1, 1], [], []>} : vector<16x32xbf16>, vector<32x32xbf16>, vector<16x32xf32> -> vector<16x32xf32>
    %cst_130 = arith.constant 0.000000e+00 : f32
    %255 = vector.broadcast %cst_130 : f32 to vector<16x32xf32>
    %256 = arith.maximumf %254, %255 : vector<16x32xf32>
    %257 = arith.index_cast %c4_i32_128 : i32 to index
    %c0_131 = arith.constant 0 : index
    %c0_132 = arith.constant 0 : index
    %258 = vector.load %arg7[%257, %c0_131, %c0_132] : memref<8x16x32xf32, #tpu.memory_space<vmem>>, vector<1x16x32xf32>
    %259 = vector.shape_cast %258 : vector<1x16x32xf32> to vector<16x32xf32>
    %260 = vector.broadcast %185 : vector<1x32xf32> to vector<16x32xf32>
    %261 = arith.mulf %259, %260 : vector<16x32xf32>
    %262 = vector.broadcast %187 : vector<1x32xf32> to vector<16x32xf32>
    %263 = arith.addf %261, %262 : vector<16x32xf32>
    %cst_133 = arith.constant 0.000000e+00 : f32
    %264 = vector.broadcast %cst_133 : f32 to vector<16x32xf32>
    %265 = arith.maximumf %263, %264 : vector<16x32xf32>
    %266 = arith.addf %265, %256 : vector<16x32xf32>
    %267 = arith.index_cast %c4_i32_128 : i32 to index
    %c0_134 = arith.constant 0 : index
    %c0_135 = arith.constant 0 : index
    %268 = vector.load %arg7[%267, %c0_134, %c0_135] : memref<8x16x32xf32, #tpu.memory_space<vmem>>, vector<1x16x32xf32>
    %269 = vector.shape_cast %268 : vector<1x16x32xf32> to vector<16x32xf32>
    %270 = vector.shape_cast %266 : vector<16x32xf32> to vector<1x16x32xf32>
    tpu.vector_store %arg7[%267, %c0_134, %c0_135], %270 {strides = array<i32>} : memref<8x16x32xf32, #tpu.memory_space<vmem>>, vector<1x16x32xf32>,
    %271 = arith.truncf %266 : vector<16x32xf32> to vector<16x32xbf16>
    %c5_i32_136 = arith.constant 5 : i32
    %cst_137 = arith.constant dense<0.000000e+00> : vector<16x32xf32>
    %272 = tpu.matmul %271, %0, %cst_137 {dimension_numbers = #tpu.dot_dimension_numbers<[1], [0], [0], [1], [0, 0, 1, 1], [], []>} : vector<16x32xbf16>, vector<32x32xbf16>, vector<16x32xf32> -> vector<16x32xf32>
    %cst_138 = arith.constant 0.000000e+00 : f32
    %273 = vector.broadcast %cst_138 : f32 to vector<16x32xf32>
    %274 = arith.maximumf %272, %273 : vector<16x32xf32>
    %275 = arith.index_cast %c5_i32_136 : i32 to index
    %c0_139 = arith.constant 0 : index
    %c0_140 = arith.constant 0 : index
    %276 = vector.load %arg7[%275, %c0_139, %c0_140] : memref<8x16x32xf32, #tpu.memory_space<vmem>>, vector<1x16x32xf32>
    %277 = vector.shape_cast %276 : vector<1x16x32xf32> to vector<16x32xf32>
    %278 = vector.broadcast %185 : vector<1x32xf32> to vector<16x32xf32>
    %279 = arith.mulf %277, %278 : vector<16x32xf32>
    %280 = vector.broadcast %187 : vector<1x32xf32> to vector<16x32xf32>
    %281 = arith.addf %279, %280 : vector<16x32xf32>
    %cst_141 = arith.constant 0.000000e+00 : f32
    %282 = vector.broadcast %cst_141 : f32 to vector<16x32xf32>
    %283 = arith.maximumf %281, %282 : vector<16x32xf32>
    %284 = arith.addf %283, %274 : vector<16x32xf32>
    %285 = arith.index_cast %c5_i32_136 : i32 to index
    %c0_142 = arith.constant 0 : index
    %c0_143 = arith.constant 0 : index
    %286 = vector.load %arg7[%285, %c0_142, %c0_143] : memref<8x16x32xf32, #tpu.memory_space<vmem>>, vector<1x16x32xf32>
    %287 = vector.shape_cast %286 : vector<1x16x32xf32> to vector<16x32xf32>
    %288 = vector.shape_cast %284 : vector<16x32xf32> to vector<1x16x32xf32>
    tpu.vector_store %arg7[%285, %c0_142, %c0_143], %288 {strides = array<i32>} : memref<8x16x32xf32, #tpu.memory_space<vmem>>, vector<1x16x32xf32>,
    %289 = arith.truncf %284 : vector<16x32xf32> to vector<16x32xbf16>
    %c6_i32_144 = arith.constant 6 : i32
    %cst_145 = arith.constant dense<0.000000e+00> : vector<16x32xf32>
    %290 = tpu.matmul %289, %0, %cst_145 {dimension_numbers = #tpu.dot_dimension_numbers<[1], [0], [0], [1], [0, 0, 1, 1], [], []>} : vector<16x32xbf16>, vector<32x32xbf16>, vector<16x32xf32> -> vector<16x32xf32>
    %cst_146 = arith.constant 0.000000e+00 : f32
    %291 = vector.broadcast %cst_146 : f32 to vector<16x32xf32>
    %292 = arith.maximumf %290, %291 : vector<16x32xf32>
    %293 = arith.index_cast %c6_i32_144 : i32 to index
    %c0_147 = arith.constant 0 : index
    %c0_148 = arith.constant 0 : index
    %294 = vector.load %arg7[%293, %c0_147, %c0_148] : memref<8x16x32xf32, #tpu.memory_space<vmem>>, vector<1x16x32xf32>
    %295 = vector.shape_cast %294 : vector<1x16x32xf32> to vector<16x32xf32>
    %296 = vector.broadcast %185 : vector<1x32xf32> to vector<16x32xf32>
    %297 = arith.mulf %295, %296 : vector<16x32xf32>
    %298 = vector.broadcast %187 : vector<1x32xf32> to vector<16x32xf32>
    %299 = arith.addf %297, %298 : vector<16x32xf32>
    %cst_149 = arith.constant 0.000000e+00 : f32
    %300 = vector.broadcast %cst_149 : f32 to vector<16x32xf32>
    %301 = arith.maximumf %299, %300 : vector<16x32xf32>
    %302 = arith.addf %301, %292 : vector<16x32xf32>
    %303 = arith.index_cast %c6_i32_144 : i32 to index
    %c0_150 = arith.constant 0 : index
    %c0_151 = arith.constant 0 : index
    %304 = vector.load %arg7[%303, %c0_150, %c0_151] : memref<8x16x32xf32, #tpu.memory_space<vmem>>, vector<1x16x32xf32>
    %305 = vector.shape_cast %304 : vector<1x16x32xf32> to vector<16x32xf32>
    %306 = vector.shape_cast %302 : vector<16x32xf32> to vector<1x16x32xf32>
    tpu.vector_store %arg7[%303, %c0_150, %c0_151], %306 {strides = array<i32>} : memref<8x16x32xf32, #tpu.memory_space<vmem>>, vector<1x16x32xf32>,
    %307 = arith.truncf %302 : vector<16x32xf32> to vector<16x32xbf16>
    %c7_i32_152 = arith.constant 7 : i32
    %cst_153 = arith.constant dense<0.000000e+00> : vector<16x32xf32>
    %308 = tpu.matmul %307, %0, %cst_153 {dimension_numbers = #tpu.dot_dimension_numbers<[1], [0], [0], [1], [0, 0, 1, 1], [], []>} : vector<16x32xbf16>, vector<32x32xbf16>, vector<16x32xf32> -> vector<16x32xf32>
    %cst_154 = arith.constant 0.000000e+00 : f32
    %309 = vector.broadcast %cst_154 : f32 to vector<16x32xf32>
    %310 = arith.maximumf %308, %309 : vector<16x32xf32>
    %311 = arith.index_cast %c7_i32_152 : i32 to index
    %c0_155 = arith.constant 0 : index
    %c0_156 = arith.constant 0 : index
    %312 = vector.load %arg7[%311, %c0_155, %c0_156] : memref<8x16x32xf32, #tpu.memory_space<vmem>>, vector<1x16x32xf32>
    %313 = vector.shape_cast %312 : vector<1x16x32xf32> to vector<16x32xf32>
    %314 = vector.broadcast %185 : vector<1x32xf32> to vector<16x32xf32>
    %315 = arith.mulf %313, %314 : vector<16x32xf32>
    %316 = vector.broadcast %187 : vector<1x32xf32> to vector<16x32xf32>
    %317 = arith.addf %315, %316 : vector<16x32xf32>
    %cst_157 = arith.constant 0.000000e+00 : f32
    %318 = vector.broadcast %cst_157 : f32 to vector<16x32xf32>
    %319 = arith.maximumf %317, %318 : vector<16x32xf32>
    %320 = arith.addf %319, %310 : vector<16x32xf32>
    %321 = arith.index_cast %c7_i32_152 : i32 to index
    %c0_158 = arith.constant 0 : index
    %c0_159 = arith.constant 0 : index
    %322 = vector.load %arg7[%321, %c0_158, %c0_159] : memref<8x16x32xf32, #tpu.memory_space<vmem>>, vector<1x16x32xf32>
    %323 = vector.shape_cast %322 : vector<1x16x32xf32> to vector<16x32xf32>
    %324 = vector.shape_cast %320 : vector<16x32xf32> to vector<1x16x32xf32>
    tpu.vector_store %arg7[%321, %c0_158, %c0_159], %324 {strides = array<i32>} : memref<8x16x32xf32, #tpu.memory_space<vmem>>, vector<1x16x32xf32>,
    %325 = arith.truncf %320 : vector<16x32xf32> to vector<16x32xbf16>
    %c7_i32_160 = arith.constant 7 : i32
    %c0_i32_161 = arith.constant 0 : i32
    %326 = arith.index_cast %c0_i32_161 : i32 to index
    %c0_162 = arith.constant 0 : index
    %c0_163 = arith.constant 0 : index
    %327 = vector.load %arg7[%326, %c0_162, %c0_163] : memref<8x16x32xf32, #tpu.memory_space<vmem>>, vector<1x16x32xf32>
    %328 = vector.shape_cast %327 : vector<1x16x32xf32> to vector<16x32xf32>
    %cst_164 = arith.constant dense<0.000000e+00> : vector<32xf32>
    %329 = vector.multi_reduction <add>, %328, %cst_164 [0] : vector<16x32xf32> to vector<32xf32>
    %330 = vector.shape_cast %329 : vector<32xf32> to vector<1x32xf32>
    %331 = arith.addf %93, %330 : vector<1x32xf32>
    %332 = arith.mulf %328, %328 : vector<16x32xf32>
    %cst_165 = arith.constant dense<0.000000e+00> : vector<32xf32>
    %333 = vector.multi_reduction <add>, %332, %cst_165 [0] : vector<16x32xf32> to vector<32xf32>
    %334 = vector.shape_cast %333 : vector<32xf32> to vector<1x32xf32>
    %335 = arith.addf %93, %334 : vector<1x32xf32>
    %c1_i32_166 = arith.constant 1 : i32
    %336 = arith.index_cast %c1_i32_166 : i32 to index
    %c0_167 = arith.constant 0 : index
    %c0_168 = arith.constant 0 : index
    %337 = vector.load %arg7[%336, %c0_167, %c0_168] : memref<8x16x32xf32, #tpu.memory_space<vmem>>, vector<1x16x32xf32>
    %338 = vector.shape_cast %337 : vector<1x16x32xf32> to vector<16x32xf32>
    %cst_169 = arith.constant dense<0.000000e+00> : vector<32xf32>
    %339 = vector.multi_reduction <add>, %338, %cst_169 [0] : vector<16x32xf32> to vector<32xf32>
    %340 = vector.shape_cast %339 : vector<32xf32> to vector<1x32xf32>
    %341 = arith.addf %331, %340 : vector<1x32xf32>
    %342 = arith.mulf %338, %338 : vector<16x32xf32>
    %cst_170 = arith.constant dense<0.000000e+00> : vector<32xf32>
    %343 = vector.multi_reduction <add>, %342, %cst_170 [0] : vector<16x32xf32> to vector<32xf32>
    %344 = vector.shape_cast %343 : vector<32xf32> to vector<1x32xf32>
    %345 = arith.addf %335, %344 : vector<1x32xf32>
    %c2_i32_171 = arith.constant 2 : i32
    %346 = arith.index_cast %c2_i32_171 : i32 to index
    %c0_172 = arith.constant 0 : index
    %c0_173 = arith.constant 0 : index
    %347 = vector.load %arg7[%346, %c0_172, %c0_173] : memref<8x16x32xf32, #tpu.memory_space<vmem>>, vector<1x16x32xf32>
    %348 = vector.shape_cast %347 : vector<1x16x32xf32> to vector<16x32xf32>
    %cst_174 = arith.constant dense<0.000000e+00> : vector<32xf32>
    %349 = vector.multi_reduction <add>, %348, %cst_174 [0] : vector<16x32xf32> to vector<32xf32>
    %350 = vector.shape_cast %349 : vector<32xf32> to vector<1x32xf32>
    %351 = arith.addf %341, %350 : vector<1x32xf32>
    %352 = arith.mulf %348, %348 : vector<16x32xf32>
    %cst_175 = arith.constant dense<0.000000e+00> : vector<32xf32>
    %353 = vector.multi_reduction <add>, %352, %cst_175 [0] : vector<16x32xf32> to vector<32xf32>
    %354 = vector.shape_cast %353 : vector<32xf32> to vector<1x32xf32>
    %355 = arith.addf %345, %354 : vector<1x32xf32>
    %c3_i32_176 = arith.constant 3 : i32
    %356 = arith.index_cast %c3_i32_176 : i32 to index
    %c0_177 = arith.constant 0 : index
    %c0_178 = arith.constant 0 : index
    %357 = vector.load %arg7[%356, %c0_177, %c0_178] : memref<8x16x32xf32, #tpu.memory_space<vmem>>, vector<1x16x32xf32>
    %358 = vector.shape_cast %357 : vector<1x16x32xf32> to vector<16x32xf32>
    %cst_179 = arith.constant dense<0.000000e+00> : vector<32xf32>
    %359 = vector.multi_reduction <add>, %358, %cst_179 [0] : vector<16x32xf32> to vector<32xf32>
    %360 = vector.shape_cast %359 : vector<32xf32> to vector<1x32xf32>
    %361 = arith.addf %351, %360 : vector<1x32xf32>
    %362 = arith.mulf %358, %358 : vector<16x32xf32>
    %cst_180 = arith.constant dense<0.000000e+00> : vector<32xf32>
    %363 = vector.multi_reduction <add>, %362, %cst_180 [0] : vector<16x32xf32> to vector<32xf32>
    %364 = vector.shape_cast %363 : vector<32xf32> to vector<1x32xf32>
    %365 = arith.addf %355, %364 : vector<1x32xf32>
    %c4_i32_181 = arith.constant 4 : i32
    %366 = arith.index_cast %c4_i32_181 : i32 to index
    %c0_182 = arith.constant 0 : index
    %c0_183 = arith.constant 0 : index
    %367 = vector.load %arg7[%366, %c0_182, %c0_183] : memref<8x16x32xf32, #tpu.memory_space<vmem>>, vector<1x16x32xf32>
    %368 = vector.shape_cast %367 : vector<1x16x32xf32> to vector<16x32xf32>
    %cst_184 = arith.constant dense<0.000000e+00> : vector<32xf32>
    %369 = vector.multi_reduction <add>, %368, %cst_184 [0] : vector<16x32xf32> to vector<32xf32>
    %370 = vector.shape_cast %369 : vector<32xf32> to vector<1x32xf32>
    %371 = arith.addf %361, %370 : vector<1x32xf32>
    %372 = arith.mulf %368, %368 : vector<16x32xf32>
    %cst_185 = arith.constant dense<0.000000e+00> : vector<32xf32>
    %373 = vector.multi_reduction <add>, %372, %cst_185 [0] : vector<16x32xf32> to vector<32xf32>
    %374 = vector.shape_cast %373 : vector<32xf32> to vector<1x32xf32>
    %375 = arith.addf %365, %374 : vector<1x32xf32>
    %c5_i32_186 = arith.constant 5 : i32
    %376 = arith.index_cast %c5_i32_186 : i32 to index
    %c0_187 = arith.constant 0 : index
    %c0_188 = arith.constant 0 : index
    %377 = vector.load %arg7[%376, %c0_187, %c0_188] : memref<8x16x32xf32, #tpu.memory_space<vmem>>, vector<1x16x32xf32>
    %378 = vector.shape_cast %377 : vector<1x16x32xf32> to vector<16x32xf32>
    %cst_189 = arith.constant dense<0.000000e+00> : vector<32xf32>
    %379 = vector.multi_reduction <add>, %378, %cst_189 [0] : vector<16x32xf32> to vector<32xf32>
    %380 = vector.shape_cast %379 : vector<32xf32> to vector<1x32xf32>
    %381 = arith.addf %371, %380 : vector<1x32xf32>
    %382 = arith.mulf %378, %378 : vector<16x32xf32>
    %cst_190 = arith.constant dense<0.000000e+00> : vector<32xf32>
    %383 = vector.multi_reduction <add>, %382, %cst_190 [0] : vector<16x32xf32> to vector<32xf32>
    %384 = vector.shape_cast %383 : vector<32xf32> to vector<1x32xf32>
    %385 = arith.addf %375, %384 : vector<1x32xf32>
    %c6_i32_191 = arith.constant 6 : i32
    %386 = arith.index_cast %c6_i32_191 : i32 to index
    %c0_192 = arith.constant 0 : index
    %c0_193 = arith.constant 0 : index
    %387 = vector.load %arg7[%386, %c0_192, %c0_193] : memref<8x16x32xf32, #tpu.memory_space<vmem>>, vector<1x16x32xf32>
    %388 = vector.shape_cast %387 : vector<1x16x32xf32> to vector<16x32xf32>
    %cst_194 = arith.constant dense<0.000000e+00> : vector<32xf32>
    %389 = vector.multi_reduction <add>, %388, %cst_194 [0] : vector<16x32xf32> to vector<32xf32>
    %390 = vector.shape_cast %389 : vector<32xf32> to vector<1x32xf32>
    %391 = arith.addf %381, %390 : vector<1x32xf32>
    %392 = arith.mulf %388, %388 : vector<16x32xf32>
    %cst_195 = arith.constant dense<0.000000e+00> : vector<32xf32>
    %393 = vector.multi_reduction <add>, %392, %cst_195 [0] : vector<16x32xf32> to vector<32xf32>
    %394 = vector.shape_cast %393 : vector<32xf32> to vector<1x32xf32>
    %395 = arith.addf %385, %394 : vector<1x32xf32>
    %c7_i32_196 = arith.constant 7 : i32
    %396 = arith.index_cast %c7_i32_196 : i32 to index
    %c0_197 = arith.constant 0 : index
    %c0_198 = arith.constant 0 : index
    %397 = vector.load %arg7[%396, %c0_197, %c0_198] : memref<8x16x32xf32, #tpu.memory_space<vmem>>, vector<1x16x32xf32>
    %398 = vector.shape_cast %397 : vector<1x16x32xf32> to vector<16x32xf32>
    %cst_199 = arith.constant dense<0.000000e+00> : vector<32xf32>
    %399 = vector.multi_reduction <add>, %398, %cst_199 [0] : vector<16x32xf32> to vector<32xf32>
    %400 = vector.shape_cast %399 : vector<32xf32> to vector<1x32xf32>
    %401 = arith.addf %391, %400 : vector<1x32xf32>
    %402 = arith.mulf %398, %398 : vector<16x32xf32>
    %cst_200 = arith.constant dense<0.000000e+00> : vector<32xf32>
    %403 = vector.multi_reduction <add>, %402, %cst_200 [0] : vector<16x32xf32> to vector<32xf32>
    %404 = vector.shape_cast %403 : vector<32xf32> to vector<1x32xf32>
    %405 = arith.addf %395, %404 : vector<1x32xf32>
    %c8_i32_201 = arith.constant 8 : i32
    %cst_202 = arith.constant 7.812500e-03 : f32
    %406 = vector.broadcast %cst_202 : f32 to vector<1x32xf32>
    %407 = arith.mulf %401, %406 : vector<1x32xf32>
    %cst_203 = arith.constant 7.812500e-03 : f32
    %408 = vector.broadcast %cst_203 : f32 to vector<1x32xf32>
    %409 = arith.mulf %405, %408 : vector<1x32xf32>
    %410 = arith.mulf %407, %407 : vector<1x32xf32>
    %411 = arith.subf %409, %410 : vector<1x32xf32>
    %cst_204 = arith.constant 0.000000e+00 : f32
    %412 = vector.broadcast %cst_204 : f32 to vector<1x32xf32>
    %413 = arith.maximumf %411, %412 : vector<1x32xf32>
    %cst_205 = arith.constant 9.99999974E-6 : f32
    %414 = vector.broadcast %cst_205 : f32 to vector<1x32xf32>
    %415 = arith.addf %413, %414 : vector<1x32xf32>
    %416 = math.rsqrt %415 : vector<1x32xf32>
    %417 = arith.mulf %1, %416 : vector<1x32xf32>
    %418 = arith.mulf %407, %417 : vector<1x32xf32>
    %419 = arith.subf %2, %418 : vector<1x32xf32>
    %cst_206 = arith.constant 0.000000e+00 : f32
    %420 = vector.broadcast %cst_206 : f32 to vector<16x3xf32>
    %c0_i32_207 = arith.constant 0 : i32
    %421 = arith.index_cast %c0_i32_207 : i32 to index
    %c0_208 = arith.constant 0 : index
    %c0_209 = arith.constant 0 : index
    %422 = vector.load %arg7[%421, %c0_208, %c0_209] : memref<8x16x32xf32, #tpu.memory_space<vmem>>, vector<1x16x32xf32>
    %423 = vector.shape_cast %422 : vector<1x16x32xf32> to vector<16x32xf32>
    %424 = vector.broadcast %417 : vector<1x32xf32> to vector<16x32xf32>
    %425 = arith.mulf %423, %424 : vector<16x32xf32>
    %426 = vector.broadcast %419 : vector<1x32xf32> to vector<16x32xf32>
    %427 = arith.addf %425, %426 : vector<16x32xf32>
    %cst_210 = arith.constant 0.000000e+00 : f32
    %428 = vector.broadcast %cst_210 : f32 to vector<16x32xf32>
    %429 = arith.maximumf %427, %428 : vector<16x32xf32>
    %430 = arith.truncf %429 : vector<16x32xf32> to vector<16x32xbf16>
    %431 = arith.index_cast %c0_i32_207 : i32 to index
    %c0_211 = arith.constant 0 : index
    %c0_212 = arith.constant 0 : index
    %432 = vector.load %arg4[%431, %c0_211, %c0_212] : memref<8x32x3xbf16, #tpu.memory_space<vmem>>, vector<1x32x3xbf16>
    %433 = vector.shape_cast %432 : vector<1x32x3xbf16> to vector<32x3xbf16>
    %cst_213 = arith.constant dense<0.000000e+00> : vector<16x3xf32>
    %434 = tpu.matmul %430, %433, %cst_213 {dimension_numbers = #tpu.dot_dimension_numbers<[1], [0], [0], [1], [0, 0, 1, 1], [], []>} : vector<16x32xbf16>, vector<32x3xbf16>, vector<16x3xf32> -> vector<16x3xf32>
    %435 = arith.addf %420, %434 : vector<16x3xf32>
    %c1_i32_214 = arith.constant 1 : i32
    %436 = arith.index_cast %c1_i32_214 : i32 to index
    %c0_215 = arith.constant 0 : index
    %c0_216 = arith.constant 0 : index
    %437 = vector.load %arg7[%436, %c0_215, %c0_216] : memref<8x16x32xf32, #tpu.memory_space<vmem>>, vector<1x16x32xf32>
    %438 = vector.shape_cast %437 : vector<1x16x32xf32> to vector<16x32xf32>
    %439 = vector.broadcast %417 : vector<1x32xf32> to vector<16x32xf32>
    %440 = arith.mulf %438, %439 : vector<16x32xf32>
    %441 = vector.broadcast %419 : vector<1x32xf32> to vector<16x32xf32>
    %442 = arith.addf %440, %441 : vector<16x32xf32>
    %cst_217 = arith.constant 0.000000e+00 : f32
    %443 = vector.broadcast %cst_217 : f32 to vector<16x32xf32>
    %444 = arith.maximumf %442, %443 : vector<16x32xf32>
    %445 = arith.truncf %444 : vector<16x32xf32> to vector<16x32xbf16>
    %446 = arith.index_cast %c1_i32_214 : i32 to index
    %c0_218 = arith.constant 0 : index
    %c0_219 = arith.constant 0 : index
    %447 = vector.load %arg4[%446, %c0_218, %c0_219] : memref<8x32x3xbf16, #tpu.memory_space<vmem>>, vector<1x32x3xbf16>
    %448 = vector.shape_cast %447 : vector<1x32x3xbf16> to vector<32x3xbf16>
    %cst_220 = arith.constant dense<0.000000e+00> : vector<16x3xf32>
    %449 = tpu.matmul %445, %448, %cst_220 {dimension_numbers = #tpu.dot_dimension_numbers<[1], [0], [0], [1], [0, 0, 1, 1], [], []>} : vector<16x32xbf16>, vector<32x3xbf16>, vector<16x3xf32> -> vector<16x3xf32>
    %450 = arith.addf %435, %449 : vector<16x3xf32>
    %c2_i32_221 = arith.constant 2 : i32
    %451 = arith.index_cast %c2_i32_221 : i32 to index
    %c0_222 = arith.constant 0 : index
    %c0_223 = arith.constant 0 : index
    %452 = vector.load %arg7[%451, %c0_222, %c0_223] : memref<8x16x32xf32, #tpu.memory_space<vmem>>, vector<1x16x32xf32>
    %453 = vector.shape_cast %452 : vector<1x16x32xf32> to vector<16x32xf32>
    %454 = vector.broadcast %417 : vector<1x32xf32> to vector<16x32xf32>
    %455 = arith.mulf %453, %454 : vector<16x32xf32>
    %456 = vector.broadcast %419 : vector<1x32xf32> to vector<16x32xf32>
    %457 = arith.addf %455, %456 : vector<16x32xf32>
    %cst_224 = arith.constant 0.000000e+00 : f32
    %458 = vector.broadcast %cst_224 : f32 to vector<16x32xf32>
    %459 = arith.maximumf %457, %458 : vector<16x32xf32>
    %460 = arith.truncf %459 : vector<16x32xf32> to vector<16x32xbf16>
    %461 = arith.index_cast %c2_i32_221 : i32 to index
    %c0_225 = arith.constant 0 : index
    %c0_226 = arith.constant 0 : index
    %462 = vector.load %arg4[%461, %c0_225, %c0_226] : memref<8x32x3xbf16, #tpu.memory_space<vmem>>, vector<1x32x3xbf16>
    %463 = vector.shape_cast %462 : vector<1x32x3xbf16> to vector<32x3xbf16>
    %cst_227 = arith.constant dense<0.000000e+00> : vector<16x3xf32>
    %464 = tpu.matmul %460, %463, %cst_227 {dimension_numbers = #tpu.dot_dimension_numbers<[1], [0], [0], [1], [0, 0, 1, 1], [], []>} : vector<16x32xbf16>, vector<32x3xbf16>, vector<16x3xf32> -> vector<16x3xf32>
    %465 = arith.addf %450, %464 : vector<16x3xf32>
    %c3_i32_228 = arith.constant 3 : i32
    %466 = arith.index_cast %c3_i32_228 : i32 to index
    %c0_229 = arith.constant 0 : index
    %c0_230 = arith.constant 0 : index
    %467 = vector.load %arg7[%466, %c0_229, %c0_230] : memref<8x16x32xf32, #tpu.memory_space<vmem>>, vector<1x16x32xf32>
    %468 = vector.shape_cast %467 : vector<1x16x32xf32> to vector<16x32xf32>
    %469 = vector.broadcast %417 : vector<1x32xf32> to vector<16x32xf32>
    %470 = arith.mulf %468, %469 : vector<16x32xf32>
    %471 = vector.broadcast %419 : vector<1x32xf32> to vector<16x32xf32>
    %472 = arith.addf %470, %471 : vector<16x32xf32>
    %cst_231 = arith.constant 0.000000e+00 : f32
    %473 = vector.broadcast %cst_231 : f32 to vector<16x32xf32>
    %474 = arith.maximumf %472, %473 : vector<16x32xf32>
    %475 = arith.truncf %474 : vector<16x32xf32> to vector<16x32xbf16>
    %476 = arith.index_cast %c3_i32_228 : i32 to index
    %c0_232 = arith.constant 0 : index
    %c0_233 = arith.constant 0 : index
    %477 = vector.load %arg4[%476, %c0_232, %c0_233] : memref<8x32x3xbf16, #tpu.memory_space<vmem>>, vector<1x32x3xbf16>
    %478 = vector.shape_cast %477 : vector<1x32x3xbf16> to vector<32x3xbf16>
    %cst_234 = arith.constant dense<0.000000e+00> : vector<16x3xf32>
    %479 = tpu.matmul %475, %478, %cst_234 {dimension_numbers = #tpu.dot_dimension_numbers<[1], [0], [0], [1], [0, 0, 1, 1], [], []>} : vector<16x32xbf16>, vector<32x3xbf16>, vector<16x3xf32> -> vector<16x3xf32>
    %480 = arith.addf %465, %479 : vector<16x3xf32>
    %c4_i32_235 = arith.constant 4 : i32
    %481 = arith.index_cast %c4_i32_235 : i32 to index
    %c0_236 = arith.constant 0 : index
    %c0_237 = arith.constant 0 : index
    %482 = vector.load %arg7[%481, %c0_236, %c0_237] : memref<8x16x32xf32, #tpu.memory_space<vmem>>, vector<1x16x32xf32>
    %483 = vector.shape_cast %482 : vector<1x16x32xf32> to vector<16x32xf32>
    %484 = vector.broadcast %417 : vector<1x32xf32> to vector<16x32xf32>
    %485 = arith.mulf %483, %484 : vector<16x32xf32>
    %486 = vector.broadcast %419 : vector<1x32xf32> to vector<16x32xf32>
    %487 = arith.addf %485, %486 : vector<16x32xf32>
    %cst_238 = arith.constant 0.000000e+00 : f32
    %488 = vector.broadcast %cst_238 : f32 to vector<16x32xf32>
    %489 = arith.maximumf %487, %488 : vector<16x32xf32>
    %490 = arith.truncf %489 : vector<16x32xf32> to vector<16x32xbf16>
    %491 = arith.index_cast %c4_i32_235 : i32 to index
    %c0_239 = arith.constant 0 : index
    %c0_240 = arith.constant 0 : index
    %492 = vector.load %arg4[%491, %c0_239, %c0_240] : memref<8x32x3xbf16, #tpu.memory_space<vmem>>, vector<1x32x3xbf16>
    %493 = vector.shape_cast %492 : vector<1x32x3xbf16> to vector<32x3xbf16>
    %cst_241 = arith.constant dense<0.000000e+00> : vector<16x3xf32>
    %494 = tpu.matmul %490, %493, %cst_241 {dimension_numbers = #tpu.dot_dimension_numbers<[1], [0], [0], [1], [0, 0, 1, 1], [], []>} : vector<16x32xbf16>, vector<32x3xbf16>, vector<16x3xf32> -> vector<16x3xf32>
    %495 = arith.addf %480, %494 : vector<16x3xf32>
    %c5_i32_242 = arith.constant 5 : i32
    %496 = arith.index_cast %c5_i32_242 : i32 to index
    %c0_243 = arith.constant 0 : index
    %c0_244 = arith.constant 0 : index
    %497 = vector.load %arg7[%496, %c0_243, %c0_244] : memref<8x16x32xf32, #tpu.memory_space<vmem>>, vector<1x16x32xf32>
    %498 = vector.shape_cast %497 : vector<1x16x32xf32> to vector<16x32xf32>
    %499 = vector.broadcast %417 : vector<1x32xf32> to vector<16x32xf32>
    %500 = arith.mulf %498, %499 : vector<16x32xf32>
    %501 = vector.broadcast %419 : vector<1x32xf32> to vector<16x32xf32>
    %502 = arith.addf %500, %501 : vector<16x32xf32>
    %cst_245 = arith.constant 0.000000e+00 : f32
    %503 = vector.broadcast %cst_245 : f32 to vector<16x32xf32>
    %504 = arith.maximumf %502, %503 : vector<16x32xf32>
    %505 = arith.truncf %504 : vector<16x32xf32> to vector<16x32xbf16>
    %506 = arith.index_cast %c5_i32_242 : i32 to index
    %c0_246 = arith.constant 0 : index
    %c0_247 = arith.constant 0 : index
    %507 = vector.load %arg4[%506, %c0_246, %c0_247] : memref<8x32x3xbf16, #tpu.memory_space<vmem>>, vector<1x32x3xbf16>
    %508 = vector.shape_cast %507 : vector<1x32x3xbf16> to vector<32x3xbf16>
    %cst_248 = arith.constant dense<0.000000e+00> : vector<16x3xf32>
    %509 = tpu.matmul %505, %508, %cst_248 {dimension_numbers = #tpu.dot_dimension_numbers<[1], [0], [0], [1], [0, 0, 1, 1], [], []>} : vector<16x32xbf16>, vector<32x3xbf16>, vector<16x3xf32> -> vector<16x3xf32>
    %510 = arith.addf %495, %509 : vector<16x3xf32>
    %c6_i32_249 = arith.constant 6 : i32
    %511 = arith.index_cast %c6_i32_249 : i32 to index
    %c0_250 = arith.constant 0 : index
    %c0_251 = arith.constant 0 : index
    %512 = vector.load %arg7[%511, %c0_250, %c0_251] : memref<8x16x32xf32, #tpu.memory_space<vmem>>, vector<1x16x32xf32>
    %513 = vector.shape_cast %512 : vector<1x16x32xf32> to vector<16x32xf32>
    %514 = vector.broadcast %417 : vector<1x32xf32> to vector<16x32xf32>
    %515 = arith.mulf %513, %514 : vector<16x32xf32>
    %516 = vector.broadcast %419 : vector<1x32xf32> to vector<16x32xf32>
    %517 = arith.addf %515, %516 : vector<16x32xf32>
    %cst_252 = arith.constant 0.000000e+00 : f32
    %518 = vector.broadcast %cst_252 : f32 to vector<16x32xf32>
    %519 = arith.maximumf %517, %518 : vector<16x32xf32>
    %520 = arith.truncf %519 : vector<16x32xf32> to vector<16x32xbf16>
    %521 = arith.index_cast %c6_i32_249 : i32 to index
    %c0_253 = arith.constant 0 : index
    %c0_254 = arith.constant 0 : index
    %522 = vector.load %arg4[%521, %c0_253, %c0_254] : memref<8x32x3xbf16, #tpu.memory_space<vmem>>, vector<1x32x3xbf16>
    %523 = vector.shape_cast %522 : vector<1x32x3xbf16> to vector<32x3xbf16>
    %cst_255 = arith.constant dense<0.000000e+00> : vector<16x3xf32>
    %524 = tpu.matmul %520, %523, %cst_255 {dimension_numbers = #tpu.dot_dimension_numbers<[1], [0], [0], [1], [0, 0, 1, 1], [], []>} : vector<16x32xbf16>, vector<32x3xbf16>, vector<16x3xf32> -> vector<16x3xf32>
    %525 = arith.addf %510, %524 : vector<16x3xf32>
    %c7_i32_256 = arith.constant 7 : i32
    %526 = arith.index_cast %c7_i32_256 : i32 to index
    %c0_257 = arith.constant 0 : index
    %c0_258 = arith.constant 0 : index
    %527 = vector.load %arg7[%526, %c0_257, %c0_258] : memref<8x16x32xf32, #tpu.memory_space<vmem>>, vector<1x16x32xf32>
    %528 = vector.shape_cast %527 : vector<1x16x32xf32> to vector<16x32xf32>
    %529 = vector.broadcast %417 : vector<1x32xf32> to vector<16x32xf32>
    %530 = arith.mulf %528, %529 : vector<16x32xf32>
    %531 = vector.broadcast %419 : vector<1x32xf32> to vector<16x32xf32>
    %532 = arith.addf %530, %531 : vector<16x32xf32>
    %cst_259 = arith.constant 0.000000e+00 : f32
    %533 = vector.broadcast %cst_259 : f32 to vector<16x32xf32>
    %534 = arith.maximumf %532, %533 : vector<16x32xf32>
    %535 = arith.truncf %534 : vector<16x32xf32> to vector<16x32xbf16>
    %536 = arith.index_cast %c7_i32_256 : i32 to index
    %c0_260 = arith.constant 0 : index
    %c0_261 = arith.constant 0 : index
    %537 = vector.load %arg4[%536, %c0_260, %c0_261] : memref<8x32x3xbf16, #tpu.memory_space<vmem>>, vector<1x32x3xbf16>
    %538 = vector.shape_cast %537 : vector<1x32x3xbf16> to vector<32x3xbf16>
    %cst_262 = arith.constant dense<0.000000e+00> : vector<16x3xf32>
    %539 = tpu.matmul %535, %538, %cst_262 {dimension_numbers = #tpu.dot_dimension_numbers<[1], [0], [0], [1], [0, 0, 1, 1], [], []>} : vector<16x32xbf16>, vector<32x3xbf16>, vector<16x3xf32> -> vector<16x3xf32>
    %540 = arith.addf %525, %539 : vector<16x3xf32>
    %c8_i32_263 = arith.constant 8 : i32
    %541 = vector.extract_strided_slice %540 {offsets = [0, 0], sizes = [8, 3], strides = [1, 1]} : vector<16x3xf32> to vector<8x3xf32>
    %cst_264 = arith.constant 0.000000e+00 : f32
    %542 = vector.broadcast %cst_264 : f32 to vector<64x1xf32>
    %c0_265 = arith.constant 0 : index
    %c0_266 = arith.constant 0 : index
    %c0_267 = arith.constant 0 : index
    %543 = vector.load %arg5[%c0_265, %c0_266, %c0_267] : memref<3x64x8xf32, #tpu.memory_space<vmem>>, vector<1x64x8xf32>
    %544 = vector.shape_cast %543 : vector<1x64x8xf32> to vector<64x8xf32>
    %545 = vector.extract_strided_slice %541 {offsets = [0, 0], sizes = [8, 1], strides = [1, 1]} : vector<8x3xf32> to vector<8x1xf32>
    %cst_268 = arith.constant dense<0.000000e+00> : vector<64x1xf32>
    %546 = tpu.matmul %544, %545, %cst_268 {dimension_numbers = #tpu.dot_dimension_numbers<[1], [0], [0], [1], [0, 0, 1, 1], [], []>} : vector<64x8xf32>, vector<8x1xf32>, vector<64x1xf32> -> vector<64x1xf32>
    %547 = arith.addf %542, %546 : vector<64x1xf32>
    %c1 = arith.constant 1 : index
    %c0_269 = arith.constant 0 : index
    %c0_270 = arith.constant 0 : index
    %548 = vector.load %arg5[%c1, %c0_269, %c0_270] : memref<3x64x8xf32, #tpu.memory_space<vmem>>, vector<1x64x8xf32>
    %549 = vector.shape_cast %548 : vector<1x64x8xf32> to vector<64x8xf32>
    %550 = vector.extract_strided_slice %541 {offsets = [0, 1], sizes = [8, 1], strides = [1, 1]} : vector<8x3xf32> to vector<8x1xf32>
    %cst_271 = arith.constant dense<0.000000e+00> : vector<64x1xf32>
    %551 = tpu.matmul %549, %550, %cst_271 {dimension_numbers = #tpu.dot_dimension_numbers<[1], [0], [0], [1], [0, 0, 1, 1], [], []>} : vector<64x8xf32>, vector<8x1xf32>, vector<64x1xf32> -> vector<64x1xf32>
    %552 = arith.addf %547, %551 : vector<64x1xf32>
    %c2 = arith.constant 2 : index
    %c0_272 = arith.constant 0 : index
    %c0_273 = arith.constant 0 : index
    %553 = vector.load %arg5[%c2, %c0_272, %c0_273] : memref<3x64x8xf32, #tpu.memory_space<vmem>>, vector<1x64x8xf32>
    %554 = vector.shape_cast %553 : vector<1x64x8xf32> to vector<64x8xf32>
    %555 = vector.extract_strided_slice %541 {offsets = [0, 2], sizes = [8, 1], strides = [1, 1]} : vector<8x3xf32> to vector<8x1xf32>
    %cst_274 = arith.constant dense<0.000000e+00> : vector<64x1xf32>
    %556 = tpu.matmul %554, %555, %cst_274 {dimension_numbers = #tpu.dot_dimension_numbers<[1], [0], [0], [1], [0, 0, 1, 1], [], []>} : vector<64x8xf32>, vector<8x1xf32>, vector<64x1xf32> -> vector<64x1xf32>
    %557 = arith.addf %552, %556 : vector<64x1xf32>
    %cst_275 = arith.constant 0.000000e+00 : f32
    %558 = vector.broadcast %cst_275 : f32 to vector<64x1xf32>
    %559 = arith.subf %558, %557 : vector<64x1xf32>
    %560 = math.exp %559 : vector<64x1xf32>
    %cst_276 = arith.constant 1.000000e+00 : f32
    %561 = vector.broadcast %cst_276 : f32 to vector<64x1xf32>
    %562 = arith.addf %561, %560 : vector<64x1xf32>
    %cst_277 = arith.constant 1.000000e+00 : f32
    %563 = vector.broadcast %cst_277 : f32 to vector<64x1xf32>
    %564 = arith.divf %563, %562 : vector<64x1xf32>
    %c0_278 = arith.constant 0 : index
    %c0_279 = arith.constant 0 : index
    %c0_280 = arith.constant 0 : index
    %565 = vector.load %arg6[%c0_278, %c0_279, %c0_280] : memref<2x64x1xf32, #tpu.memory_space<vmem>>, vector<1x64x1xf32>
    %566 = vector.shape_cast %565 : vector<1x64x1xf32> to vector<64x1xf32>
    %567 = vector.shape_cast %564 : vector<64x1xf32> to vector<1x64x1xf32>
    tpu.vector_store %arg6[%c0_278, %c0_279, %c0_280], %567 {strides = array<i32>} : memref<2x64x1xf32, #tpu.memory_space<vmem>>, vector<1x64x1xf32>,
    %568 = vector.extract_strided_slice %540 {offsets = [8, 0], sizes = [8, 3], strides = [1, 1]} : vector<16x3xf32> to vector<8x3xf32>
    %cst_281 = arith.constant 0.000000e+00 : f32
    %569 = vector.broadcast %cst_281 : f32 to vector<64x1xf32>
    %c0_282 = arith.constant 0 : index
    %c0_283 = arith.constant 0 : index
    %c0_284 = arith.constant 0 : index
    %570 = vector.load %arg5[%c0_282, %c0_283, %c0_284] : memref<3x64x8xf32, #tpu.memory_space<vmem>>, vector<1x64x8xf32>
    %571 = vector.shape_cast %570 : vector<1x64x8xf32> to vector<64x8xf32>
    %572 = vector.extract_strided_slice %568 {offsets = [0, 0], sizes = [8, 1], strides = [1, 1]} : vector<8x3xf32> to vector<8x1xf32>
    %cst_285 = arith.constant dense<0.000000e+00> : vector<64x1xf32>
    %573 = tpu.matmul %571, %572, %cst_285 {dimension_numbers = #tpu.dot_dimension_numbers<[1], [0], [0], [1], [0, 0, 1, 1], [], []>} : vector<64x8xf32>, vector<8x1xf32>, vector<64x1xf32> -> vector<64x1xf32>
    %574 = arith.addf %569, %573 : vector<64x1xf32>
    %c1_286 = arith.constant 1 : index
    %c0_287 = arith.constant 0 : index
    %c0_288 = arith.constant 0 : index
    %575 = vector.load %arg5[%c1_286, %c0_287, %c0_288] : memref<3x64x8xf32, #tpu.memory_space<vmem>>, vector<1x64x8xf32>
    %576 = vector.shape_cast %575 : vector<1x64x8xf32> to vector<64x8xf32>
    %577 = vector.extract_strided_slice %568 {offsets = [0, 1], sizes = [8, 1], strides = [1, 1]} : vector<8x3xf32> to vector<8x1xf32>
    %cst_289 = arith.constant dense<0.000000e+00> : vector<64x1xf32>
    %578 = tpu.matmul %576, %577, %cst_289 {dimension_numbers = #tpu.dot_dimension_numbers<[1], [0], [0], [1], [0, 0, 1, 1], [], []>} : vector<64x8xf32>, vector<8x1xf32>, vector<64x1xf32> -> vector<64x1xf32>
    %579 = arith.addf %574, %578 : vector<64x1xf32>
    %c2_290 = arith.constant 2 : index
    %c0_291 = arith.constant 0 : index
    %c0_292 = arith.constant 0 : index
    %580 = vector.load %arg5[%c2_290, %c0_291, %c0_292] : memref<3x64x8xf32, #tpu.memory_space<vmem>>, vector<1x64x8xf32>
    %581 = vector.shape_cast %580 : vector<1x64x8xf32> to vector<64x8xf32>
    %582 = vector.extract_strided_slice %568 {offsets = [0, 2], sizes = [8, 1], strides = [1, 1]} : vector<8x3xf32> to vector<8x1xf32>
    %cst_293 = arith.constant dense<0.000000e+00> : vector<64x1xf32>
    %583 = tpu.matmul %581, %582, %cst_293 {dimension_numbers = #tpu.dot_dimension_numbers<[1], [0], [0], [1], [0, 0, 1, 1], [], []>} : vector<64x8xf32>, vector<8x1xf32>, vector<64x1xf32> -> vector<64x1xf32>
    %584 = arith.addf %579, %583 : vector<64x1xf32>
    %cst_294 = arith.constant 0.000000e+00 : f32
    %585 = vector.broadcast %cst_294 : f32 to vector<64x1xf32>
    %586 = arith.subf %585, %584 : vector<64x1xf32>
    %587 = math.exp %586 : vector<64x1xf32>
    %cst_295 = arith.constant 1.000000e+00 : f32
    %588 = vector.broadcast %cst_295 : f32 to vector<64x1xf32>
    %589 = arith.addf %588, %587 : vector<64x1xf32>
    %cst_296 = arith.constant 1.000000e+00 : f32
    %590 = vector.broadcast %cst_296 : f32 to vector<64x1xf32>
    %591 = arith.divf %590, %589 : vector<64x1xf32>
    %c1_297 = arith.constant 1 : index
    %c0_298 = arith.constant 0 : index
    %c0_299 = arith.constant 0 : index
    %592 = vector.load %arg6[%c1_297, %c0_298, %c0_299] : memref<2x64x1xf32, #tpu.memory_space<vmem>>, vector<1x64x1xf32>
    %593 = vector.shape_cast %592 : vector<1x64x1xf32> to vector<64x1xf32>
    %594 = vector.shape_cast %591 : vector<64x1xf32> to vector<1x64x1xf32>
    tpu.vector_store %arg6[%c1_297, %c0_298, %c0_299], %594 {strides = array<i32>} : memref<2x64x1xf32, #tpu.memory_space<vmem>>, vector<1x64x1xf32>,
    return
  }
}

</mosaic_0001>

<bundles_post_ra>
// kernel: tpu_custom_call.1
= control target key start
LH: loop header
LB: loop body
LE: loop exit
PB: predicated region body
PF: predicated region fallthrough
CT: control target
= control target key end

     0   :  { %v3509_v0 = vmov 0.0   ;;  %vm3510_vm0 = vmmov 0   ;;  %vm32_vm1 = vcmask 261120   ;;  %vm1857_vm2 = vcmask 64512   ;;  %s3511_s15 = smov 127   ;;  %s3512_s16 = smov 126   ;;  %s4412_s1 = inlined_call_operand.vmem [shape: bf16[32,32], index: 1, kind: input, shape index: {}]   ;;  %s4413_s0 = inlined_call_operand.vmem [shape: f32[8,16,32], index: 0, kind: input, shape index: {}]   ;;  %s4414_s2 = inlined_call_operand.vmem [shape: f32[1,32], index: 2, kind: input, shape index: {}]   ;;  %s4415_s3 = inlined_call_operand.vmem [shape: f32[1,32], index: 3, kind: input, shape index: {}]   ;;  %s4416_s4 = inlined_call_operand.vmem [shape: bf16[8,32,3], index: 4, kind: input, shape index: {}]   ;;  %s4417_s5 = inlined_call_operand.vmem [shape: f32[3,64,8], index: 5, kind: input, shape index: {}]   ;;  %s4418_s6 = inlined_call_operand.vmem [shape: f32[2,64,1], index: 6, kind: output, shape index: {}]  }
   0x1   :  { %3099 = vmatprep.subr.bf16.mxu0 %v3509_v0  ;;  %v3552_v1 = vld [vmem:[%s4412_s1] sm:$0xff]   ;;  %3103 = vmatprep.mubr.msk.bf16.mxu0 %vm3510_vm0, %v3509_v0  ;;  %v3563_v2 = vld [vmem:[%s4412_s1 + $0x8] sm:$0xff]   ;;  %v2812_v7 = vld [vmem:[%s4413_s0 + $0x10] sm:$0xff]  ;;  %vm2313_vm3 = vcmask 7168  }
   0x2   :  { %3107 = vmatprep.subr.bf16.mxu1 %v3509_v0  ;;  %3111 = vmatprep.mubr.msk.bf16.mxu1 %vm3510_vm0, %v3509_v0  ;;  %v30_v3 = vld [vmem:[%s4413_s0] sm:$0xff]  ;;  %v31_v4 = vld [vmem:[%s4413_s0 + $0x8] sm:$0xff]  ;;  %v2813_v11 = vld [vmem:[%s4413_s0 + $0x18] sm:$0xff] }
   0x3   :  { %3100 = vmatpush3.bf16.msra.mxu0 %v3552_v1  ;;  %3108 = vmatpush3.bf16.msra.mxu1 %v3552_v1  ;;  %33 = vst.msk [vmem:[#allocation2] sm:$0xff] %vm32_vm1, %v30_v3  ;;  %34 = vst.msk [vmem:[#allocation2 + $0x8] sm:$0xff] %vm32_vm1, %v31_v4  ;;  %v35_v5 = vpack.c.bf16 %v31_v4, %v30_v3  ;;  %v2815_v18 = vld [vmem:[%s4413_s0 + $0x20] sm:$0xff]  ;;  %v2816_v22 = vld [vmem:[%s4413_s0 + $0x28] sm:$0xff] }
   0x4   :  { %3101 = vmatprep.subr.bf16.mxu0 %v3509_v0  ;;  %3109 = vmatprep.subr.bf16.mxu1 %v3509_v0  ;;  %v2818_v29 = vld [vmem:[%s4413_s0 + $0x30] sm:$0xff]  ;;  %v2819_v33 = vld [vmem:[%s4413_s0 + $0x38] sm:$0xff]  ;;  %v2821_v40 = vld [vmem:[%s4413_s0 + $0x40] sm:$0xff] }
   0x5   :  { %v2822_v44 = vld [vmem:[%s4413_s0 + $0x48] sm:$0xff]  ;;  %v2824_v51 = vld [vmem:[%s4413_s0 + $0x50] sm:$0xff]  ;;  %v2825_v55 = vld [vmem:[%s4413_s0 + $0x58] sm:$0xff] }
   0x6   :  { %v2827_v62 = vld [vmem:[%s4413_s0 + $0x60] sm:$0xff] }
   0x7   :  { %3102 = vmatpush3.bf16.msra.mxu0 %v3563_v2  ;;  %3110 = vmatpush3.bf16.msra.mxu1 %v3563_v2 }
   0x8   :  { %3115 = vmatprep.subr.bf16.mxu0 %v3509_v0  ;;  %3123 = vmatprep.subr.bf16.mxu1 %v3509_v0 }
   0xa   :  { %3104 = vmatmul.mubr.msk.bf16.vlgmr.msra.gmra.mrb[0].mxu0 %vm32_vm1, %v35_v5  ;;  %v2828_v5 = vld [vmem:[%s4413_s0 + $0x68] sm:$0xff] }
   0xb   :  { %3116 = vmatpush3.bf16.msra.mxu0 %v3552_v1  ;;  %3119 = vmatprep.mubr.msk.bf16.mxu0 %vm3510_vm0, %v3509_v0 }
   0xc   :  { %3117 = vmatprep.subr.bf16.mxu0 %v3509_v0 }
   0xf   :  { %3118 = vmatpush3.bf16.msra.mxu0 %v3563_v2 }
  0x10   :  { %3131 = vmatprep.subr.bf16.mxu0 %v3509_v0 }
  0xdd   :  { %v85_v6 = vpop.f32.mrb[0].mxu0 }
  0xde   :  { %v92_v8 = vmax.f32 %v85_v6, 0.0  ;;  %v3105_v9 = vpop.f32.mrb[1].mxu0 }
  0xdf   :  { %v88_v10 = vpop.f32.mrb[2].mxu0 }
  0xe0   :  { %v97_v12 = vadd.f32 %v2812_v7, %v92_v8  ;;  %v93_v13 = vmax.f32 %v88_v10, 0.0  ;;  %v3106_v14 = vpop.f32.mrb[3].mxu0 }
  0xe2   :  { %100 = vst.msk [vmem:[#allocation2 + $0x10] sm:$0xff] %vm32_vm1, %v97_v12  ;;  %v98_v15 = vadd.f32 %v2813_v11, %v93_v13  ;;  %v3677_v11 = vld [vmem:[#allocation2] sm:$0xff] }
  0xe3   :  { %v434_v13 = vsel %vm32_vm1, %v3677_v11, 0.0 }
  0xe4   :  { %101 = vst.msk [vmem:[#allocation2 + $0x18] sm:$0xff] %vm32_vm1, %v98_v15  ;;  %v102_v16 = vpack.c.bf16 %v98_v15, %v97_v12  ;;  %v3679_v12 = vld [vmem:[#allocation2 + $0x8] sm:$0xff] }
  0xe5   :  { %v435_v14 = vsel %vm32_vm1, %v3679_v12, 0.0 }
  0xe6   :  { %3112 = vmatmul.mubr.msk.bf16.vlgmr.msra.gmra.mrb[0].mxu1 %vm32_vm1, %v102_v16  ;;  %v436_v15 = vadd.f32 %v435_v14, %v434_v13  ;;  %v444_v16 = vmul.f32 %v3677_v11, %v3677_v11 }
  0xe7   :  { %3124 = vmatpush3.bf16.msra.mxu1 %v3552_v1  ;;  %3127 = vmatprep.mubr.msk.bf16.mxu1 %vm3510_vm0, %v3509_v0 }
  0xe8   :  { %3125 = vmatprep.subr.bf16.mxu1 %v3509_v0 }
  0xeb   :  { %3126 = vmatpush3.bf16.msra.mxu1 %v3563_v2 }
  0xec   :  { %3139 = vmatprep.subr.bf16.mxu1 %v3509_v0 }
 0x1b9   :  { %v140_v17 = vpop.f32.mrb[0].mxu1 }
 0x1ba   :  { %v147_v19 = vmax.f32 %v140_v17, 0.0  ;;  %v3113_v20 = vpop.f32.mrb[1].mxu1  ;;  %v445_v17 = vmul.f32 %v3679_v12, %v3679_v12 }
 0x1bb   :  { %v143_v21 = vpop.f32.mrb[2].mxu1  ;;  %v446_v20 = vsel %vm32_vm1, %v444_v16, 0.0 }
 0x1bc   :  { %v152_v23 = vadd.f32 %v2815_v18, %v147_v19  ;;  %v148_v24 = vmax.f32 %v143_v21, 0.0  ;;  %v3114_v25 = vpop.f32.mrb[3].mxu1  ;;  %v3689_v18 = vld [vmem:[#allocation2 + $0x18] sm:$0xff]  ;;  %v437_v19 = vrot.slane %v436_v15, 4  ;;  %v447_v21 = vsel %vm32_vm1, %v445_v17, 0.0 }
 0x1bd   :  { %v448_v25 = vadd.f32 %v447_v21, %v446_v20 }
 0x1be   :  { %155 = vst.msk [vmem:[#allocation2 + $0x20] sm:$0xff] %vm32_vm1, %v152_v23  ;;  %v153_v26 = vadd.f32 %v2816_v22, %v148_v24  ;;  %v3693_v22 = vld [vmem:[#allocation2 + $0x10] sm:$0xff]  ;;  %v438_v24 = vadd.f32 %v437_v19, %v436_v15 }
 0x1c0   :  { %156 = vst.msk [vmem:[#allocation2 + $0x28] sm:$0xff] %vm32_vm1, %v153_v26  ;;  %v157_v27 = vpack.c.bf16 %v153_v26, %v152_v23  ;;  %v459_v23 = vsel %vm32_vm1, %v3689_v18, 0.0  ;;  %v458_v26 = vsel %vm32_vm1, %v3693_v22, 0.0 }
 0x1c2   :  { %3120 = vmatmul.mubr.msk.bf16.vlgmr.msra.gmra.mrb[4].mxu0 %vm32_vm1, %v157_v27  ;;  %v460_v27 = vadd.f32 %v459_v23, %v458_v26 }
 0x1c3   :  { %3132 = vmatpush3.bf16.msra.mxu0 %v3552_v1  ;;  %3135 = vmatprep.mubr.msk.bf16.mxu0 %vm3510_vm0, %v3509_v0 }
 0x1c4   :  { %3133 = vmatprep.subr.bf16.mxu0 %v3509_v0 }
 0x1c7   :  { %3134 = vmatpush3.bf16.msra.mxu0 %v3563_v2 }
 0x1c8   :  { %3147 = vmatprep.subr.bf16.mxu0 %v3509_v0 }
 0x295   :  { %v195_v28 = vpop.f32.mrb[4].mxu0 }
 0x296   :  { %v202_v30 = vmax.f32 %v195_v28, 0.0  ;;  %v3121_v31 = vpop.f32.mrb[5].mxu0  ;;  %v469_v28 = vmul.f32 %v3689_v18, %v3689_v18 }
 0x297   :  { %v198_v32 = vpop.f32.mrb[6].mxu0  ;;  %v449_v31 = vrot.slane %v448_v25, 4 }
 0x298   :  { %v207_v34 = vadd.f32 %v2818_v29, %v202_v30  ;;  %v203_v35 = vmax.f32 %v198_v32, 0.0  ;;  %v3122_v36 = vpop.f32.mrb[7].mxu0  ;;  %v3701_v29 = vld [vmem:[#allocation2 + $0x28] sm:$0xff]  ;;  %v439_v30 = vrot.slane %v438_v24, 2  ;;  %v468_v32 = vmul.f32 %v3693_v22, %v3693_v22 }
 0x299   :  { %v471_v36 = vsel %vm32_vm1, %v469_v28, 0.0 }
 0x29a   :  { %210 = vst.msk [vmem:[#allocation2 + $0x30] sm:$0xff] %vm32_vm1, %v207_v34  ;;  %v208_v37 = vadd.f32 %v2819_v33, %v203_v35  ;;  %v3705_v33 = vld [vmem:[#allocation2 + $0x20] sm:$0xff]  ;;  %v461_v35 = vrot.slane %v460_v27, 4 }
 0x29c   :  { %211 = vst.msk [vmem:[#allocation2 + $0x38] sm:$0xff] %vm32_vm1, %v208_v37  ;;  %v212_v38 = vpack.c.bf16 %v208_v37, %v207_v34  ;;  %v493_v37 = vmul.f32 %v3701_v29, %v3701_v29 }
 0x29e   :  { %3128 = vmatmul.mubr.msk.bf16.vlgmr.msra.gmra.mrb[4].mxu1 %vm32_vm1, %v212_v38 }
 0x29f   :  { %3140 = vmatpush3.bf16.msra.mxu1 %v3552_v1  ;;  %3143 = vmatprep.mubr.msk.bf16.mxu1 %vm3510_vm0, %v3509_v0 }
 0x2a0   :  { %3141 = vmatprep.subr.bf16.mxu1 %v3509_v0 }
 0x2a1   :  { %v3712_v38 = vld [vmem:[#allocation2 + $0x30] sm:$0xff] }
 0x2a3   :  { %3142 = vmatpush3.bf16.msra.mxu1 %v3563_v2  ;;  %v3707_v34 = vld [vmem:[#allocation2 + $0x38] sm:$0xff] }
 0x2a4   :  { %3155 = vmatprep.subr.bf16.mxu1 %v3509_v0 }
 0x371   :  { %v250_v39 = vpop.f32.mrb[4].mxu1 }
 0x372   :  { %v257_v41 = vmax.f32 %v250_v39, 0.0  ;;  %v3129_v42 = vpop.f32.mrb[5].mxu1 }
 0x373   :  { %v253_v43 = vpop.f32.mrb[6].mxu1  ;;  %v470_v42 = vsel %vm32_vm1, %v468_v32, 0.0 }
 0x374   :  { %v262_v45 = vadd.f32 %v2821_v40, %v257_v41  ;;  %v258_v46 = vmax.f32 %v253_v43, 0.0  ;;  %v3130_v47 = vpop.f32.mrb[7].mxu1  ;;  %v3716_v40 = vadd.f32 %v439_v30, %v438_v24  ;;  %v3718_v41 = vadd.f32 %v449_v31, %v448_v25 }
 0x375   :  { %v492_v43 = vmul.f32 %v3705_v33, %v3705_v33  ;;  %v472_v47 = vadd.f32 %v471_v36, %v470_v42 }
 0x376   :  { %265 = vst.msk [vmem:[#allocation2 + $0x40] sm:$0xff] %vm32_vm1, %v262_v45  ;;  %v263_v48 = vadd.f32 %v2822_v44, %v258_v46  ;;  %v483_v44 = vsel %vm32_vm1, %v3701_v29, 0.0 }
 0x378   :  { %266 = vst.msk [vmem:[#allocation2 + $0x48] sm:$0xff] %vm32_vm1, %v263_v48  ;;  %v267_v49 = vpack.c.bf16 %v263_v48, %v262_v45  ;;  %v517_v45 = vmul.f32 %v3707_v34, %v3707_v34  ;;  %v482_v48 = vsel %vm32_vm1, %v3705_v33, 0.0 }
 0x37a   :  { %3136 = vmatmul.mubr.msk.bf16.vlgmr.msra.gmra.mrb[8].mxu0 %vm32_vm1, %v267_v49  ;;  %v462_v49 = vadd.f32 %v461_v35, %v460_v27 }
 0x37b   :  { %3148 = vmatpush3.bf16.msra.mxu0 %v3552_v1  ;;  %3151 = vmatprep.mubr.msk.bf16.mxu0 %vm3510_vm0, %v3509_v0 }
 0x37c   :  { %3149 = vmatprep.subr.bf16.mxu0 %v3509_v0 }
 0x37d   :  { %v3727_v46 = vld [vmem:[#allocation2 + $0x40] sm:$0xff] }
 0x37e   :  { %v530_v15 = vsel %vm32_vm1, %v3727_v46, 0.0 }
 0x37f   :  { %3150 = vmatpush3.bf16.msra.mxu0 %v3563_v2  ;;  %v3714_v39 = vld [vmem:[#allocation2 + $0x48] sm:$0xff] }
 0x380   :  { %3163 = vmatprep.subr.bf16.mxu0 %v3509_v0 }
 0x44d   :  { %v305_v50 = vpop.f32.mrb[8].mxu0 }
 0x44e   :  { %v312_v52 = vmax.f32 %v305_v50, 0.0  ;;  %v3137_v53 = vpop.f32.mrb[9].mxu0  ;;  %v495_v50 = vsel %vm32_vm1, %v493_v37, 0.0 }
 0x44f   :  { %v308_v54 = vpop.f32.mrb[10].mxu0  ;;  %v541_v53 = vmul.f32 %v3714_v39, %v3714_v39 }
 0x450   :  { %v317_v56 = vadd.f32 %v2824_v51, %v312_v52  ;;  %v313_v57 = vmax.f32 %v308_v54, 0.0  ;;  %v3138_v58 = vpop.f32.mrb[11].mxu0  ;;  %v516_v51 = vmul.f32 %v3712_v38, %v3712_v38  ;;  %v507_v52 = vsel %vm32_vm1, %v3707_v34, 0.0 }
 0x451   :  { %v484_v54 = vadd.f32 %v483_v44, %v482_v48  ;;  %v494_v58 = vsel %vm32_vm1, %v492_v43, 0.0 }
 0x452   :  { %320 = vst.msk [vmem:[#allocation2 + $0x50] sm:$0xff] %vm32_vm1, %v317_v56  ;;  %v318_v59 = vadd.f32 %v2825_v55, %v313_v57  ;;  %v540_v55 = vmul.f32 %v3727_v46, %v3727_v46  ;;  %v451_v57 = vrot.slane %v3718_v41, 2 }
 0x453   :  { %v485_v13 = vrot.slane %v484_v54, 4 }
 0x454   :  { %321 = vst.msk [vmem:[#allocation2 + $0x58] sm:$0xff] %vm32_vm1, %v318_v59  ;;  %v322_v60 = vpack.c.bf16 %v318_v59, %v317_v56  ;;  %v506_v59 = vsel %vm32_vm1, %v3712_v38, 0.0  ;;  %v542_v16 = vsel %vm32_vm1, %v540_v55, 0.0 }
 0x455   :  { %v486_v42 = vadd.f32 %v485_v13, %v484_v54 }
 0x456   :  { %3144 = vmatmul.mubr.msk.bf16.vlgmr.msra.gmra.mrb[8].mxu1 %vm32_vm1, %v322_v60  ;;  %v519_v60 = vsel %vm32_vm1, %v517_v45, 0.0 }
 0x457   :  { %3156 = vmatpush3.bf16.msra.mxu1 %v3552_v1  ;;  %3159 = vmatprep.mubr.msk.bf16.mxu1 %vm3510_vm0, %v3509_v0 }
 0x458   :  { %3157 = vmatprep.subr.bf16.mxu1 %v3509_v0 }
 0x45b   :  { %3158 = vmatpush3.bf16.msra.mxu1 %v3563_v2  ;;  %v3740_v56 = vld [vmem:[#allocation2 + $0x58] sm:$0xff] }
 0x45c   :  { %3171 = vmatprep.subr.bf16.mxu1 %v3509_v0  ;;  %v555_v21 = vsel %vm32_vm1, %v3740_v56, 0.0 }
 0x529   :  { %v360_v61 = vpop.f32.mrb[8].mxu1 }
 0x52a   :  { %v367_v63 = vmax.f32 %v360_v61, 0.0  ;;  %v3145_v3 = vpop.f32.mrb[9].mxu1  ;;  %v441_v61 = vrot.slane %v3716_v40, 1 }
 0x52b   :  { %v363_v4 = vpop.f32.mrb[10].mxu1  ;;  %v531_v3 = vsel %vm32_vm1, %v3714_v39, 0.0 }
 0x52c   :  { %v372_v6 = vadd.f32 %v2827_v62, %v367_v63  ;;  %v368_v7 = vmax.f32 %v363_v4, 0.0  ;;  %v3146_v8 = vpop.f32.mrb[11].mxu1  ;;  %v496_v62 = vadd.f32 %v495_v50, %v494_v58  ;;  %v508_v63 = vadd.f32 %v507_v52, %v506_v59  ;;  %v3750_v4 = vld [vmem:[#allocation2 + $0x50] sm:$0xff] }
 0x52d   :  { %v543_v8 = vsel %vm32_vm1, %v541_v53, 0.0  ;;  %v532_v19 = vadd.f32 %v531_v3, %v530_v15  ;;  %v564_v20 = vmul.f32 %v3750_v4, %v3750_v4  ;;  %v554_v28 = vsel %vm32_vm1, %v3750_v4, 0.0  ;;  %v2830_v52 = vld [vmem:[%s4413_s0 + $0x70] sm:$0xff] }
 0x52e   :  { %375 = vst.msk [vmem:[#allocation2 + $0x60] sm:$0xff] %vm32_vm1, %v372_v6  ;;  %v373_v9 = vadd.f32 %v2828_v5, %v368_v7  ;;  %v518_v7 = vsel %vm32_vm1, %v516_v51, 0.0  ;;  %v497_v24 = vrot.slane %v496_v62, 4  ;;  %v509_v25 = vrot.slane %v508_v63, 4 }
 0x52f   :  { %v520_v14 = vadd.f32 %v519_v60, %v518_v7  ;;  %v544_v26 = vadd.f32 %v543_v8, %v542_v16  ;;  %v556_v36 = vadd.f32 %v555_v21, %v554_v28  ;;  %v533_v43 = vrot.slane %v532_v19, 4 }
 0x530   :  { %376 = vst.msk [vmem:[#allocation2 + $0x68] sm:$0xff] %vm32_vm1, %v373_v9  ;;  %v377_v10 = vpack.c.bf16 %v373_v9, %v372_v6  ;;  %v473_v6 = vrot.slane %v472_v47, 4  ;;  %v565_v9 = vmul.f32 %v3740_v56, %v3740_v56  ;;  %v566_v44 = vsel %vm32_vm1, %v564_v20, 0.0 }
 0x531   :  { %v521_v35 = vrot.slane %v520_v14, 4  ;;  %v498_v55 = vadd.f32 %v497_v24, %v496_v62  ;;  %v510_v58 = vadd.f32 %v509_v25, %v508_v63  ;;  %v534_v13 = vadd.f32 %v533_v43, %v532_v19 }
 0x532   :  { %3152 = vmatmul.mubr.msk.bf16.vlgmr.msra.gmra.mrb[12].mxu0 %vm32_vm1, %v377_v10  ;;  %v463_v10 = vrot.slane %v462_v49, 2  ;;  %v474_v27 = vadd.f32 %v473_v6, %v472_v47  ;;  %v567_v30 = vsel %vm32_vm1, %v565_v9, 0.0  ;;  %v557_v6 = vrot.slane %v556_v36, 4  ;;  %v2831_v9 = vld [vmem:[%s4413_s0 + $0x78] sm:$0xff] }
 0x533   :  { %3164 = vmatpush3.bf16.msra.mxu0 %v3552_v1  ;;  %3167 = vmatprep.mubr.msk.bf16.mxu0 %vm3510_vm0, %v3509_v0  ;;  %v568_v48 = vadd.f32 %v567_v30, %v566_v44  ;;  %v522_v3 = vadd.f32 %v521_v35, %v520_v14  ;;  %v452_v62 = vadd.f32 %v451_v57, %v3718_v41  ;;  %v499_v24 = vrot.slane %v498_v55, 2 }
 0x534   :  { %3165 = vmatprep.subr.bf16.mxu0 %v3509_v0  ;;  %v464_v37 = vadd.f32 %v463_v10, %v462_v49  ;;  %v475_v53 = vrot.slane %v474_v27, 2  ;;  %v545_v49 = vrot.slane %v544_v26, 4  ;;  %v487_v10 = vrot.slane %v486_v42, 2 }
 0x535   :  { %v3761_v17 = vld [vmem:[#allocation2 + $0x60] sm:$0xff]  ;;  %v569_v63 = vrot.slane %v568_v48, 4  ;;  %v511_v30 = vrot.slane %v510_v58, 2  ;;  %v523_v44 = vrot.slane %v522_v3, 2  ;;  %v535_v19 = vrot.slane %v534_v13, 2 }
 0x536   :  { %v588_v31 = vmul.f32 %v3761_v17, %v3761_v17  ;;  %v578_v45 = vsel %vm32_vm1, %v3761_v17, 0.0  ;;  %v546_v25 = vadd.f32 %v545_v49, %v544_v26  ;;  %v476_v28 = vadd.f32 %v475_v53, %v474_v27 }
 0x537   :  { %3166 = vmatpush3.bf16.msra.mxu0 %v3563_v2  ;;  %v3752_v5 = vld [vmem:[#allocation2 + $0x68] sm:$0xff]  ;;  %v488_v35 = vadd.f32 %v487_v10, %v486_v42  ;;  %v442_v41 = vadd.f32 %v441_v61, %v3716_v40  ;;  %v453_v57 = vrot.slane %v452_v62, 1  ;;  %v570_v43 = vadd.f32 %v569_v63, %v568_v48 }
 0x538   :  { %3179 = vmatprep.subr.bf16.mxu0 %v3509_v0  ;;  %v589_v23 = vmul.f32 %v3752_v5, %v3752_v5  ;;  %v579_v32 = vsel %vm32_vm1, %v3752_v5, 0.0  ;;  %v590_v54 = vsel %vm32_vm1, %v588_v31, 0.0  ;;  %v558_v31 = vadd.f32 %v557_v6, %v556_v36 }
 0x539   :  { %v580_v50 = vadd.f32 %v579_v32, %v578_v45  ;;  %v512_v27 = vadd.f32 %v511_v30, %v510_v58  ;;  %v489_v49 = vrot.slane %v488_v35, 1  ;;  %v524_v42 = vadd.f32 %v523_v44, %v522_v3 }
 0x53a   :  { %v591_v47 = vsel %vm32_vm1, %v589_v23, 0.0  ;;  %v465_v23 = vrot.slane %v464_v37, 1  ;;  %v559_v53 = vrot.slane %v558_v31, 2 }
 0x53b   :  { %v592_v7 = vadd.f32 %v591_v47, %v590_v54  ;;  %v581_v21 = vrot.slane %v580_v50, 4  ;;  %v500_v47 = vadd.f32 %v499_v24, %v498_v55  ;;  %v454_v54 = vadd.f32 %v453_v57, %v452_v62 }
 0x53c   :  { %v466_v26 = vadd.f32 %v465_v23, %v464_v37  ;;  %v513_v48 = vrot.slane %v512_v27, 1  ;;  %v560_v55 = vadd.f32 %v559_v53, %v558_v31  ;;  %v525_v3 = vrot.slane %v524_v42, 1 }
 0x53d   :  { %v593_v32 = vrot.slane %v592_v7, 4  ;;  %v582_v45 = vadd.f32 %v581_v21, %v580_v50  ;;  %v501_v40 = vrot.slane %v500_v47, 1 }
 0x53f   :  { %v594_v36 = vadd.f32 %v593_v32, %v592_v7  ;;  %v583_v6 = vrot.slane %v582_v45, 2  ;;  %v490_v7 = vadd.f32 %v489_v49, %v488_v35  ;;  %v502_v23 = vadd.f32 %v501_v40, %v500_v47 }
 0x540   :  { %v561_v35 = vrot.slane %v560_v55, 1 }
 0x541   :  { %v595_v58 = vrot.slane %v594_v36, 2  ;;  %v584_v63 = vadd.f32 %v583_v6, %v582_v45 }
 0x543   :  { %v596_v30 = vadd.f32 %v595_v58, %v594_v36 }
 0x545   :  { %v597_v49 = vrot.slane %v596_v30, 1 }
 0x605   :  { %v415_v51 = vpop.f32.mrb[12].mxu0 }
 0x606   :  { %v422_v59 = vmax.f32 %v415_v51, 0.0  ;;  %v3153_v60 = vpop.f32.mrb[13].mxu0  ;;  %v547_v51 = vrot.slane %v546_v25, 2 }
 0x607   :  { %v418_v8 = vpop.f32.mrb[14].mxu0  ;;  %v571_v60 = vrot.slane %v570_v43, 2 }
 0x608   :  { %v427_v15 = vadd.f32 %v2830_v52, %v422_v59  ;;  %v423_v16 = vmax.f32 %v418_v8, 0.0  ;;  %v3154_v20 = vpop.f32.mrb[15].mxu0  ;;  %v477_v52 = vrot.slane %v476_v28, 1  ;;  %v536_v59 = vadd.f32 %v535_v19, %v534_v13 }
 0x609   :  { %v548_v50 = vadd.f32 %v547_v51, %v546_v25  ;;  %v572_v62 = vadd.f32 %v571_v60, %v570_v43 }
 0x60a   :  { %430 = vst.msk [vmem:[#allocation2 + $0x70] sm:$0xff] %vm32_vm1, %v427_v15  ;;  %v428_v14 = vadd.f32 %v2831_v9, %v423_v16  ;;  %v467_v9 = vadd.f32 %v466_v26, %v442_v41  ;;  %v478_v37 = vadd.f32 %v477_v52, %v476_v28  ;;  %v537_v20 = vrot.slane %v536_v59, 1 }
 0x60b   :  { %v549_v28 = vrot.slane %v548_v50, 1  ;;  %v526_v41 = vadd.f32 %v525_v3, %v524_v42  ;;  %v585_v26 = vrot.slane %v584_v63, 1  ;;  %v573_v45 = vrot.slane %v572_v62, 1 }
 0x60c   :  { %431 = vst.msk [vmem:[#allocation2 + $0x78] sm:$0xff] %vm32_vm1, %v428_v14  ;;  %v514_v14 = vadd.f32 %v513_v48, %v512_v27  ;;  %v479_v44 = vadd.f32 %v478_v37, %v454_v54  ;;  %v491_v19 = vadd.f32 %v490_v7, %v467_v9  ;;  %v538_v57 = vadd.f32 %v537_v20, %v536_v59 }
 0x60d   :  { %v550_v53 = vadd.f32 %v549_v28, %v548_v50  ;;  %v562_v27 = vadd.f32 %v561_v35, %v560_v55  ;;  %v574_v58 = vadd.f32 %v573_v45, %v572_v62  ;;  %v586_v54 = vadd.f32 %v585_v26, %v584_v63 }
 0x60e   :  { %v503_v52 = vadd.f32 %v502_v23, %v479_v44  ;;  %v515_v47 = vadd.f32 %v514_v14, %v491_v19  ;;  %v598_v7 = vadd.f32 %v597_v49, %v596_v30  ;;  %v635_v63 = vlaneseq  ;;  %v3810_v30 = vld [vmem:[%s4414_s2] sm:$0x1] }
 0x60f   :  { %v3818_v19 = vld [vmem:[%s4415_s3] sm:$0x1] }
 0x610   :  { %v527_v40 = vadd.f32 %v526_v41, %v503_v52  ;;  %v539_v36 = vadd.f32 %v538_v57, %v515_v47 }
 0x611   :  { %v3793_v8 = vld [vmem:[#allocation2 + $0x70] sm:$0xff] }
 0x612   :  { %v612_v61 = vmul.f32 %v3793_v8, %v3793_v8  ;;  %v602_v13 = vsel %vm32_vm1, %v3793_v8, 0.0  ;;  %v551_v9 = vadd.f32 %v550_v53, %v527_v40  ;;  %v563_v37 = vadd.f32 %v562_v27, %v539_v36 }
 0x613   :  { %v3797_v10 = vld [vmem:[#allocation2 + $0x78] sm:$0xff] }
 0x614   :  { %v603_v15 = vsel %vm32_vm1, %v3797_v10, 0.0  ;;  %v613_v16 = vmul.f32 %v3797_v10, %v3797_v10  ;;  %v614_v24 = vsel %vm32_vm1, %v612_v61, 0.0 }
 0x615   :  { %v604_v21 = vadd.f32 %v603_v15, %v602_v13  ;;  %v575_v15 = vadd.f32 %v574_v58, %v551_v9 }
 0x616   :  { %v615_v25 = vsel %vm32_vm1, %v613_v16, 0.0  ;;  %v587_v16 = vadd.f32 %v586_v54, %v563_v37 }
 0x617   :  { %v605_v31 = vrot.slane %v604_v21, 4  ;;  %v616_v32 = vadd.f32 %v615_v25, %v614_v24  ;;  %v599_v20 = vadd.f32 %v598_v7, %v575_v15 }
 0x619   :  { %v606_v51 = vadd.f32 %v605_v31, %v604_v21  ;;  %v617_v43 = vrot.slane %v616_v32, 4  ;;  %v636_v31 = vshrl.u32 %v635_v63, 7 }
 0x61b   :  { %v607_v60 = vrot.slane %v606_v51, 2  ;;  %v618_v6 = vadd.f32 %v617_v43, %v616_v32  ;;  %v3812_v32 = vsub.s32 0, %v636_v31 }
 0x61d   :  { %v608_v61 = vadd.f32 %v607_v60, %v606_v51  ;;  %v619_v48 = vrot.slane %v618_v6, 2 }
 0x61f   :  { %v609_v42 = vrot.slane %v608_v61, 1  ;;  %v620_v59 = vadd.f32 %v619_v48, %v618_v6 }
 0x621   :  { %v610_v3 = vadd.f32 %v609_v42, %v608_v61  ;;  %v621_v13 = vrot.slane %v620_v59, 1 }
 0x623   :  { %v622_v50 = vadd.f32 %v621_v13, %v620_v59  ;;  %v611_v21 = vadd.f32 %v610_v3, %v587_v16 }
 0x625   :  { %v623_v23 = vadd.f32 %v622_v50, %v599_v20  ;;  %v624_v55 = vmul.f32 0.0078125, %v611_v21 }
 0x627   :  { %v625_v24 = vmul.f32 0.0078125, %v623_v23  ;;  %v626_v25 = vmul.f32 %v624_v55, %v624_v55 }
 0x629   :  { %v627_v14 = vsub.f32 %v625_v24, %v626_v25 }
 0x62b   :  { %v628_v28 = vmax.f32 %v627_v14, 0.0 }
 0x62d   :  { %v629_v62 = vadd.f32 1e-05, %v628_v28 }
 0x62f   :  { %3441 = vrsqrt.f32 %v629_v62 }
 0x639   :  { %v3442_v35 = vpop.eup %3441 }
 0x63a   :  { %v631_v44 = vmul.f32 %v3442_v35, %v3810_v30 }
 0x63c   :  { %v632_v41 = vmul.f32 %v631_v44, %v624_v55  ;;  %v638_v57 = vrot.slane %v631_v44, %v3812_v32 }
 0x63e   :  { %v633_v26 = vsub.f32 %v3818_v19, %v632_v41  ;;  %v640_v51 = vmul.f32 %v638_v57, %v3677_v11  ;;  %v641_v43 = vmul.f32 %v638_v57, %v3679_v12  ;;  %v703_v52 = vmul.f32 %v638_v57, %v3693_v22 }
 0x63f   :  { %v704_v47 = vmul.f32 %v638_v57, %v3689_v18  ;;  %v762_v53 = vmul.f32 %v638_v57, %v3705_v33  ;;  %v763_v49 = vmul.f32 %v638_v57, %v3701_v29  ;;  %v821_v60 = vmul.f32 %v638_v57, %v3712_v38 }
 0x640   :  { %v646_v45 = vrot.slane %v633_v26, %v3812_v32  ;;  %v822_v6 = vmul.f32 %v638_v57, %v3707_v34  ;;  %v880_v27 = vmul.f32 %v638_v57, %v3727_v46  ;;  %v881_v29 = vmul.f32 %v638_v57, %v3714_v39 }
 0x641   :  { %v939_v38 = vmul.f32 %v638_v57, %v3750_v4  ;;  %v940_v34 = vmul.f32 %v638_v57, %v3740_v56  ;;  %v998_v46 = vmul.f32 %v638_v57, %v3761_v17  ;;  %v999_v54 = vmul.f32 %v638_v57, %v3752_v5 }
 0x642   :  { %v648_v40 = vadd.f32 %v646_v45, %v640_v51  ;;  %v649_v11 = vadd.f32 %v646_v45, %v641_v43  ;;  %v705_v36 = vadd.f32 %v703_v52, %v646_v45  ;;  %v706_v12 = vadd.f32 %v704_v47, %v646_v45 }
 0x643   :  { %v764_v61 = vadd.f32 %v762_v53, %v646_v45  ;;  %v765_v48 = vadd.f32 %v763_v49, %v646_v45  ;;  %v3832_v58 = vadd.f32 %v821_v60, %v646_v45  ;;  %v3834_v22 = vadd.f32 %v822_v6, %v646_v45 }
 0x644   :  { %v650_v18 = vmax.f32 %v648_v40, 0.0  ;;  %v651_v33 = vmax.f32 %v649_v11, 0.0  ;;  %v3843_v42 = vadd.f32 %v880_v27, %v646_v45  ;;  %v3845_v59 = vadd.f32 %v881_v29, %v646_v45 }
 0x645   :  { %v3847_v37 = vadd.f32 %v939_v38, %v646_v45  ;;  %v3849_v39 = vadd.f32 %v940_v34, %v646_v45  ;;  %v3851_v4 = vadd.f32 %v998_v46, %v646_v45  ;;  %v3853_v56 = vadd.f32 %v999_v54, %v646_v45 }
 0x646   :  { %652 = vst.msk [vmem:[#allocation2] sm:$0xff] %vm32_vm1, %v650_v18  ;;  %653 = vst.msk [vmem:[#allocation2 + $0x8] sm:$0xff] %vm32_vm1, %v651_v33  ;;  %v654_v9 = vpack.c.bf16 %v651_v33, %v650_v18  ;;  %v1057_v17 = vmul.f32 %v638_v57, %v3793_v8  ;;  %v1058_v5 = vmul.f32 %v638_v57, %v3797_v10  ;;  %v707_v15 = vmax.f32 %v705_v36, 0.0 }
 0x647   :  { %v708_v21 = vmax.f32 %v706_v12, 0.0  ;;  %v766_v28 = vmax.f32 %v764_v61, 0.0  ;;  %v767_v44 = vmax.f32 %v765_v48, 0.0  ;;  %v826_v60 = vmax.f32 %v3834_v22, 0.0 }
 0x648   :  { %3160 = vmatmul.mubr.msk.bf16.vlgmr.msra.gmra.mrb[12].mxu1 %vm32_vm1, %v654_v9  ;;  %v3861_v7 = vadd.f32 %v1057_v17, %v646_v45  ;;  %v3864_v3 = vadd.f32 %v1058_v5, %v646_v45  ;;  %v825_v45 = vmax.f32 %v3832_v58, 0.0  ;;  %v884_v12 = vmax.f32 %v3843_v42, 0.0 }
 0x649   :  { %3172 = vmatpush3.bf16.msra.mxu1 %v3552_v1  ;;  %3175 = vmatprep.mubr.msk.bf16.mxu1 %vm3510_vm0, %v3509_v0  ;;  %v885_v18 = vmax.f32 %v3845_v59, 0.0  ;;  %v943_v54 = vmax.f32 %v3847_v37, 0.0  ;;  %v944_v5 = vmax.f32 %v3849_v39, 0.0 }
 0x64a   :  { %3173 = vmatprep.subr.bf16.mxu1 %v3509_v0 }
 0x64d   :  { %3174 = vmatpush3.bf16.msra.mxu1 %v3563_v2 }
 0x64e   :  { %3187 = vmatprep.subr.bf16.mxu1 %v3509_v0 }
 0x71b   :  { %v692_v8 = vpop.f32.mrb[12].mxu1 }
 0x71c   :  { %v699_v13 = vmax.f32 %v692_v8, 0.0  ;;  %v3161_v16 = vpop.f32.mrb[13].mxu1 }
 0x71d   :  { %v695_v10 = vpop.f32.mrb[14].mxu1 }
 0x71e   :  { %v709_v50 = vadd.f32 %v707_v15, %v699_v13  ;;  %v700_v20 = vmax.f32 %v695_v10, 0.0  ;;  %v3162_v23 = vpop.f32.mrb[15].mxu1  ;;  %v1002_v15 = vmax.f32 %v3851_v4, 0.0  ;;  %v3426_v4 = vld [vmem:[%s4416_s4 + $0x18] sm:$0xff]  }
 0x720   :  { %711 = vst.msk [vmem:[#allocation2 + $0x10] sm:$0xff] %vm32_vm1, %v709_v50  ;;  %v710_v55 = vadd.f32 %v708_v21, %v700_v20  ;;  %v1003_v20 = vmax.f32 %v3853_v56, 0.0  ;;  %v3927_v56 = vld [vmem:[#allocation2] sm:$0xff] }
 0x722   :  { %712 = vst.msk [vmem:[#allocation2 + $0x18] sm:$0xff] %vm32_vm1, %v710_v55  ;;  %v713_v24 = vpack.c.bf16 %v710_v55, %v709_v50 }
 0x724   :  { %3168 = vmatmul.mubr.msk.bf16.vlgmr.msra.gmra.mrb[16].mxu0 %vm32_vm1, %v713_v24  ;;  %v3425_v24 = vld [vmem:[%s4416_s4 + $0x10] sm:$0xff]  }
 0x725   :  { %3180 = vmatpush3.bf16.msra.mxu0 %v3552_v1  ;;  %3183 = vmatprep.mubr.msk.bf16.mxu0 %vm3510_vm0, %v3509_v0 }
 0x726   :  { %3181 = vmatprep.subr.bf16.mxu0 %v3509_v0 }
 0x729   :  { %3182 = vmatpush3.bf16.msra.mxu0 %v3563_v2 }
 0x72a   :  { %3195 = vmatprep.subr.bf16.mxu0 %v3509_v0 }
 0x7f7   :  { %v751_v25 = vpop.f32.mrb[16].mxu0 }
 0x7f8   :  { %v758_v14 = vmax.f32 %v751_v25, 0.0  ;;  %v3169_v62 = vpop.f32.mrb[17].mxu0  ;;  %v3929_v25 = vld [vmem:[#allocation2 + $0x8] sm:$0xff] }
 0x7f9   :  { %v754_v63 = vpop.f32.mrb[18].mxu0 }
 0x7fa   :  { %v768_v31 = vadd.f32 %v766_v28, %v758_v14  ;;  %v759_v35 = vmax.f32 %v754_v63, 0.0  ;;  %v3170_v41 = vpop.f32.mrb[19].mxu0  ;;  %v1069_v14 = vsel %vm32_vm1, %v3927_v56, 0.0  ;;  %v1070_v28 = vsel %vm32_vm1, %v3929_v25, 0.0 }
 0x7fb   :  { %v1071_v62 = vadd.f32 %v1070_v28, %v1069_v14  ;;  %v1079_v63 = vmul.f32 %v3927_v56, %v3927_v56 }
 0x7fc   :  { %770 = vst.msk [vmem:[#allocation2 + $0x20] sm:$0xff] %vm32_vm1, %v768_v31  ;;  %v769_v57 = vadd.f32 %v767_v44, %v759_v35  ;;  %v3939_v44 = vld [vmem:[#allocation2 + $0x18] sm:$0xff] }
 0x7fd   :  { %v1072_v35 = vrot.slane %v1071_v62, 4  ;;  %v1081_v41 = vsel %vm32_vm1, %v1079_v63, 0.0 }
 0x7fe   :  { %771 = vst.msk [vmem:[#allocation2 + $0x28] sm:$0xff] %vm32_vm1, %v769_v57  ;;  %v772_v26 = vpack.c.bf16 %v769_v57, %v768_v31  ;;  %v1080_v31 = vmul.f32 %v3929_v25, %v3929_v25 }
 0x800   :  { %3176 = vmatmul.mubr.msk.bf16.vlgmr.msra.gmra.mrb[16].mxu1 %vm32_vm1, %v772_v26  ;;  %v1082_v57 = vsel %vm32_vm1, %v1080_v31, 0.0  ;;  %v3943_v26 = vld [vmem:[#allocation2 + $0x10] sm:$0xff] }
 0x801   :  { %3188 = vmatpush3.bf16.msra.mxu1 %v3552_v1  ;;  %3191 = vmatprep.mubr.msk.bf16.mxu1 %vm3510_vm0, %v3509_v0 }
 0x802   :  { %3189 = vmatprep.subr.bf16.mxu1 %v3509_v0 }
 0x805   :  { %3190 = vmatpush3.bf16.msra.mxu1 %v3563_v2 }
 0x806   :  { %3203 = vmatprep.subr.bf16.mxu1 %v3509_v0 }
 0x8d3   :  { %v810_v51 = vpop.f32.mrb[16].mxu1 }
 0x8d4   :  { %v817_v43 = vmax.f32 %v810_v51, 0.0  ;;  %v3177_v52 = vpop.f32.mrb[17].mxu1  ;;  %v1094_v51 = vsel %vm32_vm1, %v3939_v44, 0.0 }
 0x8d5   :  { %v813_v47 = vpop.f32.mrb[18].mxu1  ;;  %v1093_v52 = vsel %vm32_vm1, %v3943_v26, 0.0 }
 0x8d6   :  { %v827_v53 = vadd.f32 %v825_v45, %v817_v43  ;;  %v818_v49 = vmax.f32 %v813_v47, 0.0  ;;  %v3178_v6 = vpop.f32.mrb[19].mxu1  ;;  %v1073_v43 = vadd.f32 %v1072_v35, %v1071_v62  ;;  %v1083_v45 = vadd.f32 %v1082_v57, %v1081_v41 }
 0x8d7   :  { %v1095_v47 = vadd.f32 %v1094_v51, %v1093_v52  ;;  %v3951_v6 = vld [vmem:[#allocation2 + $0x28] sm:$0xff] }
 0x8d8   :  { %829 = vst.msk [vmem:[#allocation2 + $0x30] sm:$0xff] %vm32_vm1, %v827_v53  ;;  %v828_v27 = vadd.f32 %v826_v60, %v818_v49  ;;  %v1074_v49 = vrot.slane %v1073_v43, 2  ;;  %v1084_v60 = vrot.slane %v1083_v45, 4 }
 0x8da   :  { %830 = vst.msk [vmem:[#allocation2 + $0x38] sm:$0xff] %vm32_vm1, %v828_v27  ;;  %v831_v40 = vpack.c.bf16 %v828_v27, %v827_v53  ;;  %v1104_v53 = vmul.f32 %v3939_v44, %v3939_v44  ;;  %v1103_v27 = vmul.f32 %v3943_v26, %v3943_v26 }
 0x8dc   :  { %3184 = vmatmul.mubr.msk.bf16.vlgmr.msra.gmra.mrb[20].mxu0 %vm32_vm1, %v831_v40  ;;  %v1096_v40 = vrot.slane %v1095_v47, 4 }
 0x8dd   :  { %3196 = vmatpush3.bf16.msra.mxu0 %v3552_v1  ;;  %3199 = vmatprep.mubr.msk.bf16.mxu0 %vm3510_vm0, %v3509_v0 }
 0x8de   :  { %3197 = vmatprep.subr.bf16.mxu0 %v3509_v0 }
 0x8e1   :  { %3198 = vmatpush3.bf16.msra.mxu0 %v3563_v2 }
 0x8e2   :  { %3211 = vmatprep.subr.bf16.mxu0 %v3509_v0 }
 0x9af   :  { %v869_v11 = vpop.f32.mrb[20].mxu0 }
 0x9b0   :  { %v876_v36 = vmax.f32 %v869_v11, 0.0  ;;  %v3185_v61 = vpop.f32.mrb[21].mxu0  ;;  %v3955_v11 = vld [vmem:[#allocation2 + $0x20] sm:$0xff] }
 0x9b1   :  { %v872_v48 = vpop.f32.mrb[22].mxu0  ;;  %v1128_v61 = vmul.f32 %v3951_v6, %v3951_v6 }
 0x9b2   :  { %v886_v58 = vadd.f32 %v884_v12, %v876_v36  ;;  %v877_v22 = vmax.f32 %v872_v48, 0.0  ;;  %v3186_v33 = vpop.f32.mrb[23].mxu0  ;;  %v3957_v36 = vld [vmem:[#allocation2 + $0x38] sm:$0xff]  ;;  %v1106_v12 = vsel %vm32_vm1, %v1104_v53, 0.0 }
 0x9b4   :  { %888 = vst.msk [vmem:[#allocation2 + $0x40] sm:$0xff] %vm32_vm1, %v886_v58  ;;  %v887_v29 = vadd.f32 %v885_v18, %v877_v22  ;;  %v3966_v22 = vadd.f32 %v1084_v60, %v1083_v45  ;;  %v3968_v18 = vld [vmem:[#allocation2 + $0x30] sm:$0xff] }
 0x9b6   :  { %889 = vst.msk [vmem:[#allocation2 + $0x48] sm:$0xff] %vm32_vm1, %v887_v29  ;;  %v890_v38 = vpack.c.bf16 %v887_v29, %v886_v58  ;;  %v3964_v58 = vadd.f32 %v1074_v49, %v1073_v43  ;;  %v1105_v29 = vsel %vm32_vm1, %v1103_v27, 0.0 }
 0x9b8   :  { %3192 = vmatmul.mubr.msk.bf16.vlgmr.msra.gmra.mrb[20].mxu1 %vm32_vm1, %v890_v38  ;;  %v1118_v38 = vsel %vm32_vm1, %v3951_v6, 0.0 }
 0x9b9   :  { %3204 = vmatpush3.bf16.msra.mxu1 %v3552_v1  ;;  %3207 = vmatprep.mubr.msk.bf16.mxu1 %vm3510_vm0, %v3509_v0 }
 0x9ba   :  { %3205 = vmatprep.subr.bf16.mxu1 %v3509_v0 }
 0x9bb   :  { %v3970_v33 = vld [vmem:[#allocation2 + $0x40] sm:$0xff] }
 0x9bc   :  { %v1165_v51 = vsel %vm32_vm1, %v3970_v33, 0.0 }
 0x9bd   :  { %3206 = vmatpush3.bf16.msra.mxu1 %v3563_v2  ;;  %v3962_v48 = vld [vmem:[#allocation2 + $0x48] sm:$0xff] }
 0x9be   :  { %v1166_v14 = vsel %vm32_vm1, %v3962_v48, 0.0 }
 0xa8b   :  { %v928_v34 = vpop.f32.mrb[20].mxu1 }
 0xa8c   :  { %v935_v46 = vmax.f32 %v928_v34, 0.0  ;;  %v3193_v9 = vpop.f32.mrb[21].mxu1  ;;  %v1127_v34 = vmul.f32 %v3955_v11, %v3955_v11 }
 0xa8d   :  { %v931_v42 = vpop.f32.mrb[22].mxu1  ;;  %v1097_v9 = vadd.f32 %v1096_v40, %v1095_v47  ;;  %v1167_v47 = vadd.f32 %v1166_v14, %v1165_v51 }
 0xa8e   :  { %v945_v59 = vadd.f32 %v943_v54, %v935_v46  ;;  %v936_v17 = vmax.f32 %v931_v42, 0.0  ;;  %v3194_v8 = vpop.f32.mrb[23].mxu1  ;;  %v1152_v46 = vmul.f32 %v3957_v36, %v3957_v36  ;;  %v1061_v54 = vmax.f32 %v3861_v7, 0.0 }
 0xa8f   :  { %v1107_v42 = vadd.f32 %v1106_v12, %v1105_v29  ;;  %v1142_v8 = vsel %vm32_vm1, %v3957_v36, 0.0  ;;  %v1098_v62 = vrot.slane %v1097_v9, 2 }
 0xa90   :  { %947 = vst.msk [vmem:[#allocation2 + $0x50] sm:$0xff] %vm32_vm1, %v945_v59  ;;  %v946_v1 = vadd.f32 %v944_v5, %v936_v17  ;;  %v1176_v17 = vmul.f32 %v3962_v48, %v3962_v48  ;;  %v1130_v5 = vsel %vm32_vm1, %v1128_v61, 0.0 }
 0xa92   :  { %948 = vst.msk [vmem:[#allocation2 + $0x58] sm:$0xff] %vm32_vm1, %v946_v1  ;;  %v949_v13 = vpack.c.bf16 %v946_v1, %v945_v59  ;;  %v1117_v59 = vsel %vm32_vm1, %v3955_v11, 0.0  ;;  %v1151_v1 = vmul.f32 %v3968_v18, %v3968_v18  ;;  %v1178_v31 = vsel %vm32_vm1, %v1176_v17, 0.0 }
 0xa94   :  { %3200 = vmatmul.mubr.msk.bf16.vlgmr.msra.gmra.mrb[24].mxu0 %vm32_vm1, %v949_v13  ;;  %v1175_v13 = vmul.f32 %v3970_v33, %v3970_v33  ;;  %v1153_v63 = vsel %vm32_vm1, %v1151_v1, 0.0 }
 0xa95   :  { %3215 = vmatprep.mubr.msk.bf16.mxu0 %vm3510_vm0, %v3509_v0  ;;  %3212 = vmatpush3.bf16.msra.mxu0 %v3425_v24 }
 0xa96   :  { %3213 = vmatprep.subr.bf16.mxu0 %v3509_v0  ;;  %v1177_v43 = vsel %vm32_vm1, %v1175_v13, 0.0 }
 0xa97   :  { %v1179_v40 = vadd.f32 %v1178_v31, %v1177_v43 }
 0xa99   :  { %3214 = vmatpush3.bf16.msra.mxu0 %v3426_v4 }
 0xa9a   :  { %3219 = vmatprep.subr.bf16.mxu0 %v3509_v0 }
 0xb67   :  { %v987_v2 = vpop.f32.mrb[24].mxu0 }
 0xb68   :  { %v994_v37 = vmax.f32 %v987_v2, 0.0  ;;  %v3201_v16 = vpop.f32.mrb[25].mxu0  ;;  %v3991_v2 = vld [vmem:[#allocation2 + $0x58] sm:$0xff] }
 0xb69   :  { %v990_v10 = vpop.f32.mrb[26].mxu0  ;;  %v1119_v16 = vadd.f32 %v1118_v38, %v1117_v59  ;;  %v1200_v28 = vmul.f32 %v3991_v2, %v3991_v2  ;;  %v1190_v53 = vsel %vm32_vm1, %v3991_v2, 0.0 }
 0xb6a   :  { %v1004_v50 = vadd.f32 %v1002_v15, %v994_v37  ;;  %v995_v39 = vmax.f32 %v990_v10, 0.0  ;;  %v3202_v21 = vpop.f32.mrb[27].mxu0  ;;  %v1062_v37 = vmax.f32 %v3864_v3, 0.0  ;;  %v1086_v15 = vrot.slane %v3966_v22, 2 }
 0xb6b   :  { %v1076_v10 = vrot.slane %v3964_v58, 1  ;;  %v4000_v21 = vld [vmem:[#allocation2 + $0x50] sm:$0xff]  ;;  %v1120_v41 = vrot.slane %v1119_v16, 4  ;;  %v1202_v38 = vsel %vm32_vm1, %v1200_v28, 0.0 }
 0xb6c   :  { %1006 = vst.msk [vmem:[#allocation2 + $0x60] sm:$0xff] %vm32_vm1, %v1004_v50  ;;  %v1005_v23 = vadd.f32 %v1003_v20, %v995_v39  ;;  %v1141_v39 = vsel %vm32_vm1, %v3968_v18, 0.0  ;;  %v1154_v20 = vsel %vm32_vm1, %v1152_v46, 0.0  ;;  %v1199_v45 = vmul.f32 %v4000_v21, %v4000_v21 }
 0xb6d   :  { %v1143_v4 = vadd.f32 %v1142_v8, %v1141_v39  ;;  %v1155_v57 = vadd.f32 %v1154_v20, %v1153_v63  ;;  %v1189_v29 = vsel %vm32_vm1, %v4000_v21, 0.0  ;;  %v1121_v46 = vadd.f32 %v1120_v41, %v1119_v16 }
 0xb6e   :  { %1007 = vst.msk [vmem:[#allocation2 + $0x68] sm:$0xff] %vm32_vm1, %v1005_v23  ;;  %v1008_v55 = vpack.c.bf16 %v1005_v23, %v1004_v50  ;;  %v1129_v50 = vsel %vm32_vm1, %v1127_v34, 0.0  ;;  %v1099_v34 = vadd.f32 %v1098_v62, %v1097_v9  ;;  %v1191_v17 = vadd.f32 %v1190_v53, %v1189_v29 }
 0xb6f   :  { %v1131_v24 = vadd.f32 %v1130_v5, %v1129_v50  ;;  %v1144_v27 = vrot.slane %v1143_v4, 4  ;;  %v1156_v59 = vrot.slane %v1155_v57, 4  ;;  %v1168_v8 = vrot.slane %v1167_v47, 4 }
 0xb70   :  { %3208 = vmatmul.mubr.msk.bf16.vlgmr.msra.gmra.mrb[24].mxu1 %vm32_vm1, %v1008_v55  ;;  %v1108_v55 = vrot.slane %v1107_v42, 4  ;;  %v1201_v1 = vsel %vm32_vm1, %v1199_v45, 0.0  ;;  %v1180_v62 = vrot.slane %v1179_v40, 4  ;;  %v1122_v31 = vrot.slane %v1121_v46, 2 }
 0xb71   :  { %v1132_v60 = vrot.slane %v1131_v24, 4  ;;  %v1203_v20 = vadd.f32 %v1202_v38, %v1201_v1  ;;  %v1145_v16 = vadd.f32 %v1144_v27, %v1143_v4  ;;  %v1157_v41 = vadd.f32 %v1156_v59, %v1155_v57 }
 0xb72   :  { %v1109_v49 = vadd.f32 %v1108_v55, %v1107_v42  ;;  %v1192_v51 = vrot.slane %v1191_v17, 4  ;;  %v1181_v59 = vadd.f32 %v1180_v62, %v1179_v40  ;;  %v1077_v3 = vadd.f32 %v1076_v10, %v3964_v58 }
 0xb73   :  { %v4010_v35 = vld [vmem:[#allocation2 + $0x60] sm:$0xff]  ;;  %v1133_v39 = vadd.f32 %v1132_v60, %v1131_v24  ;;  %v1087_v24 = vadd.f32 %v1086_v15, %v3966_v22  ;;  %v1169_v60 = vadd.f32 %v1168_v8, %v1167_v47  ;;  %v1146_v27 = vrot.slane %v1145_v16, 2 }
 0xb74   :  { %v1223_v12 = vmul.f32 %v4010_v35, %v4010_v35  ;;  %v1213_v42 = vsel %vm32_vm1, %v4010_v35, 0.0  ;;  %v1110_v50 = vrot.slane %v1109_v49, 2  ;;  %v1158_v7 = vrot.slane %v1157_v41, 2 }
 0xb75   :  { %v4002_v23 = vld [vmem:[#allocation2 + $0x68] sm:$0xff]  ;;  %v1134_v29 = vrot.slane %v1133_v39, 2  ;;  %v1088_v22 = vrot.slane %v1087_v24, 1  ;;  %v1170_v15 = vrot.slane %v1169_v60, 2 }
 0xb76   :  { %v1224_v52 = vmul.f32 %v4002_v23, %v4002_v23  ;;  %v1214_v61 = vsel %vm32_vm1, %v4002_v23, 0.0  ;;  %v1225_v14 = vsel %vm32_vm1, %v1223_v12, 0.0  ;;  %v1204_v12 = vrot.slane %v1203_v20, 4 }
 0xb77   :  { %v1215_v55 = vadd.f32 %v1214_v61, %v1213_v42  ;;  %v1100_v61 = vrot.slane %v1099_v34, 1  ;;  %v1111_v57 = vadd.f32 %v1110_v50, %v1109_v49  ;;  %v1123_v42 = vadd.f32 %v1122_v31, %v1121_v46 }
 0xb78   :  { %v1226_v5 = vsel %vm32_vm1, %v1224_v52, 0.0  ;;  %v1135_v8 = vadd.f32 %v1134_v29, %v1133_v39  ;;  %v1205_v1 = vadd.f32 %v1204_v12, %v1203_v20  ;;  %v1147_v49 = vadd.f32 %v1146_v27, %v1145_v16 }
 0xb79   :  { %v1227_v43 = vadd.f32 %v1226_v5, %v1225_v14  ;;  %v1216_v38 = vrot.slane %v1215_v55, 4  ;;  %v1101_v47 = vadd.f32 %v1100_v61, %v1099_v34  ;;  %v1182_v50 = vrot.slane %v1181_v59, 2 }
 0xb7a   :  { %v1124_v40 = vrot.slane %v1123_v42, 1  ;;  %v1159_v46 = vadd.f32 %v1158_v7, %v1157_v41  ;;  %v1136_v34 = vrot.slane %v1135_v8, 1  ;;  %v1206_v39 = vrot.slane %v1205_v1, 2 }
 0xb7b   :  { %v1228_v5 = vrot.slane %v1227_v43, 4  ;;  %v1148_v58 = vrot.slane %v1147_v49, 1  ;;  %v1183_v10 = vadd.f32 %v1182_v50, %v1181_v59 }
 0xb7c   :  { %v1160_v41 = vrot.slane %v1159_v46, 1  ;;  %v1137_v29 = vadd.f32 %v1136_v34, %v1135_v8  ;;  %v1207_v12 = vadd.f32 %v1206_v39, %v1205_v1 }
 0xb7d   :  { %v1149_v27 = vadd.f32 %v1148_v58, %v1147_v49  ;;  %v1184_v59 = vrot.slane %v1183_v10, 1 }
 0xc43   :  { %v1046_v13 = vpop.f32.mrb[24].mxu1 }
 0xc44   :  { %v1053_v28 = vmax.f32 %v1046_v13, 0.0  ;;  %v3209_v9 = vpop.f32.mrb[25].mxu1  ;;  %v1217_v13 = vadd.f32 %v1216_v38, %v1215_v55 }
 0xc45   :  { %v1049_v63 = vpop.f32.mrb[26].mxu1  ;;  %v1171_v9 = vadd.f32 %v1170_v15, %v1169_v60 }
 0xc46   :  { %v1063_v52 = vadd.f32 %v1061_v54, %v1053_v28  ;;  %v1054_v45 = vmax.f32 %v1049_v63, 0.0  ;;  %v3210_v53 = vpop.f32.mrb[27].mxu1  ;;  %v1193_v54 = vadd.f32 %v1192_v51, %v1191_v17  ;;  %v1229_v17 = vadd.f32 %v1228_v5, %v1227_v43 }
 0xc47   :  { %v1089_v28 = vadd.f32 %v1088_v22, %v1087_v24  ;;  %v1102_v63 = vadd.f32 %v1101_v47, %v1077_v3  ;;  %v1218_v20 = vrot.slane %v1217_v13, 2  ;;  %v1125_v51 = vadd.f32 %v1124_v40, %v1123_v42 }
 0xc48   :  { %1065 = vst.msk [vmem:[#allocation2 + $0x70] sm:$0xff] %vm32_vm1, %v1063_v52  ;;  %v1064_v4 = vadd.f32 %v1062_v37, %v1054_v45  ;;  %v1112_v37 = vrot.slane %v1111_v57, 1  ;;  %v1194_v14 = vrot.slane %v1193_v54, 2  ;;  %v1230_v43 = vrot.slane %v1229_v17, 2 }
 0xc49   :  { %v1172_v60 = vrot.slane %v1171_v9, 1  ;;  %v1219_v38 = vadd.f32 %v1218_v20, %v1217_v13  ;;  %v1126_v15 = vadd.f32 %v1125_v51, %v1102_v63  ;;  %v1161_v47 = vadd.f32 %v1160_v41, %v1159_v46 }
 0xc4a   :  { %1066 = vst.msk [vmem:[#allocation2 + $0x78] sm:$0xff] %vm32_vm1, %v1064_v4  ;;  %v1113_v31 = vadd.f32 %v1112_v37, %v1111_v57  ;;  %v1195_v52 = vadd.f32 %v1194_v14, %v1193_v54  ;;  %v1231_v54 = vadd.f32 %v1230_v43, %v1229_v17  ;;  %v1208_v37 = vrot.slane %v1207_v12, 1 }
 0xc4b   :  { %v1173_v3 = vadd.f32 %v1172_v60, %v1171_v9  ;;  %v1220_v50 = vrot.slane %v1219_v38, 1  ;;  %v1150_v13 = vadd.f32 %v1149_v27, %v1126_v15  ;;  %v1185_v14 = vadd.f32 %v1184_v59, %v1183_v10 }
 0xc4c   :  { %v1196_v7 = vrot.slane %v1195_v52, 1  ;;  %v1114_v22 = vadd.f32 %v1113_v31, %v1089_v28  ;;  %v1232_v39 = vrot.slane %v1231_v54, 1 }
 0xc4d   :  { %v1174_v58 = vadd.f32 %v1173_v3, %v1150_v13  ;;  %v1221_v17 = vadd.f32 %v1220_v50, %v1219_v38 }
 0xc4e   :  { %v1138_v1 = vadd.f32 %v1137_v29, %v1114_v22  ;;  %v1197_v34 = vadd.f32 %v1196_v7, %v1195_v52  ;;  %v1233_v9 = vadd.f32 %v1232_v39, %v1231_v54 }
 0xc4f   :  { %v4043_v62 = vld [vmem:[#allocation2 + $0x70] sm:$0xff] }
 0xc50   :  { %v1247_v55 = vmul.f32 %v4043_v62, %v4043_v62  ;;  %v1237_v45 = vsel %vm32_vm1, %v4043_v62, 0.0  ;;  %v1198_v46 = vadd.f32 %v1197_v34, %v1174_v58 }
 0xc51   :  { %v4047_v16 = vld [vmem:[#allocation2 + $0x78] sm:$0xff] }
 0xc52   :  { %v1238_v53 = vsel %vm32_vm1, %v4047_v16, 0.0  ;;  %v1248_v24 = vmul.f32 %v4047_v16, %v4047_v16  ;;  %v1249_v4 = vsel %vm32_vm1, %v1247_v55, 0.0  ;;  %v1162_v55 = vadd.f32 %v1161_v47, %v1138_v1 }
 0xc53   :  { %v1239_v61 = vadd.f32 %v1238_v53, %v1237_v45  ;;  %v1209_v45 = vadd.f32 %v1208_v37, %v1207_v12  ;;  %v1222_v53 = vadd.f32 %v1221_v17, %v1198_v46 }
 0xc54   :  { %v1250_v57 = vsel %vm32_vm1, %v1248_v24, 0.0  ;;  %v1186_v63 = vadd.f32 %v1185_v14, %v1162_v55 }
 0xc55   :  { %v1251_v42 = vadd.f32 %v1250_v57, %v1249_v4  ;;  %v1240_v5 = vrot.slane %v1239_v61, 4 }
 0xc56   :  { %v1210_v41 = vadd.f32 %v1209_v45, %v1186_v63 }
 0xc57   :  { %v1241_v40 = vadd.f32 %v1240_v5, %v1239_v61  ;;  %v1252_v8 = vrot.slane %v1251_v42, 4 }
 0xc58   :  { %v1234_v10 = vadd.f32 %v1233_v9, %v1210_v41 }
 0xc59   :  { %v1242_v20 = vrot.slane %v1241_v40, 2  ;;  %v1253_v49 = vadd.f32 %v1252_v8, %v1251_v42  ;;  %v3427_v8 = vld [vmem:[%s4416_s4] sm:$0xff]  }
 0xc5b   :  { %v1243_v43 = vadd.f32 %v1242_v20, %v1241_v40  ;;  %v1254_v28 = vrot.slane %v1253_v49, 2 }
 0xc5d   :  { %v1244_v31 = vrot.slane %v1243_v43, 1  ;;  %v1255_v51 = vadd.f32 %v1254_v28, %v1253_v49  ;;  %v3429_v28 = vld [vmem:[%s4416_s4 + $0x20] sm:$0xff]  }
 0xc5f   :  { %v1245_v24 = vadd.f32 %v1244_v31, %v1243_v43  ;;  %v1256_v60 = vrot.slane %v1255_v51, 1  ;;  %v3430_v31 = vld [vmem:[%s4416_s4 + $0x28] sm:$0xff]  }
 0xc61   :  { %v1246_v52 = vadd.f32 %v1245_v24, %v1222_v53  ;;  %v1257_v61 = vadd.f32 %v1256_v60, %v1255_v51 }
 0xc63   :  { %v1258_v29 = vadd.f32 %v1257_v61, %v1234_v10  ;;  %v1259_v4 = vmul.f32 0.0078125, %v1246_v52  ;;  %v3432_v52 = vld [vmem:[%s4416_s4 + $0x38] sm:$0xff]  }
 0xc65   :  { %v1260_v57 = vmul.f32 0.0078125, %v1258_v29  ;;  %v1261_v27 = vmul.f32 %v1259_v4, %v1259_v4 }
 0xc67   :  { %v1262_v12 = vsub.f32 %v1260_v57, %v1261_v27 }
 0xc69   :  { %v1263_v38 = vmax.f32 %v1262_v12, 0.0 }
 0xc6b   :  { %v1264_v59 = vadd.f32 1e-05, %v1263_v38  ;;  %v3434_v38 = vld [vmem:[%s4416_s4 + $0x48] sm:$0xff]  }
 0xc6d   :  { %3443 = vrsqrt.f32 %v1264_v59 }
 0xc77   :  { %v3444_v42 = vpop.eup %3443 }
 0xc78   :  { %v1266_v7 = vmul.f32 %v3444_v42, %v3810_v30 }
 0xc7a   :  { %v1267_v54 = vmul.f32 %v1266_v7, %v1259_v4  ;;  %v4059_v5 = vrot.slane %v1266_v7, %v3812_v32 }
 0xc7c   :  { %v1268_v22 = vsub.f32 %v3818_v19, %v1267_v54  ;;  %v1292_v47 = vmul.f32 %v4059_v5, %v3943_v26  ;;  %v1293_v3 = vmul.f32 %v4059_v5, %v3939_v44  ;;  %v1697_v26 = vmul.f32 %v4059_v5, %v4002_v23 }
 0xc7d   :  { %v1275_v44 = vmul.f32 %v4059_v5, %v3927_v56  ;;  %v1276_v1 = vmul.f32 %v4059_v5, %v3929_v25  ;;  %v1766_v23 = vmul.f32 %v4059_v5, %v4043_v62  ;;  %v1767_v56 = vmul.f32 %v4059_v5, %v4047_v16 }
 0xc7e   :  { %v4063_v15 = vrot.slane %v1268_v22, %v3812_v32  ;;  %v1696_v32 = vmul.f32 %v4059_v5, %v4010_v35  ;;  %v3428_v35 = vld [vmem:[%s4416_s4 + $0x8] sm:$0xff]   ;;  %v1416_v46 = vmul.f32 %v4059_v5, %v3955_v11  ;;  %v1417_v9 = vmul.f32 %v4059_v5, %v3951_v6  ;;  %v3431_v6 = vld [vmem:[%s4416_s4 + $0x30] sm:$0xff]  }
 0xc7f   :  { %v1486_v60 = vmul.f32 %v4059_v5, %v3968_v18  ;;  %v1487_v10 = vmul.f32 %v4059_v5, %v3957_v36  ;;  %v3433_v36 = vld [vmem:[%s4416_s4 + $0x40] sm:$0xff]   ;;  %v1556_v27 = vmul.f32 %v4059_v5, %v3970_v33  ;;  %v1557_v12 = vmul.f32 %v4059_v5, %v3962_v48  ;;  %v3435_v48 = vld [vmem:[%s4416_s4 + $0x50] sm:$0xff]  }
 0xc80   :  { %v1294_v37 = vadd.f32 %v1292_v47, %v4063_v15  ;;  %v1295_v50 = vadd.f32 %v1293_v3, %v4063_v15  ;;  %v1698_v13 = vadd.f32 %v1696_v32, %v4063_v15  ;;  %v1699_v14 = vadd.f32 %v1697_v26, %v4063_v15  ;;  %v3436_v3 = vld [vmem:[%s4416_s4 + $0x58] sm:$0xff]   ;;  %v4206_v32 = vld [vmem:[%s4417_s5 + $0x40] sm:$0xff] }
 0xc81   :  { %v1283_v25 = vadd.f32 %v4063_v15, %v1275_v44  ;;  %v1284_v34 = vadd.f32 %v4063_v15, %v1276_v1  ;;  %v1768_v49 = vadd.f32 %v1766_v23, %v4063_v15  ;;  %v1769_v55 = vadd.f32 %v1767_v56, %v4063_v15  ;;  %v4213_v44 = vld [vmem:[%s4417_s5 + $0x8] sm:$0xff]  ;;  %v4232_v23 = vld [vmem:[%s4417_s5 + $0x20] sm:$0xff] }
 0xc82   :  { %v1296_v30 = vmax.f32 %v1294_v37, 0.0  ;;  %v1297_v40 = vmax.f32 %v1295_v50, 0.0  ;;  %v1700_v39 = vmax.f32 %v1698_v13, 0.0  ;;  %v1701_v20 = vmax.f32 %v1699_v14, 0.0  ;;  %v4218_v14 = vld [vmem:[%s4417_s5 + $0x10] sm:$0xff]  ;;  %v4241_v56 = vld [vmem:[%s4417_s5 + $0x28] sm:$0xff] }
 0xc83   :  { %v1770_v45 = vmax.f32 %v1768_v49, 0.0  ;;  %v1771_v62 = vmax.f32 %v1769_v55, 0.0  ;;  %v1285_v17 = vmax.f32 %v1283_v25, 0.0  ;;  %v1286_v43 = vmax.f32 %v1284_v34, 0.0  ;;  %v4246_v25 = vld [vmem:[%s4417_s5 + $0x30] sm:$0xff]  ;;  %v1843_v34 = vld [vmem:[%s4417_s5 + $0x38] sm:$0xff] }
 0xc84   :  { %v1298_v19 = vpack.c.bf16 %v1297_v40, %v1296_v30  ;;  %v4099_v58 = vpack.c.bf16 %v1701_v20, %v1700_v39  ;;  %v1418_v51 = vadd.f32 %v1416_v46, %v4063_v15  ;;  %v1419_v41 = vadd.f32 %v1417_v9, %v4063_v15  ;;  %v3438_v40 = vld [vmem:[%s4416_s4 + $0x68] sm:$0xff]   ;;  %v2915_v39 = vld [vmem:[%s4417_s5 + $0x80] sm:$0xff] }
 0xc85   :  { %v4102_v16 = vpack.c.bf16 %v1771_v62, %v1770_v45  ;;  %v1287_v63 = vpack.c.bf16 %v1286_v43, %v1285_v17  ;;  %v1488_v61 = vadd.f32 %v1486_v60, %v4063_v15  ;;  %v1489_v29 = vadd.f32 %v1487_v10, %v4063_v15  ;;  %v2892_v55 = vld [vmem:[%s4417_s5 + $0x48] sm:$0xff]  ;;  %v2893_v45 = vld [vmem:[%s4417_s5 + $0x50] sm:$0xff]  ;;  %v2894_v43 = vld [vmem:[%s4417_s5 + $0x58] sm:$0xff] }
 0xc86   :  { %3216 = vmatmul.mubr.msk.bf16.vlgmr.msra.gmra.mrb[28].mxu0 %vm32_vm1, %v1298_v19  ;;  %v1420_v53 = vmax.f32 %v1418_v51, 0.0  ;;  %v1421_v11 = vmax.f32 %v1419_v41, 0.0  ;;  %v1558_v59 = vadd.f32 %v1556_v27, %v4063_v15  ;;  %v1559_v42 = vadd.f32 %v1557_v12, %v4063_v15  ;;  %v4199_v19 = vld [vmem:[%s4417_s5] sm:$0xff]  ;;  %v2917_v62 = vld [vmem:[%s4417_s5 + $0x90] sm:$0xff]  ;;  %v2896_v46 = vld [vmem:[%s4417_s5 + $0x68] sm:$0xff] }
 0xc87   :  { %3220 = vmatpush3.bf16.msra.mxu0 %v3427_v8  ;;  %3223 = vmatprep.mubr.msk.bf16.mxu0 %vm3510_vm0, %v3509_v0  ;;  %v1490_v4 = vmax.f32 %v1488_v61, 0.0  ;;  %v1491_v18 = vmax.f32 %v1489_v29, 0.0  ;;  %v1626_v22 = vmul.f32 %v4059_v5, %v4000_v21  ;;  %v1627_v47 = vmul.f32 %v4059_v5, %v3991_v2  ;;  %v3437_v2 = vld [vmem:[%s4416_s4 + $0x60] sm:$0xff]   ;;  %v3440_v8 = vld [vmem:[%s4416_s4 + $0x78] sm:$0xff]   ;;  %v2920_v9 = vld [vmem:[%s4417_s5 + $0xa8] sm:$0xff] }
 0xc88   :  { %3221 = vmatprep.subr.bf16.mxu0 %v3509_v0  ;;  %v1422_v24 = vpack.c.bf16 %v1421_v11, %v1420_v53  ;;  %v1560_v7 = vmax.f32 %v1558_v59, 0.0  ;;  %v1561_v33 = vmax.f32 %v1559_v42, 0.0  ;;  %3291 = vmatprep.mubr.msk.f32.mxu1 %vm1857_vm2, %v4199_v19  ;;  %v2921_v51 = vld [vmem:[%s4417_s5 + $0xb0] sm:$0xff]  ;;  %v2898_v41 = vld [vmem:[%s4417_s5 + $0x78] sm:$0xff] }
 0xc89   :  { %v1492_v57 = vpack.c.bf16 %v1491_v18, %v1490_v4  ;;  %v1628_v37 = vadd.f32 %v1626_v22, %v4063_v15  ;;  %v1629_v50 = vadd.f32 %v1627_v47, %v4063_v15  ;;  %v3439_v15 = vld [vmem:[%s4416_s4 + $0x70] sm:$0xff]   ;;  %v2922_v53 = vld [vmem:[%s4417_s5 + $0xb8] sm:$0xff] }
 0xc8a   :  { %v1562_v54 = vpack.c.bf16 %v1561_v33, %v1560_v7 }
 0xc8b   :  { %3222 = vmatpush3.bf16.msra.mxu0 %v3428_v35  ;;  %v1630_v30 = vmax.f32 %v1628_v37, 0.0  ;;  %v1631_v21 = vmax.f32 %v1629_v50, 0.0  ;;  %v4225_v35 = vld [vmem:[%s4417_s5 + $0x18] sm:$0xff] }
 0xc8c   :  { %3227 = vmatprep.subr.bf16.mxu0 %v3509_v0 }
 0xc8d   :  { %v1632_v5 = vpack.c.bf16 %v1631_v21, %v1630_v30 }
 0xc92   :  { %3224 = vmatmul.mubr.msk.bf16.vlgmr.msra.gmra.mrb[28].mxu0 %vm32_vm1, %v1287_v63  ;;  %v2919_v63 = vld [vmem:[%s4417_s5 + $0xa0] sm:$0xff] }
 0xc93   :  { %3228 = vmatpush3.bf16.msra.mxu0 %v3429_v28  ;;  %3231 = vmatprep.mubr.msk.bf16.mxu0 %vm3510_vm0, %v3509_v0  ;;  %v2895_v28 = vld [vmem:[%s4417_s5 + $0x60] sm:$0xff] }
 0xc94   :  { %3229 = vmatprep.subr.bf16.mxu0 %v3509_v0 }
 0xc97   :  { %3230 = vmatpush3.bf16.msra.mxu0 %v3430_v31  ;;  %v2897_v31 = vld [vmem:[%s4417_s5 + $0x70] sm:$0xff] }
 0xc98   :  { %3235 = vmatprep.subr.bf16.mxu0 %v3509_v0 }
 0xc9e   :  { %3232 = vmatmul.mubr.msk.bf16.vlgmr.msra.gmra.mrb[28].mxu0 %vm32_vm1, %v1422_v24 }
 0xc9f   :  { %3236 = vmatpush3.bf16.msra.mxu0 %v3431_v6  ;;  %3239 = vmatprep.mubr.msk.bf16.mxu0 %vm3510_vm0, %v3509_v0 }
 0xca0   :  { %3237 = vmatprep.subr.bf16.mxu0 %v3509_v0 }
 0xca3   :  { %3238 = vmatpush3.bf16.msra.mxu0 %v3432_v52 }
 0xca4   :  { %3243 = vmatprep.subr.bf16.mxu0 %v3509_v0 }
 0xcaa   :  { %3240 = vmatmul.mubr.msk.bf16.vlgmr.msra.gmra.mrb[28].mxu0 %vm32_vm1, %v1492_v57 }
 0xcab   :  { %3244 = vmatpush3.bf16.msra.mxu0 %v3433_v36  ;;  %3247 = vmatprep.mubr.msk.bf16.mxu0 %vm3510_vm0, %v3509_v0 }
 0xcac   :  { %3245 = vmatprep.subr.bf16.mxu0 %v3509_v0 }
 0xcaf   :  { %3246 = vmatpush3.bf16.msra.mxu0 %v3434_v38 }
 0xcb0   :  { %3251 = vmatprep.subr.bf16.mxu0 %v3509_v0 }
 0xcb6   :  { %3248 = vmatmul.mubr.msk.bf16.vlgmr.msra.gmra.mrb[28].mxu0 %vm32_vm1, %v1562_v54 }
 0xcb7   :  { %3252 = vmatpush3.bf16.msra.mxu0 %v3435_v48  ;;  %3255 = vmatprep.mubr.msk.bf16.mxu0 %vm3510_vm0, %v3509_v0 }
 0xcb8   :  { %3253 = vmatprep.subr.bf16.mxu0 %v3509_v0 }
 0xcbb   :  { %3254 = vmatpush3.bf16.msra.mxu0 %v3436_v3 }
 0xcbc   :  { %3259 = vmatprep.subr.bf16.mxu0 %v3509_v0 }
 0xcc2   :  { %3256 = vmatmul.mubr.msk.bf16.vlgmr.msra.gmra.mrb[28].mxu0 %vm32_vm1, %v1632_v5 }
 0xcc3   :  { %3260 = vmatpush3.bf16.msra.mxu0 %v3437_v2  ;;  %3263 = vmatprep.mubr.msk.bf16.mxu0 %vm3510_vm0, %v3509_v0 }
 0xcc4   :  { %3261 = vmatprep.subr.bf16.mxu0 %v3509_v0 }
 0xcc7   :  { %3262 = vmatpush3.bf16.msra.mxu0 %v3438_v40 }
 0xcc8   :  { %3267 = vmatprep.subr.bf16.mxu0 %v3509_v0 }
 0xcce   :  { %3264 = vmatmul.mubr.msk.bf16.vlgmr.msra.gmra.mrb[28].mxu0 %vm32_vm1, %v4099_v58  ;;  %v2916_v58 = vld [vmem:[%s4417_s5 + $0x88] sm:$0xff] }
 0xccf   :  { %3268 = vmatpush3.bf16.msra.mxu0 %v3439_v15  ;;  %3271 = vmatprep.mubr.msk.bf16.mxu0 %vm3510_vm0, %v3509_v0 }
 0xcd0   :  { %3269 = vmatprep.subr.bf16.mxu0 %v3509_v0 }
 0xcd3   :  { %3270 = vmatpush3.bf16.msra.mxu0 %v3440_v8 }
 0xcda   :  { %3272 = vmatmul.mubr.msk.bf16.vlgmr.msra.gmra.mrb[28].mxu0 %vm32_vm1, %v4102_v16  ;;  %v2918_v16 = vld [vmem:[%s4417_s5 + $0x98] sm:$0xff] }
 0xcdb   :  { %3277 = vmatprep.mubr.msk.f32.mxu0 %vm1857_vm2, %v4206_v32 }
 0xdad   :  { %v1827_v0 = vpop.f32.mrb[28].mxu0 }
 0xdae   :  { %1854 = vrot.lane.b32.xlu1 %v1827_v0, %s3511_s15  ;;  %2125 = vrot.lane.b32.xlu0 %v1827_v0, %s3512_s16  ;;  %v3273_v26 = vpop.f32.mrb[29].mxu0 }
 0xdaf   :  { %3289 = vmatprep.subr.mxu1 %v1827_v0  ;;  %v1830_v1 = vpop.f32.mrb[30].mxu0 }
 0xdb0   :  { %3290 = vmatpush3.msra.mxu1 %v1827_v0  ;;  %v3274_v13 = vpop.f32.mrb[31].mxu0 }
 0xdb1   :  { %3292 = vmatmul.mubr.msk.f32.vlgmr.msra.gmra.mrb[28].mxu1 %vm1857_vm2, %v4213_v44 }
 0xdb2   :  { %2608 = vrot.lane.b32.xlu1 %v1830_v1, %s3512_s16  ;;  %2339 = vrot.lane.b32.xlu0 %v1830_v1, %s3511_s15 }
 0xdb3   :  { %3294 = vmatprep.mubr.msk.f32.mxu1 %vm1857_vm2, %v4218_v14 }
 0xdb5   :  { %3295 = vmatmul.mubr.msk.f32.gmra.mrb[30].mxu1 %vm1857_vm2, %v4225_v35 }
 0xdb6   :  { %3297 = vmatprep.mubr.msk.f32.mxu1 %vm1857_vm2, %v4232_v23 }
 0xdb9   :  { %3298 = vmatmul.mubr.msk.f32.gmra.mrb[32].mxu1 %vm1857_vm2, %v4241_v56 }
 0xdba   :  { %3300 = vmatprep.mubr.msk.f32.mxu1 %vm1857_vm2, %v4246_v25 }
 0xdbd   :  { %3301 = vmatmul.mubr.msk.f32.gmra.mrb[34].mxu1 %vm1857_vm2, %v1843_v34 }
 0xdbe   :  { %3305 = vmatprep.mubr.msk.f32.mxu1 %vm1857_vm2, %v2915_v39 }
 0xe20   :  { %v1855_v20 = vpop.permute.xlu1 %1854  ;;  %v2126_v49 = vpop.permute.xlu0 %2125 }
 0xe21   :  { %3275 = vmatprep.subr.mxu0 %v1855_v20  ;;  %3303 = vmatprep.subr.mxu1 %v2126_v49 }
 0xe22   :  { %3276 = vmatpush3.msra.mxu0 %v1855_v20  ;;  %3304 = vmatpush3.msra.mxu1 %v2126_v49 }
 0xe23   :  { %3278 = vmatmul.mubr.msk.f32.vlgmr.msra.gmra.mrb[32].mxu0 %vm1857_vm2, %v2892_v55  ;;  %3306 = vmatmul.mubr.msk.f32.vlgmr.msra.gmra.mrb[28].mxu1 %vm1857_vm2, %v2916_v58 }
 0xe24   :  { %v2340_v17 = vpop.permute.xlu0 %2339  ;;  %3280 = vmatprep.mubr.msk.f32.mxu0 %vm1857_vm2, %v2893_v45  ;;  %3308 = vmatprep.mubr.msk.f32.mxu1 %vm1857_vm2, %v2917_v62  ;;  %v2609_v11 = vpop.permute.xlu1 %2608 }
 0xe25   :  { %3317 = vmatprep.subr.mxu1 %v2340_v17 }
 0xe26   :  { %3318 = vmatpush3.msra.mxu1 %v2340_v17 }
 0xe27   :  { %3281 = vmatmul.mubr.msk.f32.gmra.mrb[34].mxu0 %vm1857_vm2, %v2894_v43  ;;  %3309 = vmatmul.mubr.msk.f32.gmra.mrb[30].mxu1 %vm1857_vm2, %v2918_v16 }
 0xe28   :  { %3331 = vmatprep.subr.mxu1 %v1830_v1  ;;  %3283 = vmatprep.mubr.msk.f32.mxu0 %vm1857_vm2, %v2895_v28 }
 0xe29   :  { %3311 = vmatprep.mubr.msk.f32.mxu1 %vm1857_vm2, %v2919_v63 }
 0xe2b   :  { %3284 = vmatmul.mubr.msk.f32.gmra.mrb[36].mxu0 %vm1857_vm2, %v2896_v46  ;;  %3312 = vmatmul.mubr.msk.f32.gmra.mrb[32].mxu1 %vm1857_vm2, %v2920_v9 }
 0xe2c   :  { %3286 = vmatprep.mubr.msk.f32.mxu0 %vm1857_vm2, %v2897_v31  ;;  %3314 = vmatprep.mubr.msk.f32.mxu1 %vm1857_vm2, %v2921_v51 }
 0xe2f   :  { %3287 = vmatmul.mubr.msk.f32.gmra.mrb[38].mxu0 %vm1857_vm2, %v2898_v41  ;;  %3315 = vmatmul.mubr.msk.f32.gmra.mrb[34].mxu1 %vm1857_vm2, %v2922_v53 }
 0xe30   :  { %3319 = vmatprep.mubr.msk.f32.mxu1 %vm1857_vm2, %v4206_v32 }
 0xe33   :  { %3320 = vmatmul.mubr.msk.f32.vlgmr.msra.gmra.mrb[36].mxu1 %vm1857_vm2, %v2892_v55 }
 0xe34   :  { %3332 = vmatpush3.msra.mxu1 %v1830_v1  ;;  %3322 = vmatprep.mubr.msk.f32.mxu1 %vm1857_vm2, %v2893_v45 }
 0xe35   :  { %3345 = vmatprep.subr.mxu1 %v2609_v11 }
 0xe37   :  { %3323 = vmatmul.mubr.msk.f32.gmra.mrb[38].mxu1 %vm1857_vm2, %v2894_v43 }
 0xe38   :  { %3325 = vmatprep.mubr.msk.f32.mxu1 %vm1857_vm2, %v2895_v28 }
 0xe3b   :  { %3326 = vmatmul.mubr.msk.f32.gmra.mrb[40].mxu1 %vm1857_vm2, %v2896_v46 }
 0xe3c   :  { %3328 = vmatprep.mubr.msk.f32.mxu1 %vm1857_vm2, %v2897_v31 }
 0xe3f   :  { %3329 = vmatmul.mubr.msk.f32.gmra.mrb[42].mxu1 %vm1857_vm2, %v2898_v41 }
 0xe40   :  { %3333 = vmatprep.mubr.msk.f32.mxu1 %vm1857_vm2, %v4199_v19 }
 0xe43   :  { %3334 = vmatmul.mubr.msk.f32.vlgmr.msra.gmra.mrb[36].mxu1 %vm1857_vm2, %v4213_v44 }
 0xe44   :  { %3346 = vmatpush3.msra.mxu1 %v2609_v11  ;;  %3336 = vmatprep.mubr.msk.f32.mxu1 %vm1857_vm2, %v4218_v14 }
 0xe47   :  { %3337 = vmatmul.mubr.msk.f32.gmra.mrb[38].mxu1 %vm1857_vm2, %v4225_v35 }
 0xe48   :  { %3339 = vmatprep.mubr.msk.f32.mxu1 %vm1857_vm2, %v4232_v23 }
 0xe4b   :  { %3340 = vmatmul.mubr.msk.f32.gmra.mrb[40].mxu1 %vm1857_vm2, %v4241_v56 }
 0xe4c   :  { %3342 = vmatprep.mubr.msk.f32.mxu1 %vm1857_vm2, %v4246_v25 }
 0xe4f   :  { %3343 = vmatmul.mubr.msk.f32.gmra.mrb[42].mxu1 %vm1857_vm2, %v1843_v34 }
 0xe50   :  { %3347 = vmatprep.mubr.msk.f32.mxu1 %vm1857_vm2, %v2915_v39 }
 0xe53   :  { %3348 = vmatmul.mubr.msk.f32.vlgmr.msra.gmra.mrb[36].mxu1 %vm1857_vm2, %v2916_v58 }
 0xe54   :  { %3350 = vmatprep.mubr.msk.f32.mxu1 %vm1857_vm2, %v2917_v62 }
 0xe57   :  { %3351 = vmatmul.mubr.msk.f32.gmra.mrb[38].mxu1 %vm1857_vm2, %v2918_v16 }
 0xe58   :  { %3353 = vmatprep.mubr.msk.f32.mxu1 %vm1857_vm2, %v2919_v63 }
 0xe5b   :  { %3354 = vmatmul.mubr.msk.f32.gmra.mrb[40].mxu1 %vm1857_vm2, %v2920_v9 }
 0xe5c   :  { %3356 = vmatprep.mubr.msk.f32.mxu1 %vm1857_vm2, %v2921_v51 }
 0xe5f   :  { %3357 = vmatmul.mubr.msk.f32.gmra.mrb[42].mxu1 %vm1857_vm2, %v2922_v53 }
 0xef6   :  { %v3279_v6 = vpop.f32.mrb[32].mxu0  ;;  %v3307_v24 = vpop.f32.mrb[28].mxu1 }
 0xef7   :  { %v3359_v60 = vadd.f32 %v3307_v24, %v3279_v6  ;;  %v1948_v10 = vpop.f32.mrb[33].mxu0  ;;  %v2218_v52 = vpop.f32.mrb[29].mxu1 }
 0xef8   :  { %v3360_v61 = vadd.f32 %v2218_v52, %v1948_v10 }
 0xef9   :  { %v2266_v29 = vsub.f32 0.0, %v3359_v60 }
 0xefa   :  { %v2265_v4 = vsub.f32 0.0, %v3360_v61  ;;  %v3282_v18 = vpop.f32.mrb[34].mxu0  ;;  %v3310_v36 = vpop.f32.mrb[30].mxu1 }
 0xefb   :  { %v2275_v57 = vmul.f32 1.442695, %v2266_v29  ;;  %v3361_v27 = vadd.f32 %v3310_v36, %v3282_v18  ;;  %v1958_v12 = vpop.f32.mrb[35].mxu0  ;;  %v2228_v38 = vpop.f32.mrb[31].mxu1 }
 0xefc   :  { %v2273_v59 = vmul.f32 1.442695, %v2265_v4  ;;  %v3362_v42 = vadd.f32 %v2228_v38, %v1958_v12 }
 0xefd   :  { %3445 = vpow2.f32 %v2275_v57  ;;  %v2268_v7 = vsub.f32 0.0, %v3361_v27 }
 0xefe   :  { %3447 = vpow2.f32 %v2273_v59  ;;  %v2267_v33 = vsub.f32 0.0, %v3362_v42  ;;  %v3285_v48 = vpop.f32.mrb[36].mxu0  ;;  %v3313_v54 = vpop.f32.mrb[32].mxu1 }
 0xeff   :  { %v2279_v22 = vmul.f32 1.442695, %v2268_v7  ;;  %v3363_v47 = vadd.f32 %v3313_v54, %v3285_v48  ;;  %v1968_v3 = vpop.f32.mrb[37].mxu0  ;;  %v2238_v37 = vpop.f32.mrb[33].mxu1 }
 0xf00   :  { %v2277_v50 = vmul.f32 1.442695, %v2267_v33  ;;  %v3364_v30 = vadd.f32 %v2238_v37, %v1968_v3 }
 0xf01   :  { %3449 = vpow2.f32 %v2279_v22  ;;  %v2270_v21 = vsub.f32 0.0, %v3363_v47 }
 0xf02   :  { %3451 = vpow2.f32 %v2277_v50  ;;  %v2269_v2 = vsub.f32 0.0, %v3364_v30  ;;  %v3288_v5 = vpop.f32.mrb[38].mxu0  ;;  %v3316_v40 = vpop.f32.mrb[34].mxu1 }
 0xf03   :  { %v2283_v15 = vmul.f32 1.442695, %v2270_v21  ;;  %v3365_v8 = vadd.f32 %v3316_v40, %v3288_v5  ;;  %v1978_v19 = vpop.f32.mrb[39].mxu0  ;;  %v2248_v32 = vpop.f32.mrb[35].mxu1 }
 0xf04   :  { %v2281_v0 = vmul.f32 1.442695, %v2269_v2  ;;  %v3366_v26 = vadd.f32 %v2248_v32, %v1978_v19 }
 0xf05   :  { %3453 = vpow2.f32 %v2283_v15  ;;  %v2272_v44 = vsub.f32 0.0, %v3365_v8 }
 0xf06   :  { %3455 = vpow2.f32 %v2281_v0  ;;  %v2271_v1 = vsub.f32 0.0, %v3366_v26 }
 0xf07   :  { %v3446_v13 = vpop.eup %3445  ;;  %v2287_v14 = vmul.f32 1.442695, %v2272_v44 }
 0xf08   :  { %v3448_v35 = vpop.eup %3447  ;;  %v2290_v23 = vadd.f32 1.0, %v3446_v13  ;;  %v2285_v56 = vmul.f32 1.442695, %v2271_v1 }
 0xf09   :  { %v2289_v25 = vadd.f32 1.0, %v3448_v35  ;;  %3457 = vpow2.f32 %v2287_v14 }
 0xf0a   :  { %3459 = vrcp.f32 %v2290_v23 }
 0xf0b   :  { %v3450_v34 = vpop.eup %3449  ;;  %3461 = vrcp.f32 %v2289_v25 }
 0xf0c   :  { %v3452_v39 = vpop.eup %3451  ;;  %v2292_v20 = vadd.f32 1.0, %v3450_v34  ;;  %3463 = vpow2.f32 %v2285_v56 }
 0xf0d   :  { %v2291_v49 = vadd.f32 1.0, %v3452_v39 }
 0xf0e   :  { %3465 = vrcp.f32 %v2292_v20 }
 0xf0f   :  { %v3454_v55 = vpop.eup %3453  ;;  %3467 = vrcp.f32 %v2291_v49 }
 0xf10   :  { %v3456_v58 = vpop.eup %3455  ;;  %v2294_v45 = vadd.f32 1.0, %v3454_v55 }
 0xf11   :  { %v2293_v62 = vadd.f32 1.0, %v3456_v58 }
 0xf12   :  { %3469 = vrcp.f32 %v2294_v45 }
 0xf13   :  { %v3458_v17 = vpop.eup %3457  ;;  %3471 = vrcp.f32 %v2293_v62 }
 0xf14   :  { %v3460_v43 = vpop.eup %3459  ;;  %v2296_v16 = vadd.f32 1.0, %v3458_v17 }
 0xf15   :  { %v3462_v28 = vpop.eup %3461  ;;  %2315 = vst.msk [vmem:[%s4418_s6 + $0x8] sm:$0xff] %vm2313_vm3, %v3460_v43 }
 0xf16   :  { %v3464_v63 = vpop.eup %3463  ;;  %2314 = vst.msk [vmem:[%s4418_s6] sm:$0xff] %vm2313_vm3, %v3462_v28  ;;  %3473 = vrcp.f32 %v2296_v16 }
 0xf17   :  { %v2295_v46 = vadd.f32 1.0, %v3464_v63 }
 0xf18   :  { %v3466_v9 = vpop.eup %3465 }
 0xf19   :  { %v3468_v31 = vpop.eup %3467  ;;  %2317 = vst.msk [vmem:[%s4418_s6 + $0x18] sm:$0xff] %vm2313_vm3, %v3466_v9  ;;  %3475 = vrcp.f32 %v2295_v46 }
 0xf1a   :  { %2316 = vst.msk [vmem:[%s4418_s6 + $0x10] sm:$0xff] %vm2313_vm3, %v3468_v31 }
 0xf1c   :  { %v3470_v51 = vpop.eup %3469 }
 0xf1d   :  { %v3472_v41 = vpop.eup %3471  ;;  %2319 = vst.msk [vmem:[%s4418_s6 + $0x28] sm:$0xff] %vm2313_vm3, %v3470_v51 }
 0xf1e   :  { %2318 = vst.msk [vmem:[%s4418_s6 + $0x20] sm:$0xff] %vm2313_vm3, %v3472_v41 }
 0xf20   :  { %v3474_v53 = vpop.eup %3473 }
 0xf21   :  { %2321 = vst.msk [vmem:[%s4418_s6 + $0x38] sm:$0xff] %vm2313_vm3, %v3474_v53 }
 0xf23   :  { %v3476_v11 = vpop.eup %3475 }
 0xf24   :  { %2320 = vst.msk [vmem:[%s4418_s6 + $0x30] sm:$0xff] %vm2313_vm3, %v3476_v11 }
 0xf26   :  { %v3349_v6 = vpop.f32.mrb[36].mxu1 }
 0xf27   :  { %v2749_v24 = vsub.f32 0.0, %v3349_v6  ;;  %v2701_v60 = vpop.f32.mrb[37].mxu1 }
 0xf28   :  { %v2748_v10 = vsub.f32 0.0, %v2701_v60 }
 0xf29   :  { %v2758_v52 = vmul.f32 1.442695, %v2749_v24 }
 0xf2a   :  { %v2756_v61 = vmul.f32 1.442695, %v2748_v10  ;;  %v3352_v29 = vpop.f32.mrb[38].mxu1 }
 0xf2b   :  { %3477 = vpow2.f32 %v2758_v52  ;;  %v2751_v4 = vsub.f32 0.0, %v3352_v29  ;;  %v2711_v18 = vpop.f32.mrb[39].mxu1 }
 0xf2c   :  { %3479 = vpow2.f32 %v2756_v61  ;;  %v2750_v36 = vsub.f32 0.0, %v2711_v18 }
 0xf2d   :  { %v2762_v57 = vmul.f32 1.442695, %v2751_v4 }
 0xf2e   :  { %v2760_v27 = vmul.f32 1.442695, %v2750_v36  ;;  %v3355_v12 = vpop.f32.mrb[40].mxu1 }
 0xf2f   :  { %3481 = vpow2.f32 %v2762_v57  ;;  %v2753_v38 = vsub.f32 0.0, %v3355_v12  ;;  %v2721_v59 = vpop.f32.mrb[41].mxu1 }
 0xf30   :  { %3483 = vpow2.f32 %v2760_v27  ;;  %v2752_v42 = vsub.f32 0.0, %v2721_v59 }
 0xf31   :  { %v2766_v7 = vmul.f32 1.442695, %v2753_v38 }
 0xf32   :  { %v2764_v33 = vmul.f32 1.442695, %v2752_v42  ;;  %v3358_v48 = vpop.f32.mrb[42].mxu1 }
 0xf33   :  { %3485 = vpow2.f32 %v2766_v7  ;;  %v2755_v54 = vsub.f32 0.0, %v3358_v48  ;;  %v2731_v22 = vpop.f32.mrb[43].mxu1 }
 0xf34   :  { %3487 = vpow2.f32 %v2764_v33  ;;  %v2754_v47 = vsub.f32 0.0, %v2731_v22 }
 0xf35   :  { %v3478_v3 = vpop.eup %3477  ;;  %v2770_v37 = vmul.f32 1.442695, %v2755_v54 }
 0xf36   :  { %v3480_v50 = vpop.eup %3479  ;;  %v2773_v30 = vadd.f32 1.0, %v3478_v3  ;;  %v2768_v21 = vmul.f32 1.442695, %v2754_v47 }
 0xf37   :  { %v2772_v2 = vadd.f32 1.0, %v3480_v50  ;;  %3489 = vpow2.f32 %v2770_v37 }
 0xf38   :  { %3491 = vrcp.f32 %v2773_v30 }
 0xf39   :  { %v3482_v5 = vpop.eup %3481  ;;  %3493 = vrcp.f32 %v2772_v2 }
 0xf3a   :  { %v3484_v40 = vpop.eup %3483  ;;  %v2775_v15 = vadd.f32 1.0, %v3482_v5  ;;  %3495 = vpow2.f32 %v2768_v21 }
 0xf3b   :  { %v2774_v8 = vadd.f32 1.0, %v3484_v40 }
 0xf3c   :  { %3497 = vrcp.f32 %v2775_v15 }
 0xf3d   :  { %v3486_v19 = vpop.eup %3485  ;;  %3499 = vrcp.f32 %v2774_v8 }
 0xf3e   :  { %v3488_v32 = vpop.eup %3487  ;;  %v2777_v0 = vadd.f32 1.0, %v3486_v19 }
 0xf3f   :  { %v2776_v26 = vadd.f32 1.0, %v3488_v32 }
 0xf40   :  { %3501 = vrcp.f32 %v2777_v0 }
 0xf41   :  { %v3490_v44 = vpop.eup %3489  ;;  %3503 = vrcp.f32 %v2776_v26 }
 0xf42   :  { %v3492_v1 = vpop.eup %3491  ;;  %v2779_v13 = vadd.f32 1.0, %v3490_v44 }
 0xf43   :  { %v3494_v14 = vpop.eup %3493  ;;  %2972 = vst.msk [vmem:[%s4418_s6 + $0x48] sm:$0xff] %vm2313_vm3, %v3492_v1 }
 0xf44   :  { %v3496_v35 = vpop.eup %3495  ;;  %2971 = vst.msk [vmem:[%s4418_s6 + $0x40] sm:$0xff] %vm2313_vm3, %v3494_v14  ;;  %3505 = vrcp.f32 %v2779_v13 }
 0xf45   :  { %v2778_v23 = vadd.f32 1.0, %v3496_v35 }
 0xf46   :  { %v3498_v56 = vpop.eup %3497 }
 0xf47   :  { %v3500_v25 = vpop.eup %3499  ;;  %2974 = vst.msk [vmem:[%s4418_s6 + $0x58] sm:$0xff] %vm2313_vm3, %v3498_v56  ;;  %3507 = vrcp.f32 %v2778_v23 }
 0xf48   :  { %2973 = vst.msk [vmem:[%s4418_s6 + $0x50] sm:$0xff] %vm2313_vm3, %v3500_v25 }
 0xf4a   :  { %v3502_v34 = vpop.eup %3501 }
 0xf4b   :  { %v3504_v39 = vpop.eup %3503  ;;  %2976 = vst.msk [vmem:[%s4418_s6 + $0x68] sm:$0xff] %vm2313_vm3, %v3502_v34 }
 0xf4c   :  { %2975 = vst.msk [vmem:[%s4418_s6 + $0x60] sm:$0xff] %vm2313_vm3, %v3504_v39 }
 0xf4e   :  { %v3506_v20 = vpop.eup %3505 }
 0xf4f   :  { %2978 = vst.msk [vmem:[%s4418_s6 + $0x78] sm:$0xff] %vm2313_vm3, %v3506_v20 }
 0xf51   :  { %v3508_v49 = vpop.eup %3507 }
 0xf52   :  { %2977 = vst.msk [vmem:[%s4418_s6 + $0x70] sm:$0xff] %vm2313_vm3, %v3508_v49 }

</bundles_post_ra>
